<compile_context>
chip_gen: v7x
topology: tpu7x:2x2x1
jax: 0.10.0
libtpu: 0.0.40
codegen_flags: <defaults>
</compile_context>

<pallas_src>
import numpy as np
import jax
import jax.numpy as jnp
from jax import lax
from jax.experimental import pallas as pl
from jax.experimental.pallas import tpu as pltpu

# ---- BasedNet hyper-params (small, but shape-consistent: the final pooled width must
#      be 10 so that Linear in_features == n_channels * 10 * n_conv_chs). ----
B = 2                       # batch
C = 4                       # n_channels
F = 8                       # n_conv_chs
NC = 16                     # n_classes
SFREQ = 10
INPUT_SIZE_S = 42.4
TCONV_SIZE_S = 0.5
T = int(np.ceil(INPUT_SIZE_S * SFREQ))      # 424  input_size
K = int(np.ceil(TCONV_SIZE_S * SFREQ))      # 5    temporal_conv_size
T1 = T - K + 1                              # 420  conv1 output width
P1 = 5
W2 = T1 // P1                               # 84   after MaxPool2d((1,5))
W3 = W2 - K + 1                             # 80   conv2 output width
P2 = 8
W4 = W3 // P2                               # 10   after MaxPool2d((1,8))
DFLAT = F * C * W4                          # 320 == n_channels*10*n_conv_chs
BN_EPS = 1e-5

T1M = P1 * (W2 - 1) + 1                     # 416  running-max length (stage 1)
W3M = P2 * (W4 - 1) + 1                     # 73   running-max length (stage 2)
CB = C * B                                  # 8    stacked rows (spatial chan x batch)
FCB = F * CB                                # 64   stacked rows (feature x chan x batch)
assert DFLAT == C * 10 * F


def basednet_kernel(xs_ref, wsb_ref, bsb_ref, w1cat_ref, sh1c_ref, s5_ref,
                    w2cat_ref, sc2_ref, sh2_ref, s8_ref, p8_ref, wlc_ref,
                    bl_ref, out_ref):
    hi = lax.Precision.HIGHEST   # only on the two tiny stage-0/1 dots (depth 8 / 40)
    lo = lax.Precision.DEFAULT   # single bf16 MXU pass everywhere else
    f32 = jnp.float32

    # --- spatial conv Conv2d(1,C,(C,1)) + ReLU, block-diagonal over batch: (CB, T).
    y = jnp.dot(wsb_ref[...], xs_ref[...], preferred_element_type=f32, precision=hi)
    y = jnp.maximum(y + bsb_ref[...], 0.0)

    # --- temporal conv 1 Conv2d(1,F,(1,K)) + folded BN as ONE MXU contraction:
    #     w1cat = [kron((w1[:,k]*sc1)[:,None], I_CB)]_k  (FCB, K*CB) against the K
    #     shifted y slices stacked along sublanes (K*CB, T1).  (was a VALU FMA loop)
    ycat = jnp.concatenate([y[:, k:k + T1] for k in range(K)], axis=0)   # (K*CB, T1)
    z1 = jnp.dot(w1cat_ref[...], ycat, preferred_element_type=f32, precision=hi)
    z1 = z1 + sh1c_ref[...]                                              # (FCB, T1)

    # --- MaxPool(1,5): running max over the window, then a single 0/1-selection
    #     matmul picking every 5th column (DEFAULT: MXU rounds m1 to bf16, no casts).
    m1 = z1[:, 0:T1M]
    for j in range(1, P1):
        m1 = jnp.maximum(m1, z1[:, j:j + T1M])
    p1 = jnp.dot(m1, s5_ref[...], preferred_element_type=f32, precision=lo)
    p1 = jnp.maximum(p1, 0.0)                                            # (FCB, W2)

    # --- temporal conv 2 Conv2d(F,F,(1,K)) + folded BN as ONE depth-(K*FCB) MXU
    #     contraction; p1 is already bf16-limited so DEFAULT precision is lossless
    #     on the data operand.
    p1cat = jnp.concatenate([p1[:, k:k + W3] for k in range(K)], axis=0)  # (K*FCB, W3)
    z2 = jnp.dot(w2cat_ref[...], p1cat, preferred_element_type=f32, precision=lo)
    z2 = z2 * sc2_ref[...] + sh2_ref[...]                                # (FCB, W3)

    # --- MaxPool(1,8): running max, ReLU (commutes with 0/1 selection), then ONE
    #     un-placed selection matmul (FCB, W3M) @ (W3M, W4).
    m2 = z2[:, 0:W3M]
    for j in range(1, P2):
        m2 = jnp.maximum(m2, z2[:, j:j + W3M])
    m2 = jnp.maximum(m2, 0.0)                                            # (FCB, W3M)
    sel = jnp.dot(m2, s8_ref[...], preferred_element_type=f32, precision=lo)  # (FCB,W4)

    # --- placement: lay feature f into lanes [f*W4,(f+1)*W4) with F tiny depth-W4
    #     matmuls (accumulated) -> (CB, F*W4).
    pooled = jnp.dot(sel[0:CB, :], p8_ref[0], preferred_element_type=f32, precision=lo)
    for f in range(1, F):
        pooled = pooled + jnp.dot(sel[f * CB:(f + 1) * CB, :], p8_ref[f],
                                  preferred_element_type=f32, precision=lo)

    # --- Linear: contract each spatial channel's (B, F*W4) block with its weight
    #     slice (PyTorch flatten order (f, c, w) is baked into wlc on the host).
    acc = jnp.dot(pooled[0:B, :], wlc_ref[0], preferred_element_type=f32, precision=lo)
    for c in range(1, C):
        acc = acc + jnp.dot(pooled[c * B:(c + 1) * B, :], wlc_ref[c],
                            preferred_element_type=f32, precision=lo)
    out_ref[...] = acc + bl_ref[...]                                     # (B, NC)


@jax.jit
def basednet_forward(x, kparams):
    (wsb, bsb, w1cat, sh1c, s5, w2cat, sc2c, sh2c, s8, p8, wlc, bl2) = kparams
    xs = x.transpose(1, 0, 2).reshape(CB, T)                # rows = c*B + b
    out = pl.pallas_call(
        basednet_kernel,
        out_shape=jax.ShapeDtypeStruct((B, NC), jnp.float32),
        grid=(1,),
        in_specs=[
            pl.BlockSpec((CB, T), lambda i: (0, 0)),             # stacked input
            pl.BlockSpec((CB, CB), lambda i: (0, 0)),            # kron spatial weight
            pl.BlockSpec((CB, 1), lambda i: (0, 0)),             # spatial bias per row
            pl.BlockSpec((FCB, K * CB), lambda i: (0, 0)),       # kron conv1 w (+BN sc)
            pl.BlockSpec((FCB, 1), lambda i: (0, 0)),            # BN1 shift per row
            pl.BlockSpec((T1M, W2), lambda i: (0, 0)),           # pool-1 0/1 select
            pl.BlockSpec((FCB, K * FCB), lambda i: (0, 0)),      # kron-stacked conv2 w
            pl.BlockSpec((FCB, 1), lambda i: (0, 0)),            # BN2 scale per row
            pl.BlockSpec((FCB, 1), lambda i: (0, 0)),            # BN2 shift per row
            pl.BlockSpec((W3M, W4), lambda i: (0, 0)),           # pool-2 0/1 select
            pl.BlockSpec((F, W4, F * W4), lambda i: (0, 0, 0)),  # per-f 0/1 placement
            pl.BlockSpec((C, F * W4, NC), lambda i: (0, 0, 0)),  # linear weight per c
            pl.BlockSpec((1, NC), lambda i: (0, 0)),             # linear bias
        ],
        out_specs=pl.BlockSpec((B, NC), lambda i: (0, 0)),
        compiler_params=pltpu.CompilerParams(dimension_semantics=("arbitrary",)),
    )(xs, wsb, bsb, w1cat, sh1c, s5, w2cat, sc2c, sh2c, s8, p8, wlc, bl2)
    return out


def init_params(key):
    ks = jax.random.split(key, 16)

    def unif(k, shape, fan_in):
        lim = 1.0 / np.sqrt(fan_in)
        return jax.random.uniform(k, shape, jnp.float32, -lim, lim)

    ws = unif(ks[0], (C, C), C)                 # Conv2d(1,C,(C,1)) weight [co, ci]
    bs = unif(ks[1], (C, 1), C)
    w1 = unif(ks[2], (F, K), K)                 # Conv2d(1,F,(1,K)) weight [f, k]
    b1 = unif(ks[3], (F,), K)
    g1 = 1.0 + 0.1 * jax.random.normal(ks[4], (F,), jnp.float32)
    be1 = 0.1 * jax.random.normal(ks[5], (F,), jnp.float32)
    mu1 = 0.1 * jax.random.normal(ks[6], (F,), jnp.float32)
    v1 = 1.0 + 0.1 * jnp.abs(jax.random.normal(ks[7], (F,), jnp.float32))
    w2 = unif(ks[8], (F, F, K), F * K)          # Conv2d(F,F,(1,K)) weight [f, g, k]
    b2 = unif(ks[9], (F,), F * K)
    g2 = 1.0 + 0.1 * jax.random.normal(ks[10], (F,), jnp.float32)
    be2 = 0.1 * jax.random.normal(ks[11], (F,), jnp.float32)
    mu2 = 0.1 * jax.random.normal(ks[12], (F,), jnp.float32)
    v2 = 1.0 + 0.1 * jnp.abs(jax.random.normal(ks[13], (F,), jnp.float32))
    wl = unif(ks[14], (NC, DFLAT), DFLAT)       # Linear weight
    bl = unif(ks[15], (NC,), DFLAT)

    raw = dict(ws=ws, bs=bs, w1=w1, b1=b1, g1=g1, be1=be1, mu1=mu1, v1=v1,
               w2=w2, b2=b2, g2=g2, be2=be2, mu2=mu2, v2=v2, wl=wl, bl=bl)

    # fold conv bias + eval-mode BatchNorm into per-feature scale / shift
    sc1 = g1 / jnp.sqrt(v1 + BN_EPS)
    sh1 = (b1 - mu1) * sc1 + be1
    sc2 = g2 / jnp.sqrt(v2 + BN_EPS)
    sh2 = (b2 - mu2) * sc2 + be2

    # batch / feature folded (kron) weights so the kernel runs on full 8-row tiles
    wsb = jnp.kron(ws, jnp.eye(B, dtype=jnp.float32))                  # (CB, CB)
    bsb = jnp.repeat(bs.reshape(C), B).reshape(CB, 1)                  # (CB, 1)
    w1cat = jnp.concatenate(                                           # (FCB, K*CB)
        [jnp.kron((w1[:, k] * sc1)[:, None], jnp.eye(CB, dtype=jnp.float32))
         for k in range(K)], axis=1)
    sh1c = jnp.repeat(sh1, CB).reshape(FCB, 1)
    w2cat = jnp.concatenate(                                           # (FCB, K*FCB)
        [jnp.kron(w2[:, :, k], jnp.eye(CB, dtype=jnp.float32)) for k in range(K)],
        axis=1)
    sc2c = jnp.repeat(sc2, CB).reshape(FCB, 1)
    sh2c = jnp.repeat(sh2, CB).reshape(FCB, 1)

    # 0/1 "pick every p-th column" + placement matrices (hoisted out of the kernel;
    # kept f32 — the MXU rounds the data operand at DEFAULT precision, no VPU casts)
    s5 = np.zeros((T1M, W2), np.float32)
    s5[P1 * np.arange(W2), np.arange(W2)] = 1.0
    s8 = np.zeros((W3M, W4), np.float32)
    s8[P2 * np.arange(W4), np.arange(W4)] = 1.0
    p8 = np.zeros((F, W4, F * W4), np.float32)
    for f in range(F):
        p8[f, np.arange(W4), f * W4 + np.arange(W4)] = 1.0

    # linear weight regrouped per spatial channel: wlc[c, f*W4 + w, n]
    wlc = wl.reshape(NC, F, C, W4).transpose(2, 1, 3, 0).reshape(C, F * W4, NC)

    kparams = (wsb, bsb, w1cat, sh1c, jnp.asarray(s5), w2cat, sc2c, sh2c,
               jnp.asarray(s8), jnp.asarray(p8), wlc, bl.reshape(1, NC))
    return raw, kparams


def reference_forward(x, raw):
    hp = lax.Precision.HIGHEST
    y = jnp.einsum('oc,bct->bot', raw['ws'], x, precision=hp) \
        + raw['bs'][:, 0][None, :, None]
    y = jnp.maximum(y, 0.0)                                           # (B, C, T)
    st1 = jnp.stack([y[:, :, k:k + T1] for k in range(K)], axis=-1)   # (B, C, T1, K)
    z1 = jnp.einsum('bctk,fk->bfct', st1, raw['w1'], precision=hp) \
        + raw['b1'][None, :, None, None]
    z1 = (z1 - raw['mu1'][None, :, None, None]) \
        / jnp.sqrt(raw['v1'] + BN_EPS)[None, :, None, None] \
        * raw['g1'][None, :, None, None] + raw['be1'][None, :, None, None]
    z1 = z1.reshape(B, F, C, W2, P1).max(axis=-1)
    z1 = jnp.maximum(z1, 0.0)                                         # (B, F, C, W2)
    st2 = jnp.stack([z1[:, :, :, k:k + W3] for k in range(K)], axis=-1)
    z2 = jnp.einsum('bgcwk,fgk->bfcw', st2, raw['w2'], precision=hp) \
        + raw['b2'][None, :, None, None]
    z2 = (z2 - raw['mu2'][None, :, None, None]) \
        / jnp.sqrt(raw['v2'] + BN_EPS)[None, :, None, None] \
        * raw['g2'][None, :, None, None] + raw['be2'][None, :, None, None]
    z2 = z2.reshape(B, F, C, W4, P2).max(axis=-1)
    z2 = jnp.maximum(z2, 0.0)
    flat = z2.reshape(B, DFLAT)
    return jnp.dot(flat, raw['wl'].T, precision=hp) + raw['bl'][None, :]


if __name__ == "__main__":
    key = jax.random.PRNGKey(0)
    k_x, k_p = jax.random.split(key)
    x = jax.random.normal(k_x, (B, C, T), jnp.float32)
    raw, kparams = init_params(k_p)

    out = jax.block_until_ready(basednet_forward(x, kparams))
    assert out.shape == (B, NC), out.shape

    ref = jax.block_until_ready(reference_forward(x, raw))
    err = float(np.max(np.abs(np.asarray(out) - np.asarray(ref))))
    assert np.allclose(np.asarray(out), np.asarray(ref), rtol=1e-2, atol=1e-2), err

    print("KERNEL_OK")
</pallas_src>

<mosaic_0001>
module attributes {stable_mosaic.version = 11 : i64} {
  func.func @basednet_kernel(%arg0: i32, %arg1: memref<8x424xf32, #tpu.memory_space<vmem>>, %arg2: memref<8x8xf32, #tpu.memory_space<vmem>>, %arg3: memref<8x1xf32, #tpu.memory_space<vmem>>, %arg4: memref<64x40xf32, #tpu.memory_space<vmem>>, %arg5: memref<64x1xf32, #tpu.memory_space<vmem>>, %arg6: memref<416x84xf32, #tpu.memory_space<vmem>>, %arg7: memref<64x320xf32, #tpu.memory_space<vmem>>, %arg8: memref<64x1xf32, #tpu.memory_space<vmem>>, %arg9: memref<64x1xf32, #tpu.memory_space<vmem>>, %arg10: memref<73x10xf32, #tpu.memory_space<vmem>>, %arg11: memref<8x10x80xf32, #tpu.memory_space<vmem>>, %arg12: memref<4x80x16xf32, #tpu.memory_space<vmem>>, %arg13: memref<1x16xf32, #tpu.memory_space<vmem>>, %arg14: memref<2x16xf32, #tpu.memory_space<vmem>>) attributes {dimension_semantics = [#tpu.dimension_semantics<arbitrary>], iteration_bounds = array<i64: 1>, scalar_prefetch = 0 : i64, scratch_operands = 0 : i64, tpu.core_type = #tpu.core_type<tc>, window_params = [{pipeline_mode = #tpu.pipeline_mode<synchronous>, transform_indices = @transform_0, window_bounds = array<i64: 8, 424>}, {pipeline_mode = #tpu.pipeline_mode<synchronous>, transform_indices = @transform_1, window_bounds = array<i64: 8, 8>}, {pipeline_mode = #tpu.pipeline_mode<synchronous>, transform_indices = @transform_2, window_bounds = array<i64: 8, 1>}, {pipeline_mode = #tpu.pipeline_mode<synchronous>, transform_indices = @transform_3, window_bounds = array<i64: 64, 40>}, {pipeline_mode = #tpu.pipeline_mode<synchronous>, transform_indices = @transform_4, window_bounds = array<i64: 64, 1>}, {pipeline_mode = #tpu.pipeline_mode<synchronous>, transform_indices = @transform_5, window_bounds = array<i64: 416, 84>}, {pipeline_mode = #tpu.pipeline_mode<synchronous>, transform_indices = @transform_6, window_bounds = array<i64: 64, 320>}, {pipeline_mode = #tpu.pipeline_mode<synchronous>, transform_indices = @transform_7, window_bounds = array<i64: 64, 1>}, {pipeline_mode = #tpu.pipeline_mode<synchronous>, transform_indices = @transform_8, window_bounds = array<i64: 64, 1>}, {pipeline_mode = #tpu.pipeline_mode<synchronous>, transform_indices = @transform_9, window_bounds = array<i64: 73, 10>}, {pipeline_mode = #tpu.pipeline_mode<synchronous>, transform_indices = @transform_10, window_bounds = array<i64: 8, 10, 80>}, {pipeline_mode = #tpu.pipeline_mode<synchronous>, transform_indices = @transform_11, window_bounds = array<i64: 4, 80, 16>}, {pipeline_mode = #tpu.pipeline_mode<synchronous>, transform_indices = @transform_12, window_bounds = array<i64: 1, 16>}, {pipeline_mode = #tpu.pipeline_mode<synchronous>, transform_indices = @transform_13, window_bounds = array<i64: 2, 16>}]} {
    %c0 = arith.constant 0 : index
    %c0_0 = arith.constant 0 : index
    %0 = vector.load %arg2[%c0, %c0_0] : memref<8x8xf32, #tpu.memory_space<vmem>>, vector<8x8xf32>
    %c0_1 = arith.constant 0 : index
    %c0_2 = arith.constant 0 : index
    %1 = vector.load %arg1[%c0_1, %c0_2] : memref<8x424xf32, #tpu.memory_space<vmem>>, vector<8x424xf32>
    %cst = arith.constant dense<0.000000e+00> : vector<8x424xf32>
    %2 = tpu.matmul %0, %1, %cst {dimension_numbers = #tpu.dot_dimension_numbers<[1], [0], [0], [1], [0, 0, 1, 1], [], []>, precision = #tpu.contract_precision<fp32>} : vector<8x8xf32>, vector<8x424xf32>, vector<8x424xf32> -> vector<8x424xf32>
    %c0_3 = arith.constant 0 : index
    %c0_4 = arith.constant 0 : index
    %3 = vector.load %arg3[%c0_3, %c0_4] : memref<8x1xf32, #tpu.memory_space<vmem>>, vector<8x1xf32>
    %4 = vector.broadcast %3 : vector<8x1xf32> to vector<8x424xf32>
    %5 = arith.addf %2, %4 : vector<8x424xf32>
    %cst_5 = arith.constant 0.000000e+00 : f32
    %6 = vector.broadcast %cst_5 : f32 to vector<8x424xf32>
    %7 = arith.maximumf %5, %6 : vector<8x424xf32>
    %8 = vector.extract_strided_slice %7 {offsets = [0, 0], sizes = [8, 420], strides = [1, 1]} : vector<8x424xf32> to vector<8x420xf32>
    %9 = vector.extract_strided_slice %7 {offsets = [0, 1], sizes = [8, 420], strides = [1, 1]} : vector<8x424xf32> to vector<8x420xf32>
    %10 = vector.extract_strided_slice %7 {offsets = [0, 2], sizes = [8, 420], strides = [1, 1]} : vector<8x424xf32> to vector<8x420xf32>
    %11 = vector.extract_strided_slice %7 {offsets = [0, 3], sizes = [8, 420], strides = [1, 1]} : vector<8x424xf32> to vector<8x420xf32>
    %12 = vector.extract_strided_slice %7 {offsets = [0, 4], sizes = [8, 420], strides = [1, 1]} : vector<8x424xf32> to vector<8x420xf32>
    %13 = tpu.concatenate %8, %9, %10, %11, %12 in 0 : vector<8x420xf32>, vector<8x420xf32>, vector<8x420xf32>, vector<8x420xf32>, vector<8x420xf32> -> vector<40x420xf32>
    %c0_6 = arith.constant 0 : index
    %c0_7 = arith.constant 0 : index
    %14 = vector.load %arg4[%c0_6, %c0_7] : memref<64x40xf32, #tpu.memory_space<vmem>>, vector<64x40xf32>
    %cst_8 = arith.constant dense<0.000000e+00> : vector<64x420xf32>
    %15 = tpu.matmul %14, %13, %cst_8 {dimension_numbers = #tpu.dot_dimension_numbers<[1], [0], [0], [1], [0, 0, 1, 1], [], []>, precision = #tpu.contract_precision<fp32>} : vector<64x40xf32>, vector<40x420xf32>, vector<64x420xf32> -> vector<64x420xf32>
    %c0_9 = arith.constant 0 : index
    %c0_10 = arith.constant 0 : index
    %16 = vector.load %arg5[%c0_9, %c0_10] : memref<64x1xf32, #tpu.memory_space<vmem>>, vector<64x1xf32>
    %17 = vector.broadcast %16 : vector<64x1xf32> to vector<64x420xf32>
    %18 = arith.addf %15, %17 : vector<64x420xf32>
    %19 = vector.extract_strided_slice %18 {offsets = [0, 0], sizes = [64, 416], strides = [1, 1]} : vector<64x420xf32> to vector<64x416xf32>
    %20 = vector.extract_strided_slice %18 {offsets = [0, 1], sizes = [64, 416], strides = [1, 1]} : vector<64x420xf32> to vector<64x416xf32>
    %21 = arith.maximumf %19, %20 : vector<64x416xf32>
    %22 = vector.extract_strided_slice %18 {offsets = [0, 2], sizes = [64, 416], strides = [1, 1]} : vector<64x420xf32> to vector<64x416xf32>
    %23 = arith.maximumf %21, %22 : vector<64x416xf32>
    %24 = vector.extract_strided_slice %18 {offsets = [0, 3], sizes = [64, 416], strides = [1, 1]} : vector<64x420xf32> to vector<64x416xf32>
    %25 = arith.maximumf %23, %24 : vector<64x416xf32>
    %26 = vector.extract_strided_slice %18 {offsets = [0, 4], sizes = [64, 416], strides = [1, 1]} : vector<64x420xf32> to vector<64x416xf32>
    %27 = arith.maximumf %25, %26 : vector<64x416xf32>
    %c0_11 = arith.constant 0 : index
    %c0_12 = arith.constant 0 : index
    %28 = vector.load %arg6[%c0_11, %c0_12] : memref<416x84xf32, #tpu.memory_space<vmem>>, vector<416x84xf32>
    %cst_13 = arith.constant dense<0.000000e+00> : vector<64x84xf32>
    %29 = tpu.matmul %27, %28, %cst_13 {dimension_numbers = #tpu.dot_dimension_numbers<[1], [0], [0], [1], [0, 0, 1, 1], [], []>} : vector<64x416xf32>, vector<416x84xf32>, vector<64x84xf32> -> vector<64x84xf32>
    %cst_14 = arith.constant 0.000000e+00 : f32
    %30 = vector.broadcast %cst_14 : f32 to vector<64x84xf32>
    %31 = arith.maximumf %29, %30 : vector<64x84xf32>
    %32 = vector.extract_strided_slice %31 {offsets = [0, 0], sizes = [64, 80], strides = [1, 1]} : vector<64x84xf32> to vector<64x80xf32>
    %33 = vector.extract_strided_slice %31 {offsets = [0, 1], sizes = [64, 80], strides = [1, 1]} : vector<64x84xf32> to vector<64x80xf32>
    %34 = vector.extract_strided_slice %31 {offsets = [0, 2], sizes = [64, 80], strides = [1, 1]} : vector<64x84xf32> to vector<64x80xf32>
    %35 = vector.extract_strided_slice %31 {offsets = [0, 3], sizes = [64, 80], strides = [1, 1]} : vector<64x84xf32> to vector<64x80xf32>
    %36 = vector.extract_strided_slice %31 {offsets = [0, 4], sizes = [64, 80], strides = [1, 1]} : vector<64x84xf32> to vector<64x80xf32>
    %37 = tpu.concatenate %32, %33, %34, %35, %36 in 0 : vector<64x80xf32>, vector<64x80xf32>, vector<64x80xf32>, vector<64x80xf32>, vector<64x80xf32> -> vector<320x80xf32>
    %c0_15 = arith.constant 0 : index
    %c0_16 = arith.constant 0 : index
    %38 = vector.load %arg7[%c0_15, %c0_16] : memref<64x320xf32, #tpu.memory_space<vmem>>, vector<64x320xf32>
    %cst_17 = arith.constant dense<0.000000e+00> : vector<64x80xf32>
    %39 = tpu.matmul %38, %37, %cst_17 {dimension_numbers = #tpu.dot_dimension_numbers<[1], [0], [0], [1], [0, 0, 1, 1], [], []>} : vector<64x320xf32>, vector<320x80xf32>, vector<64x80xf32> -> vector<64x80xf32>
    %c0_18 = arith.constant 0 : index
    %c0_19 = arith.constant 0 : index
    %40 = vector.load %arg8[%c0_18, %c0_19] : memref<64x1xf32, #tpu.memory_space<vmem>>, vector<64x1xf32>
    %41 = vector.broadcast %40 : vector<64x1xf32> to vector<64x80xf32>
    %42 = arith.mulf %39, %41 : vector<64x80xf32>
    %c0_20 = arith.constant 0 : index
    %c0_21 = arith.constant 0 : index
    %43 = vector.load %arg9[%c0_20, %c0_21] : memref<64x1xf32, #tpu.memory_space<vmem>>, vector<64x1xf32>
    %44 = vector.broadcast %43 : vector<64x1xf32> to vector<64x80xf32>
    %45 = arith.addf %42, %44 : vector<64x80xf32>
    %46 = vector.extract_strided_slice %45 {offsets = [0, 0], sizes = [64, 73], strides = [1, 1]} : vector<64x80xf32> to vector<64x73xf32>
    %47 = vector.extract_strided_slice %45 {offsets = [0, 1], sizes = [64, 73], strides = [1, 1]} : vector<64x80xf32> to vector<64x73xf32>
    %48 = arith.maximumf %46, %47 : vector<64x73xf32>
    %49 = vector.extract_strided_slice %45 {offsets = [0, 2], sizes = [64, 73], strides = [1, 1]} : vector<64x80xf32> to vector<64x73xf32>
    %50 = arith.maximumf %48, %49 : vector<64x73xf32>
    %51 = vector.extract_strided_slice %45 {offsets = [0, 3], sizes = [64, 73], strides = [1, 1]} : vector<64x80xf32> to vector<64x73xf32>
    %52 = arith.maximumf %50, %51 : vector<64x73xf32>
    %53 = vector.extract_strided_slice %45 {offsets = [0, 4], sizes = [64, 73], strides = [1, 1]} : vector<64x80xf32> to vector<64x73xf32>
    %54 = arith.maximumf %52, %53 : vector<64x73xf32>
    %55 = vector.extract_strided_slice %45 {offsets = [0, 5], sizes = [64, 73], strides = [1, 1]} : vector<64x80xf32> to vector<64x73xf32>
    %56 = arith.maximumf %54, %55 : vector<64x73xf32>
    %57 = vector.extract_strided_slice %45 {offsets = [0, 6], sizes = [64, 73], strides = [1, 1]} : vector<64x80xf32> to vector<64x73xf32>
    %58 = arith.maximumf %56, %57 : vector<64x73xf32>
    %59 = vector.extract_strided_slice %45 {offsets = [0, 7], sizes = [64, 73], strides = [1, 1]} : vector<64x80xf32> to vector<64x73xf32>
    %60 = arith.maximumf %58, %59 : vector<64x73xf32>
    %cst_22 = arith.constant 0.000000e+00 : f32
    %61 = vector.broadcast %cst_22 : f32 to vector<64x73xf32>
    %62 = arith.maximumf %60, %61 : vector<64x73xf32>
    %c0_23 = arith.constant 0 : index
    %c0_24 = arith.constant 0 : index
    %63 = vector.load %arg10[%c0_23, %c0_24] : memref<73x10xf32, #tpu.memory_space<vmem>>, vector<73x10xf32>
    %cst_25 = arith.constant dense<0.000000e+00> : vector<64x10xf32>
    %64 = tpu.matmul %62, %63, %cst_25 {dimension_numbers = #tpu.dot_dimension_numbers<[1], [0], [0], [1], [0, 0, 1, 1], [], []>} : vector<64x73xf32>, vector<73x10xf32>, vector<64x10xf32> -> vector<64x10xf32>
    %65 = vector.extract_strided_slice %64 {offsets = [0, 0], sizes = [8, 10], strides = [1, 1]} : vector<64x10xf32> to vector<8x10xf32>
    %c0_26 = arith.constant 0 : index
    %c0_27 = arith.constant 0 : index
    %c0_28 = arith.constant 0 : index
    %66 = vector.load %arg11[%c0_26, %c0_27, %c0_28] : memref<8x10x80xf32, #tpu.memory_space<vmem>>, vector<1x10x80xf32>
    %67 = vector.shape_cast %66 : vector<1x10x80xf32> to vector<10x80xf32>
    %cst_29 = arith.constant dense<0.000000e+00> : vector<8x80xf32>
    %68 = tpu.matmul %65, %67, %cst_29 {dimension_numbers = #tpu.dot_dimension_numbers<[1], [0], [0], [1], [0, 0, 1, 1], [], []>} : vector<8x10xf32>, vector<10x80xf32>, vector<8x80xf32> -> vector<8x80xf32>
    %69 = vector.extract_strided_slice %64 {offsets = [8, 0], sizes = [8, 10], strides = [1, 1]} : vector<64x10xf32> to vector<8x10xf32>
    %c1 = arith.constant 1 : index
    %c0_30 = arith.constant 0 : index
    %c0_31 = arith.constant 0 : index
    %70 = vector.load %arg11[%c1, %c0_30, %c0_31] : memref<8x10x80xf32, #tpu.memory_space<vmem>>, vector<1x10x80xf32>
    %71 = vector.shape_cast %70 : vector<1x10x80xf32> to vector<10x80xf32>
    %cst_32 = arith.constant dense<0.000000e+00> : vector<8x80xf32>
    %72 = tpu.matmul %69, %71, %cst_32 {dimension_numbers = #tpu.dot_dimension_numbers<[1], [0], [0], [1], [0, 0, 1, 1], [], []>} : vector<8x10xf32>, vector<10x80xf32>, vector<8x80xf32> -> vector<8x80xf32>
    %73 = arith.addf %68, %72 : vector<8x80xf32>
    %74 = vector.extract_strided_slice %64 {offsets = [16, 0], sizes = [8, 10], strides = [1, 1]} : vector<64x10xf32> to vector<8x10xf32>
    %c2 = arith.constant 2 : index
    %c0_33 = arith.constant 0 : index
    %c0_34 = arith.constant 0 : index
    %75 = vector.load %arg11[%c2, %c0_33, %c0_34] : memref<8x10x80xf32, #tpu.memory_space<vmem>>, vector<1x10x80xf32>
    %76 = vector.shape_cast %75 : vector<1x10x80xf32> to vector<10x80xf32>
    %cst_35 = arith.constant dense<0.000000e+00> : vector<8x80xf32>
    %77 = tpu.matmul %74, %76, %cst_35 {dimension_numbers = #tpu.dot_dimension_numbers<[1], [0], [0], [1], [0, 0, 1, 1], [], []>} : vector<8x10xf32>, vector<10x80xf32>, vector<8x80xf32> -> vector<8x80xf32>
    %78 = arith.addf %73, %77 : vector<8x80xf32>
    %79 = vector.extract_strided_slice %64 {offsets = [24, 0], sizes = [8, 10], strides = [1, 1]} : vector<64x10xf32> to vector<8x10xf32>
    %c3 = arith.constant 3 : index
    %c0_36 = arith.constant 0 : index
    %c0_37 = arith.constant 0 : index
    %80 = vector.load %arg11[%c3, %c0_36, %c0_37] : memref<8x10x80xf32, #tpu.memory_space<vmem>>, vector<1x10x80xf32>
    %81 = vector.shape_cast %80 : vector<1x10x80xf32> to vector<10x80xf32>
    %cst_38 = arith.constant dense<0.000000e+00> : vector<8x80xf32>
    %82 = tpu.matmul %79, %81, %cst_38 {dimension_numbers = #tpu.dot_dimension_numbers<[1], [0], [0], [1], [0, 0, 1, 1], [], []>} : vector<8x10xf32>, vector<10x80xf32>, vector<8x80xf32> -> vector<8x80xf32>
    %83 = arith.addf %78, %82 : vector<8x80xf32>
    %84 = vector.extract_strided_slice %64 {offsets = [32, 0], sizes = [8, 10], strides = [1, 1]} : vector<64x10xf32> to vector<8x10xf32>
    %c4 = arith.constant 4 : index
    %c0_39 = arith.constant 0 : index
    %c0_40 = arith.constant 0 : index
    %85 = vector.load %arg11[%c4, %c0_39, %c0_40] : memref<8x10x80xf32, #tpu.memory_space<vmem>>, vector<1x10x80xf32>
    %86 = vector.shape_cast %85 : vector<1x10x80xf32> to vector<10x80xf32>
    %cst_41 = arith.constant dense<0.000000e+00> : vector<8x80xf32>
    %87 = tpu.matmul %84, %86, %cst_41 {dimension_numbers = #tpu.dot_dimension_numbers<[1], [0], [0], [1], [0, 0, 1, 1], [], []>} : vector<8x10xf32>, vector<10x80xf32>, vector<8x80xf32> -> vector<8x80xf32>
    %88 = arith.addf %83, %87 : vector<8x80xf32>
    %89 = vector.extract_strided_slice %64 {offsets = [40, 0], sizes = [8, 10], strides = [1, 1]} : vector<64x10xf32> to vector<8x10xf32>
    %c5 = arith.constant 5 : index
    %c0_42 = arith.constant 0 : index
    %c0_43 = arith.constant 0 : index
    %90 = vector.load %arg11[%c5, %c0_42, %c0_43] : memref<8x10x80xf32, #tpu.memory_space<vmem>>, vector<1x10x80xf32>
    %91 = vector.shape_cast %90 : vector<1x10x80xf32> to vector<10x80xf32>
    %cst_44 = arith.constant dense<0.000000e+00> : vector<8x80xf32>
    %92 = tpu.matmul %89, %91, %cst_44 {dimension_numbers = #tpu.dot_dimension_numbers<[1], [0], [0], [1], [0, 0, 1, 1], [], []>} : vector<8x10xf32>, vector<10x80xf32>, vector<8x80xf32> -> vector<8x80xf32>
    %93 = arith.addf %88, %92 : vector<8x80xf32>
    %94 = vector.extract_strided_slice %64 {offsets = [48, 0], sizes = [8, 10], strides = [1, 1]} : vector<64x10xf32> to vector<8x10xf32>
    %c6 = arith.constant 6 : index
    %c0_45 = arith.constant 0 : index
    %c0_46 = arith.constant 0 : index
    %95 = vector.load %arg11[%c6, %c0_45, %c0_46] : memref<8x10x80xf32, #tpu.memory_space<vmem>>, vector<1x10x80xf32>
    %96 = vector.shape_cast %95 : vector<1x10x80xf32> to vector<10x80xf32>
    %cst_47 = arith.constant dense<0.000000e+00> : vector<8x80xf32>
    %97 = tpu.matmul %94, %96, %cst_47 {dimension_numbers = #tpu.dot_dimension_numbers<[1], [0], [0], [1], [0, 0, 1, 1], [], []>} : vector<8x10xf32>, vector<10x80xf32>, vector<8x80xf32> -> vector<8x80xf32>
    %98 = arith.addf %93, %97 : vector<8x80xf32>
    %99 = vector.extract_strided_slice %64 {offsets = [56, 0], sizes = [8, 10], strides = [1, 1]} : vector<64x10xf32> to vector<8x10xf32>
    %c7 = arith.constant 7 : index
    %c0_48 = arith.constant 0 : index
    %c0_49 = arith.constant 0 : index
    %100 = vector.load %arg11[%c7, %c0_48, %c0_49] : memref<8x10x80xf32, #tpu.memory_space<vmem>>, vector<1x10x80xf32>
    %101 = vector.shape_cast %100 : vector<1x10x80xf32> to vector<10x80xf32>
    %cst_50 = arith.constant dense<0.000000e+00> : vector<8x80xf32>
    %102 = tpu.matmul %99, %101, %cst_50 {dimension_numbers = #tpu.dot_dimension_numbers<[1], [0], [0], [1], [0, 0, 1, 1], [], []>} : vector<8x10xf32>, vector<10x80xf32>, vector<8x80xf32> -> vector<8x80xf32>
    %103 = arith.addf %98, %102 : vector<8x80xf32>
    %104 = vector.extract_strided_slice %103 {offsets = [0, 0], sizes = [2, 80], strides = [1, 1]} : vector<8x80xf32> to vector<2x80xf32>
    %c0_51 = arith.constant 0 : index
    %c0_52 = arith.constant 0 : index
    %c0_53 = arith.constant 0 : index
    %105 = vector.load %arg12[%c0_51, %c0_52, %c0_53] : memref<4x80x16xf32, #tpu.memory_space<vmem>>, vector<1x80x16xf32>
    %106 = vector.shape_cast %105 : vector<1x80x16xf32> to vector<80x16xf32>
    %cst_54 = arith.constant dense<0.000000e+00> : vector<2x16xf32>
    %107 = tpu.matmul %104, %106, %cst_54 {dimension_numbers = #tpu.dot_dimension_numbers<[1], [0], [0], [1], [0, 0, 1, 1], [], []>} : vector<2x80xf32>, vector<80x16xf32>, vector<2x16xf32> -> vector<2x16xf32>
    %108 = vector.extract_strided_slice %103 {offsets = [2, 0], sizes = [2, 80], strides = [1, 1]} : vector<8x80xf32> to vector<2x80xf32>
    %c1_55 = arith.constant 1 : index
    %c0_56 = arith.constant 0 : index
    %c0_57 = arith.constant 0 : index
    %109 = vector.load %arg12[%c1_55, %c0_56, %c0_57] : memref<4x80x16xf32, #tpu.memory_space<vmem>>, vector<1x80x16xf32>
    %110 = vector.shape_cast %109 : vector<1x80x16xf32> to vector<80x16xf32>
    %cst_58 = arith.constant dense<0.000000e+00> : vector<2x16xf32>
    %111 = tpu.matmul %108, %110, %cst_58 {dimension_numbers = #tpu.dot_dimension_numbers<[1], [0], [0], [1], [0, 0, 1, 1], [], []>} : vector<2x80xf32>, vector<80x16xf32>, vector<2x16xf32> -> vector<2x16xf32>
    %112 = arith.addf %107, %111 : vector<2x16xf32>
    %113 = vector.extract_strided_slice %103 {offsets = [4, 0], sizes = [2, 80], strides = [1, 1]} : vector<8x80xf32> to vector<2x80xf32>
    %c2_59 = arith.constant 2 : index
    %c0_60 = arith.constant 0 : index
    %c0_61 = arith.constant 0 : index
    %114 = vector.load %arg12[%c2_59, %c0_60, %c0_61] : memref<4x80x16xf32, #tpu.memory_space<vmem>>, vector<1x80x16xf32>
    %115 = vector.shape_cast %114 : vector<1x80x16xf32> to vector<80x16xf32>
    %cst_62 = arith.constant dense<0.000000e+00> : vector<2x16xf32>
    %116 = tpu.matmul %113, %115, %cst_62 {dimension_numbers = #tpu.dot_dimension_numbers<[1], [0], [0], [1], [0, 0, 1, 1], [], []>} : vector<2x80xf32>, vector<80x16xf32>, vector<2x16xf32> -> vector<2x16xf32>
    %117 = arith.addf %112, %116 : vector<2x16xf32>
    %118 = vector.extract_strided_slice %103 {offsets = [6, 0], sizes = [2, 80], strides = [1, 1]} : vector<8x80xf32> to vector<2x80xf32>
    %c3_63 = arith.constant 3 : index
    %c0_64 = arith.constant 0 : index
    %c0_65 = arith.constant 0 : index
    %119 = vector.load %arg12[%c3_63, %c0_64, %c0_65] : memref<4x80x16xf32, #tpu.memory_space<vmem>>, vector<1x80x16xf32>
    %120 = vector.shape_cast %119 : vector<1x80x16xf32> to vector<80x16xf32>
    %cst_66 = arith.constant dense<0.000000e+00> : vector<2x16xf32>
    %121 = tpu.matmul %118, %120, %cst_66 {dimension_numbers = #tpu.dot_dimension_numbers<[1], [0], [0], [1], [0, 0, 1, 1], [], []>} : vector<2x80xf32>, vector<80x16xf32>, vector<2x16xf32> -> vector<2x16xf32>
    %122 = arith.addf %117, %121 : vector<2x16xf32>
    %c0_67 = arith.constant 0 : index
    %c0_68 = arith.constant 0 : index
    %123 = vector.load %arg13[%c0_67, %c0_68] : memref<1x16xf32, #tpu.memory_space<vmem>>, vector<1x16xf32>
    %124 = vector.broadcast %123 : vector<1x16xf32> to vector<2x16xf32>
    %125 = arith.addf %122, %124 : vector<2x16xf32>
    %c0_69 = arith.constant 0 : index
    %c0_70 = arith.constant 0 : index
    %126 = vector.load %arg14[%c0_69, %c0_70] : memref<2x16xf32, #tpu.memory_space<vmem>>, vector<2x16xf32>
    tpu.vector_store %arg14[%c0_69, %c0_70], %125 {strides = array<i32>} : memref<2x16xf32, #tpu.memory_space<vmem>>, vector<2x16xf32>,
    return
  }
  func.func @transform_0(%arg0: i32) -> (i32, i32) {
    %c0_i32 = arith.constant 0 : i32
    %c0_i32_0 = arith.constant 0 : i32
    %c0_i32_1 = arith.constant 0 : i32
    return %c0_i32, %c0_i32_0 : i32, i32
  }
  func.func @transform_1(%arg0: i32) -> (i32, i32) {
    %c0_i32 = arith.constant 0 : i32
    %c0_i32_0 = arith.constant 0 : i32
    %c0_i32_1 = arith.constant 0 : i32
    return %c0_i32, %c0_i32_0 : i32, i32
  }
  func.func @transform_2(%arg0: i32) -> (i32, i32) {
    %c0_i32 = arith.constant 0 : i32
    %c0_i32_0 = arith.constant 0 : i32
    %c0_i32_1 = arith.constant 0 : i32
    return %c0_i32, %c0_i32_0 : i32, i32
  }
  func.func @transform_3(%arg0: i32) -> (i32, i32) {
    %c0_i32 = arith.constant 0 : i32
    %c0_i32_0 = arith.constant 0 : i32
    %c0_i32_1 = arith.constant 0 : i32
    return %c0_i32, %c0_i32_0 : i32, i32
  }
  func.func @transform_4(%arg0: i32) -> (i32, i32) {
    %c0_i32 = arith.constant 0 : i32
    %c0_i32_0 = arith.constant 0 : i32
    %c0_i32_1 = arith.constant 0 : i32
    return %c0_i32, %c0_i32_0 : i32, i32
  }
  func.func @transform_5(%arg0: i32) -> (i32, i32) {
    %c0_i32 = arith.constant 0 : i32
    %c0_i32_0 = arith.constant 0 : i32
    %c0_i32_1 = arith.constant 0 : i32
    return %c0_i32, %c0_i32_0 : i32, i32
  }
  func.func @transform_6(%arg0: i32) -> (i32, i32) {
    %c0_i32 = arith.constant 0 : i32
    %c0_i32_0 = arith.constant 0 : i32
    %c0_i32_1 = arith.constant 0 : i32
    return %c0_i32, %c0_i32_0 : i32, i32
  }
  func.func @transform_7(%arg0: i32) -> (i32, i32) {
    %c0_i32 = arith.constant 0 : i32
    %c0_i32_0 = arith.constant 0 : i32
    %c0_i32_1 = arith.constant 0 : i32
    return %c0_i32, %c0_i32_0 : i32, i32
  }
  func.func @transform_8(%arg0: i32) -> (i32, i32) {
    %c0_i32 = arith.constant 0 : i32
    %c0_i32_0 = arith.constant 0 : i32
    %c0_i32_1 = arith.constant 0 : i32
    return %c0_i32, %c0_i32_0 : i32, i32
  }
  func.func @transform_9(%arg0: i32) -> (i32, i32) {
    %c0_i32 = arith.constant 0 : i32
    %c0_i32_0 = arith.constant 0 : i32
    %c0_i32_1 = arith.constant 0 : i32
    return %c0_i32, %c0_i32_0 : i32, i32
  }
  func.func @transform_10(%arg0: i32) -> (i32, i32, i32) {
    %c0_i32 = arith.constant 0 : i32
    %c0_i32_0 = arith.constant 0 : i32
    %c0_i32_1 = arith.constant 0 : i32
    %c0_i32_2 = arith.constant 0 : i32
    return %c0_i32, %c0_i32_0, %c0_i32_1 : i32, i32, i32
  }
  func.func @transform_11(%arg0: i32) -> (i32, i32, i32) {
    %c0_i32 = arith.constant 0 : i32
    %c0_i32_0 = arith.constant 0 : i32
    %c0_i32_1 = arith.constant 0 : i32
    %c0_i32_2 = arith.constant 0 : i32
    return %c0_i32, %c0_i32_0, %c0_i32_1 : i32, i32, i32
  }
  func.func @transform_12(%arg0: i32) -> (i32, i32) {
    %c0_i32 = arith.constant 0 : i32
    %c0_i32_0 = arith.constant 0 : i32
    %c0_i32_1 = arith.constant 0 : i32
    return %c0_i32, %c0_i32_0 : i32, i32
  }
  func.func @transform_13(%arg0: i32) -> (i32, i32) {
    %c0_i32 = arith.constant 0 : i32
    %c0_i32_0 = arith.constant 0 : i32
    %c0_i32_1 = arith.constant 0 : i32
    return %c0_i32, %c0_i32_0 : i32, i32
  }
}

</mosaic_0001>

<bundles_post_ra>
// kernel: basednet_forward.1
= control target key start
LH: loop header
LB: loop body
LE: loop exit
PB: predicated region body
PF: predicated region fallthrough
CT: control target
= control target key end

     0   :  { %vm56_vm0 = vcmask 64512   ;;  %v9364_v5 = vmov 0.0   ;;  %v7184_v12 = vmov 0   ;;  %s9345_s0 = inlined_call_operand.vmem [shape: f32[8,424], index: 0, kind: input, shape index: {}]   ;;  %s9346_s1 = inlined_call_operand.vmem [shape: f32[8,8], index: 1, kind: input, shape index: {}]   ;;  %s9347_s2 = inlined_call_operand.vmem [shape: f32[8,1], index: 2, kind: input, shape index: {}]   ;;  %s9348_s3 = inlined_call_operand.vmem [shape: f32[64,40], index: 3, kind: input, shape index: {}]   ;;  %s9349_s4 = inlined_call_operand.vmem [shape: f32[64,1], index: 4, kind: input, shape index: {}]   ;;  %s9350_s5 = inlined_call_operand.vmem [shape: f32[416,84], index: 5, kind: input, shape index: {}]   ;;  %s9351_s6 = inlined_call_operand.vmem [shape: f32[64,320], index: 6, kind: input, shape index: {}]   ;;  %s9352_s7 = inlined_call_operand.vmem [shape: f32[64,1], index: 7, kind: input, shape index: {}]   ;;  %s9353_s8 = inlined_call_operand.vmem [shape: f32[64,1], index: 8, kind: input, shape index: {}]   ;;  %s9354_s9 = inlined_call_operand.vmem [shape: f32[73,10], index: 9, kind: input, shape index: {}]   ;;  %s9355_s10 = inlined_call_operand.vmem [shape: f32[8,10,80], index: 10, kind: input, shape index: {}]   ;;  %s9356_s11 = inlined_call_operand.vmem [shape: f32[4,80,16], index: 11, kind: input, shape index: {}]   ;;  %s9357_s12 = inlined_call_operand.vmem [shape: f32[1,16], index: 12, kind: input, shape index: {}]   ;;  %s9358_s13 = inlined_call_operand.hbm [shape: f32[2,16], index: 13, kind: output, shape index: {}]  }
   0x1   :  { %v47_v0 = vld [vmem:[%s9345_s0 + $0x8] sm:$0xff]  ;;  %v46_v1 = vld [vmem:[%s9345_s0] sm:$0xff]  ;;  %v49_v2 = vld [vmem:[%s9345_s0 + $0x18] sm:$0xff]  ;;  %126 = vmatprep.mubr.f32.mxu0 %v9364_v5  ;;  %677 = vmatprep.mubr.f32.mxu1 %v9364_v5 }
   0x2   :  { %v7275_v3 = vand.u32 4294901760, %v47_v0  ;;  %v7277_v4 = vand.u32 4294901760, %v46_v1  ;;  %v7280_v6 = vand.u32 4294901760, %v49_v2  ;;  %v45_v7 = vld [vmem:[%s9346_s1] sm:$0xff]  ;;  %v48_v8 = vld [vmem:[%s9345_s0 + $0x10] sm:$0xff]  ;;  %6837 = vset.pattern.permute.xlu0 %v7184_v12  ;;  %6838 = vset.pattern.permute.xlu1 %v7184_v12 }
   0x3   :  { %v50_v9 = vld [vmem:[%s9347_s2] sm:$0xff]  ;;  %v58_v10 = vsel %vm56_vm0, %v45_v7, 0  ;;  %v7292_v11 = vand.u32 4294901760, %v48_v8 }
   0x4   :  { %18 = vsyncpa [#allocation3], 0  ;;  %61 = vmatprep.subr.mxu0 %v7275_v3  ;;  %v145_v13 = vsub.f32 %v46_v1, %v7277_v4  ;;  %v604_v14 = vsub.f32 %v49_v2, %v7280_v6  ;;  %v127_v15 = vand.u32 4294901760, %v58_v10  ;;  %v139_v16 = vsub.f32 %v47_v0, %v7275_v3  ;;  %53 = vperm.xlu0 %6837, %v50_v9   ;;  %s7185_s0 = smov 125   ;;  %s7186_s1 = smov 127   ;;  %v1071_v51 = vld [vmem:[%s9349_s4 + $0x8] sm:$0xff] }
   0x5   :  { %63 = vmatpush1.msra.mxu0 %v7277_v4  ;;  %v610_v17 = vsub.f32 %v48_v8, %v7292_v11  ;;  %s7187_s2 = smov 126   ;;  %s7188_s20 = smov 124   ;;  %v1073_v52 = vld [vmem:[%s9349_s4 + $0x18] sm:$0xff]  ;;  %v1075_v53 = vld [vmem:[%s9349_s4 + $0x28] sm:$0xff]  ;;  %v1062_v55 = vld [vmem:[%s9348_s3] sm:$0xff]  ;;  %vm1118_vm1 = vcmask 326656  }
   0x6   :  { %v605_v18 = vand.u32 4294901760, %v604_v14  ;;  %v128_v19 = vsub.f32 %v58_v10, %v127_v15  ;;  %v140_v20 = vand.u32 4294901760, %v139_v16  ;;  %v146_v21 = vand.u32 4294901760, %v145_v13  ;;  %v1077_v54 = vld [vmem:[%s9349_s4 + $0x38] sm:$0xff]  ;;  %v1063_v57 = vld [vmem:[%s9348_s3 + $0x8] sm:$0xff]  ;;  %v1064_v0 = vld [vmem:[%s9348_s3 + $0x10] sm:$0xff] }
   0x7   :  { %v611_v22 = vand.u32 4294901760, %v610_v17  ;;  %v1120_v59 = vsel %vm1118_vm1, %v1062_v55, 0  ;;  %v1123_v60 = vsel %vm1118_vm1, %v1063_v57, 0  ;;  %vm1006_vm2 = vcmask 1039360  }
   0x8   :  { %v606_v23 = vsub.f32 %v604_v14, %v605_v18  ;;  %v129_v24 = vand.u32 4294901760, %v128_v19  ;;  %v141_v25 = vsub.f32 %v139_v16, %v140_v20  ;;  %v147_v26 = vsub.f32 %v145_v13, %v146_v21 }
   0x9   :  { %v612_v27 = vsub.f32 %v610_v17, %v611_v22  ;;  %v7399_v2 = vand.u32 4294901760, %v1120_v59  ;;  %vm1022_vm3 = vcmask 1031168   ;;  %vm1038_vm4 = vcmask 1022976  }
   0xa   :  { %v607_v28 = vand.u32 4294901760, %v606_v23  ;;  %v130_v29 = vsub.f32 %v128_v19, %v129_v24  ;;  %v142_v30 = vand.u32 4294901760, %v141_v25  ;;  %v148_v32 = vand.u32 4294901760, %v147_v26 }
   0xb   :  { %v613_v31 = vand.u32 4294901760, %v612_v27  ;;  %vm1054_vm5 = vcmask 1014784   ;;  %vm3659_vm6 = vcmask 261120   ;;  %vm4030_vm7 = vcmask 523264  }
   0xc   :  { %608 = vmatprep.subr.mxu1 %v607_v28  ;;  %v131_v33 = vand.u32 4294901760, %v130_v29  ;;  %143 = vmatprep.subr.mxu0 %v142_v30  ;;  %v1067_v30 = vld [vmem:[%s9348_s3 + $0x28] sm:$0xff]  ;;  %vm4652_vm8 = vcmask 1040384   ;;  %vm7190_vm9 = vmmov 1   ;;  %vm4770_vm11 = vcmask 1041408  }
   0xd   :  { %614 = vmatpush1.msra.mxu1 %v613_v31  ;;  %vm6497_vm10 = vmpackc.low %vm4652_vm8, %vm7190_vm9  ;;  %vm4627_vm13 = vcmask 596992   ;;  %vm7194_vm14 = vmmov 0   ;;  %vm4766_vm15 = vcmask 80896   ;;  %vm5423_vm0 = vcmask 654336  }
   0xe   :  { %132 = vmatmul.mubr.f32.vlgmr.msra.gmra.mrb[0].mxu0 %v131_v33  ;;  %679 = vmatmul.mubr.f32.vlgmr.msra.gmra.mrb[0].mxu1 %v127_v15  ;;  %vm9054_vm12 = vmpackc.low %vm4770_vm11, %vm7190_vm9 }
   0xf   :  { %149 = vmatpush1.msra.mxu0 %v148_v32  ;;  %212 = vmatprep.mubr.f32.mxu0 %v9364_v5 }
  0x10   :  { %687 = vmatprep.subr.mxu1 %v604_v14  ;;  %753 = vmatprep.mubr.f32.mxu1 %v9364_v5 }
  0x11   :  { %690 = vmatpush1.msra.mxu1 %v610_v17  ;;  %222 = vmatprep.subr.mxu0 %v139_v16  ;;  %v1066_v17 = vld [vmem:[%s9348_s3 + $0x20] sm:$0xff] }
  0x12   :  { %763 = vmatprep.subr.mxu1 %v7280_v6  ;;  %v1132_v26 = vsel %vm1118_vm1, %v1066_v17, 0 }
  0x16   :  { %214 = vmatmul.mubr.f32.vlgmr.msra.gmra.mrb[0].mxu0 %v127_v15  ;;  %756 = vmatmul.mubr.f32.vlgmr.msra.gmra.mrb[0].mxu1 %v128_v19 }
  0x17   :  { %225 = vmatpush1.msra.mxu0 %v145_v13  ;;  %288 = vmatprep.mubr.f32.mxu0 %v9364_v5  ;;  %v7420_v13 = vsub.f32 %v1120_v59, %v7399_v2 }
  0x18   :  { %765 = vmatpush1.msra.mxu1 %v7292_v11  ;;  %828 = vmatprep.mubr.f32.mxu1 %v9364_v5 }
  0x19   :  { %298 = vmatprep.subr.mxu0 %v7275_v3  ;;  %841 = vmatprep.subr.mxu1 %v605_v18 }
  0x1e   :  { %291 = vmatmul.mubr.f32.vlgmr.msra.gmra.mrb[0].mxu0 %v128_v19  ;;  %832 = vmatmul.mubr.f32.vlgmr.msra.gmra.mrb[0].mxu1 %v129_v24 }
  0x1f   :  { %300 = vmatpush1.msra.mxu0 %v7277_v4  ;;  %363 = vmatprep.mubr.f32.mxu0 %v9364_v5 }
  0x20   :  { %845 = vmatpush1.msra.mxu1 %v611_v22  ;;  %908 = vmatprep.mubr.f32.mxu1 %v9364_v5 }
  0x21   :  { %376 = vmatprep.subr.mxu0 %v140_v20  ;;  %917 = vmatprep.subr.mxu1 %v7280_v6 }
  0x26   :  { %367 = vmatmul.mubr.f32.vlgmr.msra.gmra.mrb[0].mxu0 %v129_v24  ;;  %910 = vmatmul.mubr.f32.vlgmr.msra.gmra.mrb[0].mxu1 %v127_v15  ;;  %v7443_v24 = vand.u32 4294901760, %v7420_v13 }
  0x27   :  { %380 = vmatpush1.msra.mxu0 %v146_v21  ;;  %443 = vmatprep.mubr.f32.mxu0 %v9364_v5 }
  0x28   :  { %919 = vmatpush1.msra.mxu1 %v7292_v11  ;;  %982 = vmatprep.mubr.f32.mxu1 %v9364_v5  ;;  %9400 = vst [vmem:[#allocation6_spill] sm:$0xff] %v7443_v24 }
  0x29   :  { %452 = vmatprep.subr.mxu0 %v7275_v3  ;;  %v1065_v3 = vld [vmem:[%s9348_s3 + $0x18] sm:$0xff] }
  0x2a   :  { %v1129_v10 = vsel %vm1118_vm1, %v1065_v3, 0 }
  0x2b   :  { %v7431_v18 = vand.u32 4294901760, %v1129_v10 }
  0x2d   :  { %v7463_v32 = vsub.f32 %v1129_v10, %v7431_v18 }
  0x2e   :  { %445 = vmatmul.mubr.f32.vlgmr.msra.gmra.mrb[0].mxu0 %v127_v15  ;;  %984 = vmatmul.mubr.f32.vlgmr.msra.gmra.mrb[0].mxu1 %v127_v15 }
  0x2f   :  { %454 = vmatpush1.msra.mxu0 %v7277_v4  ;;  %517 = vmatprep.mubr.f32.mxu0 %v9364_v5  ;;  %v7404_v4 = vand.u32 4294901760, %v1123_v60 }
  0x30   :  { %526 = vmatprep.subr.mxu0 %v7280_v6  ;;  %2129 = vmatprep.mubr.f32.mxu1 %v9364_v5  ;;  %v1126_v6 = vsel %vm1118_vm1, %v1064_v0, 0 }
  0x31   :  { %v7426_v16 = vand.u32 4294901760, %v1126_v6 }
  0x33   :  { %v7457_v29 = vsub.f32 %v1126_v6, %v7426_v16 }
  0x36   :  { %519 = vmatmul.mubr.f32.vlgmr.msra.gmra.mrb[0].mxu0 %v127_v15  ;;  %v7424_v15 = vsub.f32 %v1123_v60, %v7404_v4 }
  0x37   :  { %528 = vmatpush1.msra.mxu0 %v7292_v11  ;;  %591 = vmatprep.mubr.f32.mxu0 %v9364_v5 }
  0x38   :  { %9399 = vst [vmem:[#allocation5_spill] sm:$0xff] %v7424_v15  ;;  %v7454_v28 = vand.u32 4294901760, %v7424_v15 }
  0x3a   :  { %597 = vmatmul.mubr.f32.vlgmr.msra.gmra.mrb[2].mxu0 %v131_v33  ;;  %9401 = vst [vmem:[#allocation7_spill] sm:$0xff] %v7454_v28 }
  0x3b   :  { %1217 = vmatprep.mubr.f32.mxu0 %v9364_v5 }
  0x83   :  { %v54_v36 = vpop.permute.xlu0 %53 }
 0x101   :  { %v985_v34 = vpop.f32.mrb[0].mxu1 }
 0x102   :  { %v987_v35 = vpop.f32.mrb[1].mxu1 }
 0x109   :  { %v520_v37 = vpop.f32.mrb[0].mxu0 }
 0x10a   :  { %v6594_v38 = vadd.f32 %v520_v37, %v54_v36  ;;  %v522_v39 = vpop.f32.mrb[1].mxu0 }
 0x10b   :  { %v6595_v41 = vadd.f32 %v522_v39, %v54_v36 }
 0x10c   :  { %v7322_v40 = vmax.f32 %v6594_v38, 0.0 }
 0x10d   :  { %v598_v42 = vpop.f32.mrb[2].mxu0  ;;  %v7328_v46 = vmax.f32 %v6595_v41, 0.0  ;;  %v1221_v41 = vsub.f32 %v7420_v13, %v7443_v24 }
 0x10e   :  { %v599_v43 = vadd.f32 %v598_v42, %v54_v36  ;;  %v600_v44 = vpop.f32.mrb[3].mxu0  ;;  %1030 = vrot.lane.b32.xlu0 %v7322_v40, %s7185_s0  ;;  %998 = vrot.lane.b32.xlu1 %v7322_v40, %s7186_s1  ;;  %v1145_v56 = vand.u32 4294901760, %v7322_v40 }
 0x10f   :  { %v601_v45 = vadd.f32 %v600_v44, %v54_v36  ;;  %v1143_v58 = vand.u32 4294901760, %v7328_v46  ;;  %v7476_v36 = vand.u32 4294901760, %v1132_v26  ;;  %v7514_v17 = vand.u32 4294901760, %v1221_v41 }
 0x110   :  { %v6597_v47 = vadd.f32 %v985_v34, %v599_v43  ;;  %v7387_v61 = vsub.f32 %v7322_v40, %v1145_v56  ;;  %v1135_v43 = vsel %vm1118_vm1, %v1067_v30, 0 }
 0x111   :  { %v6599_v48 = vadd.f32 %v987_v35, %v601_v45  ;;  %v7397_v1 = vsub.f32 %v7328_v46, %v1143_v58  ;;  %v7501_v59 = vsub.f32 %v1132_v26, %v7476_v36  ;;  %v7503_v60 = vand.u32 4294901760, %v1135_v43 }
 0x112   :  { %1000 = vrot.lane.b32.xlu0 %v7328_v46, %s7186_s1  ;;  %1014 = vrot.lane.b32.xlu1 %v7322_v40, %s7187_s2  ;;  %v7334_v49 = vmax.f32 %v6597_v47, 0.0  ;;  %v9361_v9 = vand.u32 4294901760, %v7387_v61  ;;  %v1232_v47 = vsub.f32 %v7424_v15, %v7454_v28 }
 0x113   :  { %v7344_v50 = vmax.f32 %v6599_v48, 0.0  ;;  %v9363_v14 = vand.u32 4294901760, %v7397_v1  ;;  %v7492_v48 = vand.u32 4294901760, %v7457_v29 }
 0x114   :  { %v2057_v62 = vand.u32 4294901760, %v7334_v49  ;;  %v7437_v20 = vsub.f32 %v7387_v61, %v9361_v9  ;;  %v7521_v30 = vand.u32 4294901760, %v1232_v47  ;;  %v7530_v9 = vand.u32 4294901760, %v7501_v59 }
 0x115   :  { %v2055_v63 = vand.u32 4294901760, %v7344_v50  ;;  %v7448_v25 = vsub.f32 %v7397_v1, %v9363_v14 }
 0x116   :  { %1018 = vrot.lane.b32.xlu0 %v7334_v49, %s7187_s2  ;;  %1016 = vrot.lane.b32.xlu1 %v7328_v46, %s7187_s2  ;;  %v7410_v7 = vsub.f32 %v7334_v49, %v2057_v62 }
 0x117   :  { %v7415_v8 = vsub.f32 %v7344_v50, %v2055_v63 }
 0x118   :  { %v9359_v21 = vand.u32 4294901760, %v7410_v7 }
 0x119   :  { %v9362_v19 = vand.u32 4294901760, %v7415_v8 }
 0x11a   :  { %1034 = vrot.lane.b32.xlu0 %v7334_v49, %s7185_s0  ;;  %1032 = vrot.lane.b32.xlu1 %v7328_v46, %s7185_s0  ;;  %v7474_v35 = vsub.f32 %v7410_v7, %v9359_v21 }
 0x11b   :  { %v7468_v33 = vsub.f32 %v7415_v8, %v9362_v19 }
 0x11e   :  { %1004 = vrot.lane.b32.xlu0 %v7344_v50, %s7186_s1  ;;  %1002 = vrot.lane.b32.xlu1 %v7334_v49, %s7186_s1 }
 0x122   :  { %1036 = vrot.lane.b32.xlu0 %v7344_v50, %s7185_s0  ;;  %1020 = vrot.lane.b32.xlu1 %v7344_v50, %s7187_s2 }
 0x126   :  { %1050 = vrot.lane.b32.xlu0 %v7334_v49, %s7188_s20  ;;  %1048 = vrot.lane.b32.xlu1 %v7328_v46, %s7188_s20 }
 0x12a   :  { %1052 = vrot.lane.b32.xlu0 %v7344_v50, %s7188_s20  ;;  %1046 = vrot.lane.b32.xlu1 %v7322_v40, %s7188_s20 }
 0x12e   :  { %1085 = vperm.xlu0 %6837, %v1071_v51  }
 0x132   :  { %1095 = vperm.xlu0 %6837, %v1073_v52  }
 0x136   :  { %1105 = vperm.xlu0 %6837, %v1075_v53  }
 0x13a   :  { %1115 = vperm.xlu0 %6837, %v1077_v54   ;;  %v7496_v54 = vand.u32 4294901760, %v7463_v32 }
 0x180   :  { %v1031_v11 = vpop.permute.xlu0 %1030  ;;  %v999_v12 = vpop.permute.xlu1 %998 }
 0x184   :  { %v7440_v22 = vpop.permute.xlu0 %1000  ;;  %v1015_v23 = vpop.permute.xlu1 %1014 }
 0x185   :  { %v1007_v27 = vsel %vm1006_vm2, %v999_v12, %v7440_v22 }
 0x186   :  { %v1149_v31 = vand.u32 4294901760, %v1007_v27 }
 0x188   :  { %v7478_v37 = vsub.f32 %v1007_v27, %v1149_v31  ;;  %v7480_v38 = vpop.permute.xlu0 %1018  ;;  %v1017_v39 = vpop.permute.xlu1 %1016 }
 0x189   :  { %v1023_v44 = vsel %vm1022_vm3, %v1015_v23, %v1017_v39  ;;  %v1024_v45 = vsel %vm1022_vm3, %v1017_v39, %v7480_v38  ;;  %v1068_v23 = vld [vmem:[%s9348_s3 + $0x30] sm:$0xff] }
 0x18a   :  { %v9360_v51 = vand.u32 4294901760, %v7478_v37  ;;  %v1151_v52 = vand.u32 4294901760, %v1024_v45  ;;  %v1153_v53 = vand.u32 4294901760, %v1023_v44  ;;  %v7536_v47 = vsel %vm1118_vm1, %v1068_v23, 0 }
 0x18c   :  { %v7508_v0 = vsub.f32 %v7478_v37, %v9360_v51  ;;  %v7510_v3 = vsub.f32 %v1024_v45, %v1151_v52  ;;  %v7512_v6 = vsub.f32 %v1023_v44, %v1153_v53  ;;  %v1035_v10 = vpop.permute.xlu0 %1034  ;;  %v1033_v12 = vpop.permute.xlu1 %1032 }
 0x18d   :  { %v1039_v26 = vsel %vm1038_vm4, %v1031_v11, %v1033_v12  ;;  %v1040_v27 = vsel %vm1038_vm4, %v1033_v12, %v1035_v10  ;;  %v7533_v11 = vsub.f32 %v1135_v43, %v7503_v60  ;;  %v7540_v12 = vpack.c.bf16 %v1149_v31, %v1145_v56 }
 0x18e   :  { %v9366_v44 = vand.u32 4294901760, %v7512_v6  ;;  %v1155_v45 = vand.u32 4294901760, %v1040_v27  ;;  %v1157_v21 = vand.u32 4294901760, %v1039_v26  ;;  %v9367_v51 = vand.u32 4294901760, %v7510_v3 }
 0x18f   :  { %v1328_v5 = vand.u32 4294901760, %v7508_v0 }
 0x190   :  { %v7542_v19 = vsub.f32 %v1040_v27, %v1155_v45  ;;  %v7544_v14 = vsub.f32 %v1039_v26, %v1157_v21  ;;  %v1005_v41 = vpop.permute.xlu0 %1004  ;;  %v1003_v39 = vpop.permute.xlu1 %1002  ;;  %v7550_v43 = vsub.f32 %v7512_v6, %v9366_v44  ;;  %v7555_v56 = vpack.c.bf16 %v1157_v21, %v1153_v53 }
 0x191   :  { %v2059_v55 = vand.u32 4294901760, %v1005_v41  ;;  %v1008_v23 = vsel %vm1006_vm2, %v7440_v22, %v1003_v39  ;;  %v1009_v40 = vsel %vm1006_vm2, %v1003_v39, %v1005_v41  ;;  %v7557_v27 = vpack.c.bf16 %v1155_v45, %v1151_v52 }
 0x192   :  { %9402 = vst [vmem:[#allocation8_spill] sm:$0xff] %v7555_v56  ;;  %v1147_v31 = vand.u32 4294901760, %v1008_v23  ;;  %v2061_v26 = vand.u32 4294901760, %v1009_v40  ;;  %v7569_v22 = vsub.f32 %v7510_v3, %v9367_v51 }
 0x193   :  { %9403 = vst [vmem:[#allocation9_spill] sm:$0xff] %v7557_v27  ;;  %v7560_v0 = vsub.f32 %v1005_v41, %v2059_v55  ;;  %v7564_v44 = vpack.c.bf16 %v2059_v55, %v2055_v63 }
 0x194   :  { %v7571_v39 = vsub.f32 %v1008_v23, %v1147_v31  ;;  %v7575_v21 = vpack.c.bf16 %v2061_v26, %v2057_v62  ;;  %v7577_v52 = vsub.f32 %v1009_v40, %v2061_v26  ;;  %v1037_v53 = vpop.permute.xlu0 %1036  ;;  %v1021_v45 = vpop.permute.xlu1 %1020  ;;  %v7587_v40 = vpack.c.bf16 %v1147_v31, %v1143_v58 }
 0x195   :  { %v1041_v50 = vsel %vm1038_vm4, %v1035_v10, %v1037_v53  ;;  %v2067_v63 = vand.u32 4294901760, %v1037_v53  ;;  %v1025_v55 = vsel %vm1022_vm3, %v7480_v38, %v1021_v45  ;;  %v2063_v51 = vand.u32 4294901760, %v1021_v45  ;;  %6323 = vmatprep.subr.bf16.mxu1 %v7564_v44 }
 0x196   :  { %9404 = vst [vmem:[#allocation10_spill] sm:$0xff] %v7575_v21  ;;  %v9368_v23 = vand.u32 4294901760, %v7577_v52  ;;  %v2069_v49 = vand.u32 4294901760, %v1041_v50  ;;  %v2065_v62 = vand.u32 4294901760, %v1025_v55  ;;  %6325 = vmatpush1.bf16.msra.mxu1 %v7575_v21  ;;  %v9371_v38 = vand.u32 4294901760, %v7571_v39  ;;  %6275 = vmatprep.subr.bf16.mxu0 %v7587_v40 }
 0x197   :  { %v7590_v26 = vsub.f32 %v1037_v53, %v2067_v63  ;;  %v7592_v10 = vsub.f32 %v1021_v45, %v2063_v51  ;;  %v7594_v57 = vpack.c.bf16 %v2067_v63, %v2063_v51  ;;  %6277 = vmatpush1.bf16.msra.mxu0 %v7540_v12  ;;  %v9378_v45 = vand.u32 4294901760, %v7560_v0 }
 0x198   :  { %v2239_v41 = vsub.f32 %v7577_v52, %v9368_v23  ;;  %v7600_v42 = vsub.f32 %v1041_v50, %v2069_v49  ;;  %v7602_v34 = vsub.f32 %v1025_v55, %v2065_v62  ;;  %v1051_v46 = vpop.permute.xlu0 %1050  ;;  %v1049_v58 = vpop.permute.xlu1 %1048  ;;  %v7605_v31 = vpack.c.bf16 %v2069_v49, %v2065_v62  ;;  %6279 = vmatprep.subr.bf16.mxu0 %v7557_v27 }
 0x199   :  { %9405 = vst [vmem:[#allocation11_spill] sm:$0xff] %v7594_v57  ;;  %v1056_v51 = vsel %vm1054_vm5, %v1049_v58, %v1051_v46  ;;  %6327 = vmatprep.subr.bf16.mxu1 %v7594_v57  ;;  %v1321_v53 = vsub.f32 %v7571_v39, %v9371_v38  ;;  %v9407_v50 = vand.u32 4294901760, %v7437_v20  ;;  %v9408_v55 = vand.u32 4294901760, %v7544_v14 }
 0x19a   :  { %9406 = vst [vmem:[#allocation12_spill] sm:$0xff] %v7605_v31  ;;  %v7621_v62 = vand.u32 4294901760, %v1056_v51  ;;  %6329 = vmatpush1.bf16.msra.mxu1 %v7605_v31  ;;  %v2240_v23 = vand.u32 4294901760, %v2239_v41  ;;  %v1334_v28 = vand.u32 4294901760, %v7569_v22  ;;  %v2233_v20 = vsub.f32 %v7560_v0, %v9378_v45 }
 0x19b   :  { %v6284_v63 = vpack.c.bf16 %v1328_v5, %v9407_v50  ;;  %v7619_v49 = vsub.f32 %v7544_v14, %v9408_v55  ;;  %v1322_v38 = vand.u32 4294901760, %v1321_v53  ;;  %v9409_v5 = vand.u32 4294901760, %v7542_v19  ;;  %6281 = vmatpush1.bf16.msra.mxu0 %v7555_v56 }
 0x19c   :  { %v7636_v31 = vsub.f32 %v1056_v51, %v7621_v62  ;;  %v1053_v41 = vpop.permute.xlu0 %1052  ;;  %v1047_v22 = vpop.permute.xlu1 %1046  ;;  %v9410_v55 = vand.u32 4294901760, %v7474_v35  ;;  %1160 = vmatprep.subr.mxu0 %v7621_v62  ;;  %v2234_v51 = vand.u32 4294901760, %v2233_v20 }
 0x19d   :  { %v1345_v50 = vsub.f32 %v7542_v19, %v9409_v5  ;;  %v1057_v45 = vsel %vm1054_vm5, %v1051_v46, %v1053_v41  ;;  %v7641_v57 = vand.u32 4294901760, %v1053_v41  ;;  %v1055_v5 = vsel %vm1054_vm5, %v1047_v22, %v1049_v58 }
 0x19e   :  { %v6332_v24 = vpack.c.bf16 %v2240_v23, %v9410_v55  ;;  %v7646_v27 = vand.u32 4294901760, %v1057_v45  ;;  %v7648_v15 = vand.u32 4294901760, %v1055_v5  ;;  %v9411_v46 = vand.u32 4294901760, %v7448_v25 }
 0x19f   :  { %v1346_v21 = vand.u32 4294901760, %v1345_v50  ;;  %v7652_v53 = vsub.f32 %v1053_v41, %v7641_v57  ;;  %2072 = vmatprep.subr.mxu1 %v7641_v57  ;;  %v9412_v58 = vand.u32 4294901760, %v7592_v10  ;;  %v9413_v23 = vand.u32 4294901760, %v7590_v26 }
 0x1a0   :  { %v6282_v56 = vpack.c.bf16 %v1322_v38, %v9411_v46  ;;  %v7664_v22 = vsub.f32 %v1057_v45, %v7646_v27  ;;  %v7667_v20 = vsub.f32 %v1055_v5, %v7648_v15  ;;  %2074 = vmatpush1.msra.mxu1 %v7646_v27  ;;  %v9414_v50 = vand.u32 4294901760, %v7468_v33  ;;  %1162 = vmatpush1.msra.mxu0 %v7648_v15 }
 0x1a1   :  { %v2245_v35 = vsub.f32 %v7592_v10, %v9412_v58  ;;  %v2257_v55 = vsub.f32 %v7590_v26, %v9413_v23  ;;  %v1352_v38 = vand.u32 4294901760, %v7619_v49  ;;  %2135 = vmatmul.mubr.f32.vlgmr.msra.gmra.mrb[2].mxu1 %v7514_v17  ;;  %v6286_v41 = vpack.c.bf16 %v1346_v21, %v1334_v28  ;;  %1223 = vmatmul.mubr.f32.vlgmr.msra.gmra.mrb[4].mxu0 %v7514_v17  ;;  %v1069_v28 = vld [vmem:[%s9348_s3 + $0x38] sm:$0xff] }
 0x1a2   :  { %v6330_v25 = vpack.c.bf16 %v2234_v51, %v9414_v50  ;;  %v9415_v45 = vand.u32 4294901760, %v7602_v34  ;;  %v9389_v5 = vand.u32 4294901760, %v7667_v20  ;;  %6283 = vmatprep.subr.bf16.mxu0 %v6282_v56  ;;  %v9416_v33 = vand.u32 4294901760, %v7600_v42 }
 0x1a3   :  { %v2246_v46 = vand.u32 4294901760, %v2245_v35  ;;  %v2258_v58 = vand.u32 4294901760, %v2257_v55  ;;  %v9390_v51 = vand.u32 4294901760, %v7636_v31  ;;  %v9387_v50 = vand.u32 4294901760, %v7652_v53  ;;  %6285 = vmatpush1.bf16.msra.mxu0 %v6284_v63 }
 0x1a4   :  { %v2251_v23 = vsub.f32 %v7602_v34, %v9415_v45  ;;  %v2263_v49 = vsub.f32 %v7600_v42, %v9416_v33  ;;  %6331 = vmatprep.subr.bf16.mxu1 %v6330_v25  ;;  %v1340_v35 = vand.u32 4294901760, %v7550_v43  ;;  %v9388_v17 = vand.u32 4294901760, %v7664_v22  ;;  %6287 = vmatprep.subr.bf16.mxu0 %v6286_v41 }
 0x1a5   :  { %v6334_v21 = vpack.c.bf16 %v2258_v58, %v2246_v46  ;;  %6333 = vmatpush1.bf16.msra.mxu1 %v6332_v24  ;;  %v1357_v45 = vsub.f32 %v7636_v31, %v9390_v51  ;;  %v2269_v33 = vsub.f32 %v7652_v53, %v9387_v50  ;;  %v7697_v25 = vand.u32 4294901760, %v7536_v47 }
 0x1a6   :  { %v2252_v55 = vand.u32 4294901760, %v2251_v23  ;;  %v2264_v56 = vand.u32 4294901760, %v2263_v49  ;;  %v1363_v43 = vsub.f32 %v7667_v20, %v9389_v5  ;;  %v9417_v63 = vmov 0.0  }
 0x1a7   :  { %6335 = vmatprep.subr.bf16.mxu1 %v6334_v21  ;;  %1228 = vmatprep.mubr.f32.mxu0 %v9417_v63  ;;  %v6288_v24 = vpack.c.bf16 %v1352_v38, %v1340_v35  ;;  %v9418_v41 = vsub.f32 %v7457_v29, %v7492_v48  ;;  %v1141_v58 = vsel %vm1118_vm1, %v1069_v28, 0  ;;  %v1358_v49 = vand.u32 4294901760, %v1357_v45 }
 0x1a8   :  { %2140 = vmatprep.mubr.f32.mxu1 %v9417_v63  ;;  %1234 = vmatmul.mubr.f32.gmra.mrb[6].mxu0 %v7521_v30  ;;  %v6336_v23 = vpack.c.bf16 %v2264_v56, %v2252_v55  ;;  %v2270_v50 = vand.u32 4294901760, %v2269_v33  ;;  %v2275_v21 = vsub.f32 %v7664_v22, %v9388_v17  ;;  %v9419_v38 = vsub.f32 %v7463_v32, %v7496_v54 }
 0x1a9   :  { %v1244_v46 = vand.u32 4294901760, %v9418_v41  ;;  %2146 = vmatmul.mubr.f32.gmra.mrb[4].mxu1 %v7521_v30  ;;  %6289 = vmatpush1.bf16.msra.mxu0 %v6288_v24  ;;  %v1265_v35 = vsub.f32 %v7501_v59, %v7530_v9  ;;  %v7719_v55 = vand.u32 4294901760, %v7533_v11  ;;  %v7723_v56 = vsub.f32 %v7536_v47, %v7697_v25 }
 0x1aa   :  { %6337 = vmatpush1.bf16.msra.mxu1 %v6336_v23  ;;  %1359 = vmatprep.subr.mxu0 %v1358_v49  ;;  %v1255_v28 = vand.u32 4294901760, %v9419_v38  ;;  %v1364_v30 = vand.u32 4294901760, %v1363_v43  ;;  %v7726_v45 = vand.u32 4294901760, %v1141_v58  ;;  %v9420_v33 = vand.u32 4294901760, %v7510_v3 }
 0x1ab   :  { %2271 = vmatprep.subr.mxu1 %v2270_v50  ;;  %1239 = vmatprep.mubr.f32.mxu0 %v9417_v63  ;;  %v9421_v24 = vand.u32 4294901760, %v7542_v19  ;;  %v9422_v23 = vand.u32 4294901760, %v7592_v10  ;;  %v9423_v49 = vand.u32 4294901760, %v7590_v26  ;;  %v2276_v47 = vand.u32 4294901760, %v2275_v21 }
 0x1ac   :  { %2151 = vmatprep.mubr.f32.mxu1 %v9417_v63  ;;  %1245 = vmatmul.mubr.f32.gmra.mrb[8].mxu0 %v1244_v46  ;;  %v6290_v50 = vpack.c.bf16 %v7571_v39, %v7397_v1  ;;  %v9424_v43 = vand.u32 4294901760, %v7512_v6  ;;  %v9425_v17 = vand.u32 4294901760, %v7544_v14  ;;  %v6338_v21 = vpack.c.bf16 %v7560_v0, %v7415_v8 }
 0x1ad   :  { %v7732_v41 = vpack.c.bf16 %v9421_v24, %v9420_v33  ;;  %v7738_v38 = vpack.c.bf16 %v9423_v49, %v9422_v23  ;;  %v9426_v33 = vand.u32 4294901760, %v7602_v34  ;;  %v9427_v24 = vand.u32 4294901760, %v7600_v42  ;;  %2157 = vmatmul.mubr.f32.gmra.mrb[6].mxu1 %v1244_v46  ;;  %1365 = vmatpush1.msra.mxu0 %v1364_v30 }
 0x1ae   :  { %v7747_v5 = vpack.c.bf16 %v9425_v17, %v9424_v43  ;;  %2277 = vmatpush1.msra.mxu1 %v2276_v47  ;;  %6291 = vmatprep.subr.bf16.mxu0 %v6290_v50  ;;  %v1266_v17 = vand.u32 4294901760, %v1265_v35  ;;  %v1276_v23 = vsub.f32 %v7533_v11, %v7719_v55  ;;  %v7762_v49 = vand.u32 4294901760, %v7723_v56 }
 0x1af   :  { %v7753_v51 = vpack.c.bf16 %v9427_v24, %v9426_v33  ;;  %6339 = vmatprep.subr.bf16.mxu1 %v6338_v21  ;;  %1250 = vmatprep.mubr.f32.mxu0 %v9417_v63  ;;  %v7765_v46 = vsub.f32 %v1141_v58, %v7726_v45  ;;  %v6292_v43 = vpack.c.bf16 %v7478_v37, %v7387_v61  ;;  %vm5746_vm1 = vcmask 123904  }
 0x1b0   :  { %2162 = vmatprep.mubr.f32.mxu1 %v9417_v63  ;;  %1256 = vmatmul.mubr.f32.gmra.mrb[10].mxu0 %v1255_v28  ;;  %v1277_v30 = vand.u32 4294901760, %v1276_v23  ;;  %v1287_v47 = vsub.f32 %v7723_v56, %v7762_v49  ;;  %v6340_v33 = vpack.c.bf16 %v7577_v52, %v7410_v7  ;;  %v6294_v24 = vpack.c.bf16 %v7542_v19, %v7510_v3  ;;  %v9430_v3 = vld [vmem:[#allocation11_spill] sm:$0xff] }
 0x1b1   :  { %2168 = vmatmul.mubr.f32.gmra.mrb[8].mxu1 %v1255_v28  ;;  %1261 = vmatprep.mubr.f32.mxu0 %v9417_v63  ;;  %v7772_v35 = vand.u32 4294901760, %v7765_v46  ;;  %v6342_v21 = vpack.c.bf16 %v7590_v26, %v7592_v10  ;;  %v6344_v19 = vpack.c.bf16 %v7600_v42, %v7602_v34  ;;  %v9428_v34 = vld [vmem:[#allocation10_spill] sm:$0xff]  ;;  %v9429_v42 = vld [vmem:[#allocation9_spill] sm:$0xff]  ;;  %v9432_v26 = vld [vmem:[#allocation8_spill] sm:$0xff]  ;;  %v9435_v23 = vand.u32 4294901760, %v7571_v39 }
 0x1b2   :  { %2173 = vmatprep.mubr.f32.mxu1 %v9417_v63  ;;  %v1288_v58 = vand.u32 4294901760, %v1287_v47  ;;  %v9433_v10 = vld [vmem:[#allocation12_spill] sm:$0xff]  ;;  %v9436_v47 = vand.u32 4294901760, %v7415_v8  ;;  %v9441_v39 = vand.u32 4294901760, %v7410_v7  ;;  %v9444_v7 = vand.u32 4294901760, %v7636_v31 }
 0x1b3   :  { %v1298_v28 = vsub.f32 %v7765_v46, %v7772_v35  ;;  %v1074_v8 = vld [vmem:[%s9349_s4 + $0x20] sm:$0xff] }
 0x1b4   :  { %1267 = vmatmul.mubr.f32.gmra.mrb[12].mxu0 %v1266_v17 }
 0x1b5   :  { %2179 = vmatmul.mubr.f32.gmra.mrb[10].mxu1 %v1266_v17  ;;  %1272 = vmatprep.mubr.f32.mxu0 %v9417_v63  ;;  %v1299_v50 = vand.u32 4294901760, %v1298_v28  ;;  %v6296_v17 = vpack.c.bf16 %v7544_v14, %v7512_v6  ;;  %v1070_v14 = vld [vmem:[%s9349_s4] sm:$0xff] }
 0x1b6   :  { %2184 = vmatprep.mubr.f32.mxu1 %v9417_v63  ;;  %1080 = vperm.xlu1 %6838, %v1070_v14   ;;  %v9431_v6 = vld [vmem:[#allocation5_spill] sm:$0xff] }
 0x1b7   :  { %v3627_v14 = vld [vmem:[%s9350_s5 + $0xa0] sm:$0xff] }
 0x1b8   :  { %1278 = vmatmul.mubr.f32.gmra.mrb[14].mxu0 %v1277_v30 }
 0x1b9   :  { %2190 = vmatmul.mubr.f32.gmra.mrb[12].mxu1 %v1277_v30  ;;  %1283 = vmatprep.mubr.f32.mxu0 %v9417_v63 }
 0x1ba   :  { %2195 = vmatprep.mubr.f32.mxu1 %v9417_v63 }
 0x1bc   :  { %1289 = vmatmul.mubr.f32.gmra.mrb[16].mxu0 %v1288_v58 }
 0x1bd   :  { %2201 = vmatmul.mubr.f32.gmra.mrb[14].mxu1 %v1288_v58  ;;  %1294 = vmatprep.mubr.f32.mxu0 %v9417_v63  ;;  %v9437_v58 = vand.u32 4294901760, %v7560_v0  ;;  %v9440_v0 = vld [vmem:[#allocation6_spill] sm:$0xff] }
 0x1be   :  { %2206 = vmatprep.mubr.f32.mxu1 %v9417_v63 }
 0x1bf   :  { %v6354_v28 = vpack.c.bf16 %v9437_v58, %v9436_v47 }
 0x1c0   :  { %1300 = vmatmul.mubr.f32.gmra.mrb[18].mxu0 %v1299_v50 }
 0x1c1   :  { %2212 = vmatmul.mubr.f32.gmra.mrb[16].mxu1 %v1299_v50  ;;  %1420 = vmatprep.mubr.f32.mxu0 %v9417_v63 }
 0x1c2   :  { %2332 = vmatprep.mubr.f32.mxu1 %v9417_v63 }
 0x1c4   :  { %1422 = vmatmul.mubr.f32.vlgmr.msra.gmra.mrb[4].mxu0 %v7399_v2 }
 0x1c5   :  { %6293 = vmatpush1.bf16.msra.mxu0 %v6292_v43  ;;  %2334 = vmatmul.mubr.f32.vlgmr.msra.gmra.mrb[2].mxu1 %v7399_v2 }
 0x1c6   :  { %6341 = vmatpush1.bf16.msra.mxu1 %v6340_v33  ;;  %6295 = vmatprep.subr.bf16.mxu0 %v6294_v24 }
 0x1c7   :  { %6343 = vmatprep.subr.bf16.mxu1 %v6342_v21  ;;  %1427 = vmatprep.mubr.f32.mxu0 %v9417_v63 }
 0x1c8   :  { %2339 = vmatprep.mubr.f32.mxu1 %v9417_v63  ;;  %1429 = vmatmul.mubr.f32.gmra.mrb[6].mxu0 %v7404_v4 }
 0x1c9   :  { %6297 = vmatpush1.bf16.msra.mxu0 %v6296_v17  ;;  %2341 = vmatmul.mubr.f32.gmra.mrb[4].mxu1 %v7404_v4 }
 0x1ca   :  { %6345 = vmatpush1.bf16.msra.mxu1 %v6344_v19  ;;  %1503 = vmatprep.subr.mxu0 %v7636_v31  ;;  %v3645_v31 = vld [vmem:[%s9350_s5 + $0x130] sm:$0xff] }
 0x1cb   :  { %2415 = vmatprep.subr.mxu1 %v7652_v53  ;;  %1434 = vmatprep.mubr.f32.mxu0 %v9417_v63 }
 0x1cc   :  { %2346 = vmatprep.mubr.f32.mxu1 %v9417_v63  ;;  %1436 = vmatmul.mubr.f32.gmra.mrb[8].mxu0 %v7426_v16 }
 0x1cd   :  { %1506 = vmatpush1.msra.mxu0 %v7667_v20  ;;  %2348 = vmatmul.mubr.f32.gmra.mrb[6].mxu1 %v7426_v16 }
 0x1ce   :  { %2418 = vmatpush1.msra.mxu1 %v7664_v22  ;;  %6299 = vmatprep.subr.bf16.mxu0 %v7587_v40 }
 0x1cf   :  { %6347 = vmatprep.subr.bf16.mxu1 %v7564_v44  ;;  %1441 = vmatprep.mubr.f32.mxu0 %v9417_v63 }
 0x1d0   :  { %2353 = vmatprep.mubr.f32.mxu1 %v9417_v63  ;;  %1443 = vmatmul.mubr.f32.gmra.mrb[10].mxu0 %v7431_v18 }
 0x1d1   :  { %2355 = vmatmul.mubr.f32.gmra.mrb[8].mxu1 %v7431_v18  ;;  %1448 = vmatprep.mubr.f32.mxu0 %v9417_v63 }
 0x1d2   :  { %2360 = vmatprep.mubr.f32.mxu1 %v9417_v63 }
 0x1d4   :  { %1450 = vmatmul.mubr.f32.gmra.mrb[12].mxu0 %v7476_v36 }
 0x1d5   :  { %2362 = vmatmul.mubr.f32.gmra.mrb[10].mxu1 %v7476_v36  ;;  %1455 = vmatprep.mubr.f32.mxu0 %v9417_v63 }
 0x1d6   :  { %2367 = vmatprep.mubr.f32.mxu1 %v9417_v63 }
 0x1d8   :  { %1457 = vmatmul.mubr.f32.gmra.mrb[14].mxu0 %v7503_v60 }
 0x1d9   :  { %2369 = vmatmul.mubr.f32.gmra.mrb[12].mxu1 %v7503_v60  ;;  %1462 = vmatprep.mubr.f32.mxu0 %v9417_v63 }
 0x1da   :  { %2374 = vmatprep.mubr.f32.mxu1 %v9417_v63 }
 0x1dc   :  { %1464 = vmatmul.mubr.f32.gmra.mrb[16].mxu0 %v7697_v25 }
 0x1dd   :  { %2376 = vmatmul.mubr.f32.gmra.mrb[14].mxu1 %v7697_v25  ;;  %1469 = vmatprep.mubr.f32.mxu0 %v9417_v63 }
 0x1de   :  { %2381 = vmatprep.mubr.f32.mxu1 %v9417_v63 }
 0x1e0   :  { %1471 = vmatmul.mubr.f32.gmra.mrb[18].mxu0 %v7726_v45 }
 0x1e1   :  { %2383 = vmatmul.mubr.f32.gmra.mrb[16].mxu1 %v7726_v45  ;;  %1561 = vmatprep.mubr.f32.mxu0 %v9417_v63 }
 0x1e2   :  { %2473 = vmatprep.mubr.f32.mxu1 %v9417_v63 }
 0x1e4   :  { %1564 = vmatmul.mubr.f32.vlgmr.msra.gmra.mrb[4].mxu0 %v7420_v13 }
 0x1e5   :  { %6301 = vmatpush1.bf16.msra.mxu0 %v7540_v12  ;;  %2476 = vmatmul.mubr.f32.vlgmr.msra.gmra.mrb[2].mxu1 %v7420_v13  ;;  %v9434_v13 = vand.u32 4294901760, %v7397_v1  ;;  %v1072_v1 = vld [vmem:[%s9349_s4 + $0x10] sm:$0xff] }
 0x1e6   :  { %6349 = vmatpush1.bf16.msra.mxu1 %v9428_v34  ;;  %6303 = vmatprep.subr.bf16.mxu0 %v9429_v42 }
 0x1e7   :  { %6351 = vmatprep.subr.bf16.mxu1 %v9430_v3  ;;  %1569 = vmatprep.mubr.f32.mxu0 %v9417_v63  ;;  %v6306_v30 = vpack.c.bf16 %v9435_v23, %v9434_v13  ;;  %v3650_v13 = vld [vmem:[%s9350_s5 + $0x158] sm:$0xff]  ;;  %v8112_v23 = vpop.permute.xlu0 %1085 }
 0x1e8   :  { %2481 = vmatprep.mubr.f32.mxu1 %v9417_v63  ;;  %1572 = vmatmul.mubr.f32.gmra.mrb[6].mxu0 %v9431_v6 }
 0x1e9   :  { %6305 = vmatpush1.bf16.msra.mxu0 %v9432_v26  ;;  %2484 = vmatmul.mubr.f32.gmra.mrb[4].mxu1 %v9431_v6 }
 0x1ea   :  { %6353 = vmatpush1.bf16.msra.mxu1 %v9433_v10  ;;  %1643 = vmatprep.subr.mxu0 %v7621_v62 }
 0x1eb   :  { %2555 = vmatprep.subr.mxu1 %v7641_v57  ;;  %1577 = vmatprep.mubr.f32.mxu0 %v9417_v63 }
 0x1ec   :  { %2489 = vmatprep.mubr.f32.mxu1 %v9417_v63  ;;  %1580 = vmatmul.mubr.f32.gmra.mrb[8].mxu0 %v7457_v29 }
 0x1ed   :  { %1645 = vmatpush1.msra.mxu0 %v7648_v15  ;;  %2492 = vmatmul.mubr.f32.gmra.mrb[6].mxu1 %v7457_v29  ;;  %v1076_v29 = vld [vmem:[%s9349_s4 + $0x30] sm:$0xff] }
 0x1ee   :  { %2557 = vmatpush1.msra.mxu1 %v7646_v27  ;;  %6307 = vmatprep.subr.bf16.mxu0 %v6306_v30 }
 0x1ef   :  { %6355 = vmatprep.subr.bf16.mxu1 %v6354_v28  ;;  %1585 = vmatprep.mubr.f32.mxu0 %v9417_v63 }
 0x1f0   :  { %2497 = vmatprep.mubr.f32.mxu1 %v9417_v63  ;;  %1588 = vmatmul.mubr.f32.gmra.mrb[10].mxu0 %v7463_v32 }
 0x1f1   :  { %2500 = vmatmul.mubr.f32.gmra.mrb[8].mxu1 %v7463_v32  ;;  %1593 = vmatprep.mubr.f32.mxu0 %v9417_v63  ;;  %v9438_v32 = vand.u32 4294901760, %v7387_v61  ;;  %v9443_v61 = vld [vmem:[#allocation7_spill] sm:$0xff] }
 0x1f2   :  { %2505 = vmatprep.mubr.f32.mxu1 %v9417_v63  ;;  %1090 = vperm.xlu1 %6838, %v1072_v1  }
 0x1f4   :  { %1596 = vmatmul.mubr.f32.gmra.mrb[12].mxu0 %v7501_v59 }
 0x1f5   :  { %2508 = vmatmul.mubr.f32.gmra.mrb[10].mxu1 %v7501_v59  ;;  %1601 = vmatprep.mubr.f32.mxu0 %v9417_v63  ;;  %v9439_v59 = vand.u32 4294901760, %v7478_v37  ;;  %v9445_v37 = vand.u32 4294901760, %v7652_v53 }
 0x1f6   :  { %2513 = vmatprep.mubr.f32.mxu1 %v9417_v63  ;;  %1100 = vperm.xlu1 %6838, %v1074_v8  }
 0x1f8   :  { %1604 = vmatmul.mubr.f32.gmra.mrb[14].mxu0 %v7533_v11 }
 0x1f9   :  { %2516 = vmatmul.mubr.f32.gmra.mrb[12].mxu1 %v7533_v11  ;;  %1609 = vmatprep.mubr.f32.mxu0 %v9417_v63  ;;  %v6308_v11 = vpack.c.bf16 %v9439_v59, %v9438_v32  ;;  %v3629_v32 = vld [vmem:[%s9350_s5 + $0xb0] sm:$0xff]  ;;  %v3630_v59 = vld [vmem:[%s9350_s5 + $0xb8] sm:$0xff] }
 0x1fa   :  { %2521 = vmatprep.mubr.f32.mxu1 %v9417_v63  ;;  %1110 = vperm.xlu1 %6838, %v1076_v29  }
 0x1fc   :  { %1612 = vmatmul.mubr.f32.gmra.mrb[16].mxu0 %v7723_v56 }
 0x1fd   :  { %2524 = vmatmul.mubr.f32.gmra.mrb[14].mxu1 %v7723_v56  ;;  %1617 = vmatprep.mubr.f32.mxu0 %v9417_v63  ;;  %v9442_v56 = vand.u32 4294901760, %v7577_v52  ;;  %v9446_v52 = vand.u32 4294901760, %v7667_v20  ;;  %v3625_v20 = vld [vmem:[%s9350_s5 + $0x90] sm:$0xff] }
 0x1fe   :  { %2529 = vmatprep.mubr.f32.mxu1 %v9417_v63 }
 0x1ff   :  { %v6356_v50 = vpack.c.bf16 %v9442_v56, %v9441_v39  ;;  %v3613_v39 = vld [vmem:[%s9350_s5 + $0x30] sm:$0xff]  ;;  %v3614_v56 = vld [vmem:[%s9350_s5 + $0x38] sm:$0xff] }
 0x200   :  { %1620 = vmatmul.mubr.f32.gmra.mrb[18].mxu0 %v7765_v46 }
 0x201   :  { %2532 = vmatmul.mubr.f32.gmra.mrb[16].mxu1 %v7765_v46  ;;  %1700 = vmatprep.mubr.f32.mxu0 %v9417_v63  ;;  %v3648_v46 = vld [vmem:[%s9350_s5 + $0x148] sm:$0xff] }
 0x202   :  { %2612 = vmatprep.mubr.f32.mxu1 %v9417_v63 }
 0x204   :  { %1704 = vmatmul.mubr.f32.vlgmr.msra.gmra.mrb[4].mxu0 %v9440_v0 }
 0x205   :  { %6309 = vmatpush1.bf16.msra.mxu0 %v6308_v11  ;;  %2616 = vmatmul.mubr.f32.vlgmr.msra.gmra.mrb[2].mxu1 %v9440_v0 }
 0x206   :  { %6357 = vmatpush1.bf16.msra.mxu1 %v6356_v50  ;;  %6311 = vmatprep.subr.bf16.mxu0 %v7732_v41  ;;  %v6382_v50 = vpack.c.bf16 %v3630_v59, %v3629_v32 }
 0x207   :  { %6359 = vmatprep.subr.bf16.mxu1 %v7738_v38  ;;  %1709 = vmatprep.mubr.f32.mxu0 %v9417_v63  ;;  %v3610_v38 = vld [vmem:[%s9350_s5 + $0x18] sm:$0xff] }
 0x208   :  { %2621 = vmatprep.mubr.f32.mxu1 %v9417_v63  ;;  %1713 = vmatmul.mubr.f32.gmra.mrb[6].mxu0 %v9443_v61 }
 0x209   :  { %6313 = vmatpush1.bf16.msra.mxu0 %v7747_v5  ;;  %2625 = vmatmul.mubr.f32.gmra.mrb[4].mxu1 %v9443_v61  ;;  %v9447_v5 = vand.u32 4294901760, %v7664_v22 }
 0x20a   :  { %6361 = vmatpush1.bf16.msra.mxu1 %v7753_v51  ;;  %1808 = vmatprep.subr.mxu0 %v9444_v7  ;;  %v3626_v51 = vld [vmem:[%s9350_s5 + $0x98] sm:$0xff] }
 0x20b   :  { %2720 = vmatprep.subr.mxu1 %v9445_v37  ;;  %1718 = vmatprep.mubr.f32.mxu0 %v9417_v63  ;;  %v6374_v41 = vpack.c.bf16 %v3626_v51, %v3625_v20  ;;  %v6384_v37 = vpack.c.bf16 %v3614_v56, %v3613_v39  ;;  %v3633_v51 = vld [vmem:[%s9350_s5 + $0xd0] sm:$0xff] }
 0x20c   :  { %2630 = vmatprep.mubr.f32.mxu1 %v9417_v63  ;;  %1722 = vmatmul.mubr.f32.gmra.mrb[8].mxu0 %v7492_v48  ;;  %v3637_v56 = vld [vmem:[%s9350_s5 + $0xf0] sm:$0xff] }
 0x20d   :  { %1812 = vmatpush1.msra.mxu0 %v9446_v52  ;;  %2634 = vmatmul.mubr.f32.gmra.mrb[6].mxu1 %v7492_v48  ;;  %v3643_v48 = vld [vmem:[%s9350_s5 + $0x120] sm:$0xff] }
 0x20e   :  { %2724 = vmatpush1.msra.mxu1 %v9447_v5  ;;  %6315 = vmatprep.subr.bf16.mxu0 %v7587_v40  ;;  %v3608_v40 = vld [vmem:[%s9350_s5 + $0x8] sm:$0xff]  ;;  %v3651_v52 = vld [vmem:[%s9350_s5 + $0x160] sm:$0xff] }
 0x20f   :  { %6363 = vmatprep.subr.bf16.mxu1 %v7564_v44  ;;  %1727 = vmatprep.mubr.f32.mxu0 %v9417_v63  ;;  %v3624_v44 = vld [vmem:[%s9350_s5 + $0x88] sm:$0xff] }
 0x210   :  { %2639 = vmatprep.mubr.f32.mxu1 %v9417_v63  ;;  %1731 = vmatmul.mubr.f32.gmra.mrb[10].mxu0 %v7496_v54  ;;  %v3652_v5 = vld [vmem:[%s9350_s5 + $0x168] sm:$0xff] }
 0x211   :  { %2643 = vmatmul.mubr.f32.gmra.mrb[8].mxu1 %v7496_v54  ;;  %1736 = vmatprep.mubr.f32.mxu0 %v9417_v63  ;;  %v3644_v54 = vld [vmem:[%s9350_s5 + $0x128] sm:$0xff] }
 0x212   :  { %2648 = vmatprep.mubr.f32.mxu1 %v9417_v63 }
 0x214   :  { %1740 = vmatmul.mubr.f32.gmra.mrb[12].mxu0 %v7530_v9 }
 0x215   :  { %2652 = vmatmul.mubr.f32.gmra.mrb[10].mxu1 %v7530_v9  ;;  %1745 = vmatprep.mubr.f32.mxu0 %v9417_v63  ;;  %v9391_v9 = vmov 0.0|0.0  }
 0x216   :  { %2657 = vmatprep.mubr.f32.mxu1 %v9417_v63 }
 0x218   :  { %1749 = vmatmul.mubr.f32.gmra.mrb[14].mxu0 %v7719_v55 }
 0x219   :  { %2661 = vmatmul.mubr.f32.gmra.mrb[12].mxu1 %v7719_v55  ;;  %1754 = vmatprep.mubr.f32.mxu0 %v9417_v63 }
 0x21a   :  { %2666 = vmatprep.mubr.f32.mxu1 %v9417_v63 }
 0x21c   :  { %1758 = vmatmul.mubr.f32.gmra.mrb[16].mxu0 %v7762_v49 }
 0x21d   :  { %2670 = vmatmul.mubr.f32.gmra.mrb[14].mxu1 %v7762_v49  ;;  %1763 = vmatprep.mubr.f32.mxu0 %v9417_v63  ;;  %v3647_v49 = vld [vmem:[%s9350_s5 + $0x140] sm:$0xff] }
 0x21e   :  { %2675 = vmatprep.mubr.f32.mxu1 %v9417_v63  ;;  %v6415_v24 = vpack.c.bf16 %v3648_v46, %v3647_v49  ;;  %v3618_v46 = vld [vmem:[%s9350_s5 + $0x58] sm:$0xff] }
 0x220   :  { %1767 = vmatmul.mubr.f32.gmra.mrb[18].mxu0 %v7772_v35 }
 0x221   :  { %2679 = vmatmul.mubr.f32.gmra.mrb[16].mxu1 %v7772_v35  ;;  %1867 = vmatprep.mubr.f32.mxu0 %v9417_v63 }
 0x222   :  { %2779 = vmatprep.mubr.f32.mxu1 %v9417_v63 }
 0x224   :  { %1869 = vmatmul.mubr.f32.vlgmr.msra.gmra.mrb[4].mxu0 %v7399_v2 }
 0x225   :  { %6317 = vmatpush1.bf16.msra.mxu0 %v7540_v12  ;;  %2781 = vmatmul.mubr.f32.vlgmr.msra.gmra.mrb[2].mxu1 %v7399_v2  ;;  %v3607_v12 = vld [vmem:[%s9350_s5] sm:$0xff] }
 0x226   :  { %6365 = vmatpush1.bf16.msra.mxu1 %v9428_v34  ;;  %6319 = vmatprep.subr.bf16.mxu0 %v9429_v42  ;;  %v6372_v53 = vpack.c.bf16 %v3608_v40, %v3607_v12  ;;  %v3628_v34 = vld [vmem:[%s9350_s5 + $0xa8] sm:$0xff]  ;;  %v3611_v42 = vld [vmem:[%s9350_s5 + $0x20] sm:$0xff]  ;;  %v3654_v40 = vld [vmem:[%s9350_s5 + $0x178] sm:$0xff] }
 0x227   :  { %6367 = vmatprep.subr.bf16.mxu1 %v9430_v3  ;;  %1874 = vmatprep.mubr.f32.mxu0 %v9417_v63  ;;  %v6378_v6 = vpack.c.bf16 %v3628_v34, %v3627_v14  ;;  %v3616_v12 = vld [vmem:[%s9350_s5 + $0x48] sm:$0xff] }
 0x228   :  { %2786 = vmatprep.mubr.f32.mxu1 %v9417_v63  ;;  %1876 = vmatmul.mubr.f32.gmra.mrb[6].mxu0 %v7404_v4 }
 0x229   :  { %6321 = vmatpush1.bf16.msra.mxu0 %v9432_v26  ;;  %2788 = vmatmul.mubr.f32.gmra.mrb[4].mxu1 %v7404_v4  ;;  %v3612_v26 = vld [vmem:[%s9350_s5 + $0x28] sm:$0xff] }
 0x22a   :  { %6369 = vmatpush1.bf16.msra.mxu1 %v9433_v10  ;;  %1941 = vmatprep.subr.mxu0 %v7621_v62  ;;  %v3646_v62 = vld [vmem:[%s9350_s5 + $0x138] sm:$0xff]  ;;  %v3649_v10 = vld [vmem:[%s9350_s5 + $0x150] sm:$0xff]  ;;  %v6380_v8 = vpack.c.bf16 %v3612_v26, %v3611_v42  ;;  %v3619_v26 = vld [vmem:[%s9350_s5 + $0x60] sm:$0xff] }
 0x22b   :  { %2853 = vmatprep.subr.mxu1 %v7641_v57  ;;  %1881 = vmatprep.mubr.f32.mxu0 %v9417_v63  ;;  %v6409_v57 = vpack.c.bf16 %v3644_v54, %v3643_v48  ;;  %v6412_v22 = vpack.c.bf16 %v3646_v62, %v3645_v31  ;;  %v6418_v29 = vpack.c.bf16 %v3650_v13, %v3649_v10  ;;  %v3632_v48 = vld [vmem:[%s9350_s5 + $0xc8] sm:$0xff]  ;;  %v3615_v54 = vld [vmem:[%s9350_s5 + $0x40] sm:$0xff] }
 0x22c   :  { %2793 = vmatprep.mubr.f32.mxu1 %v9417_v63  ;;  %1883 = vmatmul.mubr.f32.gmra.mrb[8].mxu0 %v7426_v16  ;;  %v6388_v62 = vpack.c.bf16 %v3616_v12, %v3615_v54 }
 0x22d   :  { %1943 = vmatpush1.msra.mxu0 %v7648_v15  ;;  %2795 = vmatmul.mubr.f32.gmra.mrb[6].mxu1 %v7426_v16 }
 0x22e   :  { %2855 = vmatpush1.msra.mxu1 %v7646_v27  ;;  %1888 = vmatprep.mubr.f32.mxu0 %v9417_v63 }
 0x22f   :  { %2800 = vmatprep.mubr.f32.mxu1 %v9417_v63  ;;  %6402 = vmatprep.subr.bf16.mxu1 %v9391_v9 }
 0x230   :  { %1890 = vmatmul.mubr.f32.gmra.mrb[10].mxu0 %v7431_v18 }
 0x231   :  { %2802 = vmatmul.mubr.f32.gmra.mrb[8].mxu1 %v7431_v18  ;;  %1895 = vmatprep.mubr.f32.mxu0 %v9417_v63 }
 0x232   :  { %2807 = vmatprep.mubr.f32.mxu1 %v9417_v63 }
 0x234   :  { %1897 = vmatmul.mubr.f32.gmra.mrb[12].mxu0 %v7476_v36 }
 0x235   :  { %2809 = vmatmul.mubr.f32.gmra.mrb[10].mxu1 %v7476_v36  ;;  %1902 = vmatprep.mubr.f32.mxu0 %v9417_v63  ;;  %v8071_v55 = vpop.permute.xlu1 %1080 }
 0x236   :  { %2814 = vmatprep.mubr.f32.mxu1 %v9417_v63 }
 0x238   :  { %1904 = vmatmul.mubr.f32.gmra.mrb[14].mxu0 %v7503_v60 }
 0x239   :  { %2816 = vmatmul.mubr.f32.gmra.mrb[12].mxu1 %v7503_v60  ;;  %1909 = vmatprep.mubr.f32.mxu0 %v9417_v63 }
 0x23a   :  { %2821 = vmatprep.mubr.f32.mxu1 %v9417_v63 }
 0x23c   :  { %1911 = vmatmul.mubr.f32.gmra.mrb[16].mxu0 %v7697_v25 }
 0x23d   :  { %2823 = vmatmul.mubr.f32.gmra.mrb[14].mxu1 %v7697_v25  ;;  %1916 = vmatprep.mubr.f32.mxu0 %v9417_v63 }
 0x23e   :  { %2828 = vmatprep.mubr.f32.mxu1 %v9417_v63 }
 0x240   :  { %1918 = vmatmul.mubr.f32.gmra.mrb[18].mxu0 %v7726_v45 }
 0x241   :  { %2830 = vmatmul.mubr.f32.gmra.mrb[16].mxu1 %v7726_v45  ;;  %1998 = vmatprep.mubr.f32.mxu0 %v9417_v63 }
 0x242   :  { %2910 = vmatprep.mubr.f32.mxu1 %v9417_v63 }
 0x244   :  { %2000 = vmatmul.mubr.f32.vlgmr.msra.gmra.mrb[4].mxu0 %v7399_v2 }
 0x245   :  { %2912 = vmatmul.mubr.f32.vlgmr.msra.gmra.mrb[2].mxu1 %v7399_v2  ;;  %2005 = vmatprep.mubr.f32.mxu0 %v9417_v63  ;;  %v3639_v2 = vld [vmem:[%s9350_s5 + $0x100] sm:$0xff] }
 0x246   :  { %2917 = vmatprep.mubr.f32.mxu1 %v9417_v63 }
 0x248   :  { %2007 = vmatmul.mubr.f32.gmra.mrb[6].mxu0 %v7404_v4 }
 0x249   :  { %2919 = vmatmul.mubr.f32.gmra.mrb[4].mxu1 %v7404_v4  ;;  %2012 = vmatprep.mubr.f32.mxu0 %v9417_v63  ;;  %v3640_v4 = vld [vmem:[%s9350_s5 + $0x108] sm:$0xff] }
 0x24a   :  { %2924 = vmatprep.mubr.f32.mxu1 %v9417_v63  ;;  %v6403_v15 = vpack.c.bf16 %v3640_v4, %v3639_v2 }
 0x24c   :  { %2014 = vmatmul.mubr.f32.gmra.mrb[8].mxu0 %v7426_v16  ;;  %6404 = vmatpush1.bf16.msra.mxu1 %v6403_v15 }
 0x24d   :  { %2926 = vmatmul.mubr.f32.gmra.mrb[6].mxu1 %v7426_v16  ;;  %2019 = vmatprep.mubr.f32.mxu0 %v9417_v63  ;;  %v3641_v16 = vld [vmem:[%s9350_s5 + $0x110] sm:$0xff] }
 0x24e   :  { %2931 = vmatprep.mubr.f32.mxu1 %v9417_v63  ;;  %6405 = vmatprep.subr.bf16.mxu1 %v9391_v9 }
 0x250   :  { %2021 = vmatmul.mubr.f32.gmra.mrb[10].mxu0 %v7431_v18 }
 0x251   :  { %2933 = vmatmul.mubr.f32.gmra.mrb[8].mxu1 %v7431_v18  ;;  %2026 = vmatprep.mubr.f32.mxu0 %v9417_v63  ;;  %v3642_v18 = vld [vmem:[%s9350_s5 + $0x118] sm:$0xff] }
 0x252   :  { %2938 = vmatprep.mubr.f32.mxu1 %v9417_v63 }
 0x254   :  { %2028 = vmatmul.mubr.f32.gmra.mrb[12].mxu0 %v7476_v36 }
 0x255   :  { %2940 = vmatmul.mubr.f32.gmra.mrb[10].mxu1 %v7476_v36  ;;  %2033 = vmatprep.mubr.f32.mxu0 %v9417_v63  ;;  %v6406_v36 = vpack.c.bf16 %v3642_v18, %v3641_v16  ;;  %v6421_v16 = vpack.c.bf16 %v3652_v5, %v3651_v52 }
 0x256   :  { %2945 = vmatprep.mubr.f32.mxu1 %v9417_v63 }
 0x257   :  { %6407 = vmatpush1.bf16.msra.mxu1 %v6406_v36  ;;  %v3631_v36 = vld [vmem:[%s9350_s5 + $0xc0] sm:$0xff] }
 0x258   :  { %2035 = vmatmul.mubr.f32.gmra.mrb[14].mxu0 %v7503_v60  ;;  %6408 = vmatprep.subr.bf16.mxu1 %v9391_v9 }
 0x259   :  { %2947 = vmatmul.mubr.f32.gmra.mrb[12].mxu1 %v7503_v60  ;;  %2040 = vmatprep.mubr.f32.mxu0 %v9417_v63  ;;  %v3623_v60 = vld [vmem:[%s9350_s5 + $0x80] sm:$0xff] }
 0x25a   :  { %2952 = vmatprep.mubr.f32.mxu1 %v9417_v63  ;;  %v6370_v27 = vpack.c.bf16 %v3624_v44, %v3623_v60  ;;  %v6386_v44 = vpack.c.bf16 %v3632_v48, %v3631_v36 }
 0x25b   :  { %6410 = vmatpush1.bf16.msra.mxu1 %v6409_v57 }
 0x25c   :  { %2042 = vmatmul.mubr.f32.gmra.mrb[16].mxu0 %v7697_v25  ;;  %6411 = vmatprep.subr.bf16.mxu1 %v9391_v9 }
 0x25d   :  { %2954 = vmatmul.mubr.f32.gmra.mrb[14].mxu1 %v7697_v25  ;;  %2047 = vmatprep.mubr.f32.mxu0 %v9417_v63  ;;  %v3609_v25 = vld [vmem:[%s9350_s5 + $0x10] sm:$0xff] }
 0x25e   :  { %2959 = vmatprep.mubr.f32.mxu1 %v9417_v63  ;;  %6371 = vmatprep.subr.bf16.mxu0 %v6370_v27  ;;  %v6376_v33 = vpack.c.bf16 %v3610_v38, %v3609_v25  ;;  %v3653_v27 = vld [vmem:[%s9350_s5 + $0x170] sm:$0xff]  ;;  %v3634_v25 = vld [vmem:[%s9350_s5 + $0xd8] sm:$0xff] }
 0x25f   :  { %6373 = vmatpush3.bf16.msra.mxu0 %v6372_v53  ;;  %6413 = vmatpush1.bf16.msra.mxu1 %v6412_v22  ;;  %v6424_v53 = vpack.c.bf16 %v3654_v40, %v3653_v27 }
 0x260   :  { %2049 = vmatmul.mubr.f32.gmra.mrb[18].mxu0 %v7726_v45  ;;  %6414 = vmatprep.subr.bf16.mxu1 %v9391_v9 }
 0x261   :  { %2961 = vmatmul.mubr.f32.gmra.mrb[16].mxu1 %v7726_v45  ;;  %6375 = vmatprep.subr.bf16.mxu0 %v6374_v41  ;;  %v3617_v41 = vld [vmem:[%s9350_s5 + $0x50] sm:$0xff] }
 0x262   :  { %v6392_v14 = vpack.c.bf16 %v3618_v46, %v3617_v41 }
 0x263   :  { %6377 = vmatpush3.bf16.msra.mxu0 %v6376_v33  ;;  %6416 = vmatpush1.bf16.msra.mxu1 %v6415_v24 }
 0x264   :  { %6379 = vmatprep.subr.bf16.mxu0 %v6378_v6  ;;  %6417 = vmatprep.subr.bf16.mxu1 %v9391_v9 }
 0x267   :  { %6381 = vmatpush3.bf16.msra.mxu0 %v6380_v8  ;;  %6419 = vmatpush1.bf16.msra.mxu1 %v6418_v29  ;;  %v3658_v8 = vld [vmem:[%s9350_s5 + $0x198] sm:$0xff] }
 0x268   :  { %6383 = vmatprep.subr.bf16.mxu0 %v6382_v50  ;;  %6420 = vmatprep.subr.bf16.mxu1 %v9391_v9  ;;  %v3638_v50 = vld [vmem:[%s9350_s5 + $0xf8] sm:$0xff] }
 0x269   :  { %v6398_v48 = vpack.c.bf16 %v3638_v50, %v3637_v56 }
 0x26b   :  { %6385 = vmatpush3.bf16.msra.mxu0 %v6384_v37  ;;  %6422 = vmatpush1.bf16.msra.mxu1 %v6421_v16  ;;  %v3621_v37 = vld [vmem:[%s9350_s5 + $0x70] sm:$0xff]  ;;  %v3622_v16 = vld [vmem:[%s9350_s5 + $0x78] sm:$0xff] }
 0x26c   :  { %6387 = vmatprep.subr.bf16.mxu0 %v6386_v44  ;;  %6423 = vmatprep.subr.bf16.mxu1 %v9391_v9  ;;  %v6400_v54 = vpack.c.bf16 %v3622_v16, %v3621_v37 }
 0x26f   :  { %6389 = vmatpush3.bf16.msra.mxu0 %v6388_v62  ;;  %6425 = vmatpush1.bf16.msra.mxu1 %v6424_v53 }
 0x270   :  { %6426 = vmatprep.subr.bf16.mxu1 %v9391_v9 }
 0x271   :  { %v1091_v62 = vpop.permute.xlu1 %1090 }
 0x317   :  { %v8073_v45 = vpop.f32.mrb[4].mxu0 }
 0x318   :  { %v2913_v35 = vpop.f32.mrb[2].mxu1  ;;  %v2003_v43 = vpop.f32.mrb[5].mxu0  ;;  %v8226_v33 = vadd.f32 %v8073_v45, %v8071_v55  ;;  %v3636_v45 = vld [vmem:[%s9350_s5 + $0xe8] sm:$0xff] }
 0x319   :  { %v8086_v21 = vadd.f32 %v2913_v35, %v8071_v55  ;;  %v2915_v17 = vpop.f32.mrb[3].mxu1  ;;  %v8089_v19 = vadd.f32 %v2003_v43, %v8071_v55  ;;  %v3655_v35 = vld [vmem:[%s9350_s5 + $0x180] sm:$0xff]  ;;  %v3656_v43 = vld [vmem:[%s9350_s5 + $0x188] sm:$0xff] }
 0x31a   :  { %v8101_v3 = vadd.f32 %v2915_v17, %v8071_v55  ;;  %v6390_v17 = vpack.c.bf16 %v3634_v25, %v3633_v51  ;;  %v6427_v34 = vpack.c.bf16 %v3656_v43, %v3655_v35  ;;  %v3635_v55 = vld [vmem:[%s9350_s5 + $0xe0] sm:$0xff] }
 0x31b   :  { %v2008_v30 = vpop.f32.mrb[6].mxu0  ;;  %v8116_v47 = vpack.i.bf16 %v8086_v21, %v8089_v19 }
 0x31c   :  { %v2920_v58 = vpop.f32.mrb[4].mxu1  ;;  %3461 = vrot.lane.b32.xlu0 %v8101_v3, %s7188_s20  ;;  %v8121_v28 = vadd.f32 %v2008_v30, %v8112_v23  ;;  %v2010_v1 = vpop.f32.mrb[7].mxu0  ;;  %6391 = vmatprep.subr.bf16.mxu0 %v6390_v17  ;;  %v6394_v30 = vpack.c.bf16 %v3636_v45, %v3635_v55 }
 0x31d   :  { %v8130_v11 = vadd.f32 %v2920_v58, %v8112_v23  ;;  %v8132_v0 = vpop.f32.mrb[5].mxu1  ;;  %6840 = vrot.lane.b32.xlu1 %v8116_v47, %s7186_s1  ;;  %v8198_v22 = vadd.f32 %v2010_v1, %v8112_v23  ;;  %6428 = vmatpush1.bf16.msra.mxu1 %v6427_v34  ;;  %v3620_v58 = vld [vmem:[%s9350_s5 + $0x68] sm:$0xff]  ;;  %v3657_v1 = vld [vmem:[%s9350_s5 + $0x190] sm:$0xff] }
 0x31e   :  { %6393 = vmatpush3.bf16.msra.mxu0 %v6392_v14  ;;  %v6396_v32 = vpack.c.bf16 %v3620_v58, %v3619_v26  ;;  %6429 = vmatprep.subr.bf16.mxu1 %v9391_v9  ;;  %v6430_v59 = vpack.c.bf16 %v3658_v8, %v3657_v1 }
 0x31f   :  { %v8143_v61 = vpop.f32.mrb[8].mxu0  ;;  %v8147_v7 = vpack.i.bf16 %v8121_v28, %v8130_v11  ;;  %v6879_v6 = vpack.i.bf16 %v8198_v22, %v8226_v33  ;;  %6395 = vmatprep.subr.bf16.mxu0 %v6394_v30 }
 0x320   :  { %v8155_v2 = vpop.f32.mrb[6].mxu1  ;;  %v8157_v4 = vpop.f32.mrb[9].mxu0 }
 0x321   :  { %v8159_v15 = vpop.f32.mrb[7].mxu1  ;;  %6860 = vrot.lane.b32.xlu0 %v8147_v7, %s7186_s1  ;;  %6845 = vrot.lane.b32.xlu1 %v8116_v47, %s7187_s2  ;;  %v8313_v53 = vadd.f32 %v8155_v2, %v1091_v62  ;;  %v8316_v51 = vadd.f32 %v8157_v4, %v1091_v62 }
 0x322   :  { %6431 = vmatpush1.bf16.msra.mxu1 %v6430_v59  ;;  %6397 = vmatpush3.bf16.msra.mxu0 %v6396_v32 }
 0x323   :  { %v8166_v18 = vpop.f32.mrb[10].mxu0  ;;  %6399 = vmatprep.subr.bf16.mxu0 %v6398_v48 }
 0x324   :  { %v8177_v57 = vpop.f32.mrb[8].mxu1  ;;  %v8179_v60 = vpop.f32.mrb[11].mxu0 }
 0x325   :  { %v8190_v31 = vpop.f32.mrb[9].mxu1  ;;  %6865 = vrot.lane.b32.xlu0 %v8147_v7, %s7187_s2  ;;  %3005 = vrot.lane.b32.xlu1 %v8101_v3, %s7186_s1 }
 0x326   :  { %6401 = vmatpush3.bf16.msra.mxu0 %v6400_v54 }
 0x327   :  { %v8200_v20 = vpop.f32.mrb[12].mxu0 }
 0x328   :  { %v8211_v38 = vpop.f32.mrb[10].mxu1  ;;  %v8213_v49 = vpop.f32.mrb[13].mxu0 }
 0x329   :  { %v8228_v24 = vpop.f32.mrb[11].mxu1  ;;  %6870 = vrot.lane.b32.xlu0 %v8147_v7, %s7185_s0  ;;  %6850 = vrot.lane.b32.xlu1 %v8116_v47, %s7185_s0 }
 0x32b   :  { %v8235_v42 = vpop.f32.mrb[14].mxu0 }
 0x32c   :  { %v8248_v10 = vpop.f32.mrb[12].mxu1  ;;  %v8250_v13 = vpop.f32.mrb[15].mxu0 }
 0x32d   :  { %v8261_v29 = vpop.f32.mrb[13].mxu1  ;;  %6880 = vrot.lane.b32.xlu0 %v6879_v6, %s7186_s1  ;;  %3157 = vrot.lane.b32.xlu1 %v8101_v3, %s7187_s2 }
 0x32f   :  { %v8267_v39 = vpop.f32.mrb[16].mxu0 }
 0x330   :  { %v8278_v52 = vpop.f32.mrb[14].mxu1  ;;  %v8280_v5 = vpop.f32.mrb[17].mxu0 }
 0x331   :  { %v8285_v36 = vpop.f32.mrb[15].mxu1  ;;  %6885 = vrot.lane.b32.xlu0 %v6879_v6, %s7187_s2  ;;  %6855 = vrot.lane.b32.xlu1 %v8116_v47, %s7188_s20  ;;  %v8306_v47 = vadd.f32 %v8132_v0, %v8112_v23  ;;  %v6899_v23 = vpack.i.bf16 %v8313_v53, %v8316_v51  ;;  %v8327_v0 = vadd.f32 %v8159_v15, %v1091_v62 }
 0x333   :  { %v8290_v44 = vpop.f32.mrb[18].mxu0 }
 0x334   :  { %v8292_v12 = vpop.f32.mrb[16].mxu1  ;;  %v8294_v27 = vpop.f32.mrb[19].mxu0 }
 0x335   :  { %v8296_v40 = vpop.f32.mrb[17].mxu1  ;;  %6890 = vrot.lane.b32.xlu0 %v6879_v6, %s7185_s0  ;;  %3309 = vrot.lane.b32.xlu1 %v8101_v3, %s7185_s0 }
 0x339   :  { %6895 = vrot.lane.b32.xlu0 %v6879_v6, %s7188_s20  ;;  %6875 = vrot.lane.b32.xlu1 %v8147_v7, %s7188_s20  ;;  %v1096_v7 = vpop.permute.xlu0 %1095 }
 0x33a   :  { %v8336_v2 = vadd.f32 %v8166_v18, %v1096_v7  ;;  %v8339_v4 = vadd.f32 %v8177_v57, %v1096_v7  ;;  %v8350_v25 = vadd.f32 %v8179_v60, %v1096_v7  ;;  %v8353_v18 = vadd.f32 %v8143_v61, %v1091_v62  ;;  %v1101_v61 = vpop.permute.xlu1 %1100 }
 0x33b   :  { %v8364_v60 = vadd.f32 %v8190_v31, %v1096_v7  ;;  %v8371_v41 = vadd.f32 %v8211_v38, %v1101_v61  ;;  %v8374_v46 = vadd.f32 %v8213_v49, %v1101_v61  ;;  %v8385_v35 = vadd.f32 %v8228_v24, %v1101_v61 }
 0x33c   :  { %v6919_v15 = vpack.i.bf16 %v8336_v2, %v8339_v4  ;;  %v6944_v57 = vpack.i.bf16 %v8350_v25, %v8353_v18  ;;  %v8411_v14 = vadd.f32 %v8200_v20, %v1101_v61 }
 0x33d   :  { %3165 = vrot.lane.b32.xlu0 %v8306_v47, %s7187_s2  ;;  %3013 = vrot.lane.b32.xlu1 %v8306_v47, %s7186_s1  ;;  %v6959_v31 = vpack.i.bf16 %v8371_v41, %v8374_v46  ;;  %v1106_v38 = vpop.permute.xlu0 %1105 }
 0x33e   :  { %v8394_v49 = vadd.f32 %v8235_v42, %v1106_v38  ;;  %v8397_v43 = vadd.f32 %v8248_v10, %v1106_v38  ;;  %v8408_v17 = vadd.f32 %v8250_v13, %v1106_v38  ;;  %v1111_v6 = vpop.permute.xlu1 %1110  ;;  %v8424_v20 = vadd.f32 %v8261_v29, %v1106_v38 }
 0x33f   :  { %v8433_v45 = vadd.f32 %v8278_v52, %v1111_v6  ;;  %v8436_v26 = vadd.f32 %v8280_v5, %v1111_v6  ;;  %v8453_v1 = vadd.f32 %v8285_v36, %v1111_v6 }
 0x340   :  { %v6979_v24 = vpack.i.bf16 %v8394_v49, %v8397_v43  ;;  %v7004_v34 = vpack.i.bf16 %v8408_v17, %v8411_v14 }
 0x341   :  { %3469 = vrot.lane.b32.xlu0 %v8306_v47, %s7188_s20  ;;  %3317 = vrot.lane.b32.xlu1 %v8306_v47, %s7185_s0  ;;  %v8421_v42 = vpop.permute.xlu0 %1115  ;;  %v7019_v58 = vpack.i.bf16 %v8433_v45, %v8436_v26 }
 0x342   :  { %v8464_v56 = vadd.f32 %v8290_v44, %v8421_v42  ;;  %v8468_v50 = vadd.f32 %v8292_v12, %v8421_v42  ;;  %v8476_v36 = vadd.f32 %v8294_v27, %v8421_v42  ;;  %v8483_v12 = vadd.f32 %v8267_v39, %v1111_v6 }
 0x344   :  { %9448 = vst [vmem:[#allocation10_spill] sm:$0xff] %v8464_v56  ;;  %9449 = vst [vmem:[#allocation9_spill] sm:$0xff] %v8468_v50  ;;  %v7039_v27 = vpack.i.bf16 %v8464_v56, %v8468_v50  ;;  %v8497_v39 = vpack.i.bf16 %v8476_v36, %v8483_v12 }
 0x345   :  { %6900 = vrot.lane.b32.xlu0 %v6899_v23, %s7186_s1  ;;  %6905 = vrot.lane.b32.xlu1 %v6899_v23, %s7187_s2  ;;  %9450 = vst [vmem:[#allocation11_spill] sm:$0xff] %v8476_v36  ;;  %9451 = vst [vmem:[#allocation5_spill] sm:$0xff] %v8483_v12 }
 0x349   :  { %6910 = vrot.lane.b32.xlu0 %v6899_v23, %s7185_s0  ;;  %3021 = vrot.lane.b32.xlu1 %v8327_v0, %s7186_s1 }
 0x34d   :  { %3173 = vrot.lane.b32.xlu0 %v8327_v0, %s7187_s2  ;;  %6915 = vrot.lane.b32.xlu1 %v6899_v23, %s7188_s20 }
 0x351   :  { %3477 = vrot.lane.b32.xlu0 %v8327_v0, %s7188_s20  ;;  %3325 = vrot.lane.b32.xlu1 %v8327_v0, %s7185_s0 }
 0x355   :  { %6920 = vrot.lane.b32.xlu0 %v6919_v15, %s7186_s1  ;;  %6925 = vrot.lane.b32.xlu1 %v6919_v15, %s7187_s2 }
 0x359   :  { %6930 = vrot.lane.b32.xlu0 %v6919_v15, %s7185_s0  ;;  %6935 = vrot.lane.b32.xlu1 %v6919_v15, %s7188_s20 }
 0x35d   :  { %6945 = vrot.lane.b32.xlu0 %v6944_v57, %s7187_s2  ;;  %6940 = vrot.lane.b32.xlu1 %v6944_v57, %s7186_s1 }
 0x361   :  { %6955 = vrot.lane.b32.xlu0 %v6944_v57, %s7188_s20  ;;  %6950 = vrot.lane.b32.xlu1 %v6944_v57, %s7185_s0 }
 0x365   :  { %3181 = vrot.lane.b32.xlu0 %v8364_v60, %s7187_s2  ;;  %3029 = vrot.lane.b32.xlu1 %v8364_v60, %s7186_s1 }
 0x369   :  { %3485 = vrot.lane.b32.xlu0 %v8364_v60, %s7188_s20  ;;  %3333 = vrot.lane.b32.xlu1 %v8364_v60, %s7185_s0 }
 0x36d   :  { %6960 = vrot.lane.b32.xlu0 %v6959_v31, %s7186_s1  ;;  %6965 = vrot.lane.b32.xlu1 %v6959_v31, %s7187_s2 }
 0x371   :  { %6970 = vrot.lane.b32.xlu0 %v6959_v31, %s7185_s0  ;;  %3037 = vrot.lane.b32.xlu1 %v8385_v35, %s7186_s1 }
 0x375   :  { %3189 = vrot.lane.b32.xlu0 %v8385_v35, %s7187_s2  ;;  %6975 = vrot.lane.b32.xlu1 %v6959_v31, %s7188_s20 }
 0x379   :  { %3493 = vrot.lane.b32.xlu0 %v8385_v35, %s7188_s20  ;;  %3341 = vrot.lane.b32.xlu1 %v8385_v35, %s7185_s0 }
 0x37d   :  { %6980 = vrot.lane.b32.xlu0 %v6979_v24, %s7186_s1  ;;  %6985 = vrot.lane.b32.xlu1 %v6979_v24, %s7187_s2 }
 0x381   :  { %6990 = vrot.lane.b32.xlu0 %v6979_v24, %s7185_s0  ;;  %6995 = vrot.lane.b32.xlu1 %v6979_v24, %s7188_s20 }
 0x385   :  { %7005 = vrot.lane.b32.xlu0 %v7004_v34, %s7187_s2  ;;  %7000 = vrot.lane.b32.xlu1 %v7004_v34, %s7186_s1 }
 0x389   :  { %7015 = vrot.lane.b32.xlu0 %v7004_v34, %s7188_s20  ;;  %7010 = vrot.lane.b32.xlu1 %v7004_v34, %s7185_s0 }
 0x38d   :  { %3197 = vrot.lane.b32.xlu0 %v8424_v20, %s7187_s2  ;;  %3045 = vrot.lane.b32.xlu1 %v8424_v20, %s7186_s1 }
 0x38e   :  { %v8430_v55 = vpop.permute.xlu0 %3461 }
 0x38f   :  { %v8438_v10 = vpop.permute.xlu1 %6840 }
 0x390   :  { %v6843_v32 = vunpack.i.h.bf16 %v8438_v10  ;;  %v6842_v59 = vunpack.i.l.bf16 %v8438_v10 }
 0x391   :  { %3501 = vrot.lane.b32.xlu0 %v8424_v20, %s7188_s20  ;;  %3349 = vrot.lane.b32.xlu1 %v8424_v20, %s7185_s0 }
 0x392   :  { %v3064_v48 = vsel %vm1006_vm2, %v6842_v59, %v6843_v32 }
 0x393   :  { %v8444_v13 = vpop.permute.xlu0 %6860  ;;  %v8446_v30 = vpop.permute.xlu1 %6845  ;;  %v3120_v15 = vmax.f32 %v8089_v19, %v3064_v48 }
 0x394   :  { %v6848_v37 = vunpack.i.h.bf16 %v8446_v30  ;;  %v6847_v52 = vunpack.i.l.bf16 %v8446_v30  ;;  %v9395_v31 = vunpack.i.l.bf16 %v8444_v13  ;;  %v6863_v38 = vunpack.i.h.bf16 %v8444_v13 }
 0x395   :  { %7020 = vrot.lane.b32.xlu0 %v7019_v58, %s7186_s1  ;;  %7025 = vrot.lane.b32.xlu1 %v7019_v58, %s7187_s2 }
 0x396   :  { %v3216_v62 = vsel %vm1022_vm3, %v6847_v52, %v6848_v37 }
 0x397   :  { %v8455_v8 = vpop.permute.xlu0 %6865  ;;  %v3006_v29 = vpop.permute.xlu1 %3005  ;;  %v3272_v19 = vmax.f32 %v3120_v15, %v3216_v62 }
 0x398   :  { %v3065_v57 = vsel %vm1006_vm2, %v6843_v32, %v3006_v29  ;;  %v3122_v10 = vmax.f32 %v8101_v3, %v3006_v29  ;;  %v6868_v62 = vunpack.i.h.bf16 %v8455_v8 }
 0x399   :  { %7030 = vrot.lane.b32.xlu0 %v7019_v58, %s7185_s0  ;;  %3053 = vrot.lane.b32.xlu1 %v8453_v1, %s7186_s1  ;;  %v3121_v6 = vmax.f32 %v8086_v21, %v3065_v57 }
 0x39b   :  { %v8472_v5 = vpop.permute.xlu0 %6870  ;;  %v6851_v16 = vpop.permute.xlu1 %6850 }
 0x39c   :  { %v6853_v54 = vunpack.i.h.bf16 %v6851_v16  ;;  %v6852_v44 = vunpack.i.l.bf16 %v6851_v16 }
 0x39d   :  { %3205 = vrot.lane.b32.xlu0 %v8453_v1, %s7187_s2  ;;  %7035 = vrot.lane.b32.xlu1 %v7019_v58, %s7188_s20 }
 0x39e   :  { %v3368_v34 = vsel %vm1038_vm4, %v6852_v44, %v6853_v54 }
 0x39f   :  { %v6881_v23 = vpop.permute.xlu0 %6880  ;;  %v3158_v7 = vpop.permute.xlu1 %3157  ;;  %v3424_v3 = vmax.f32 %v3272_v19, %v3368_v34 }
 0x3a0   :  { %v6883_v61 = vunpack.i.h.bf16 %v6881_v23  ;;  %v6882_v24 = vunpack.i.l.bf16 %v6881_v23  ;;  %v3217_v58 = vsel %vm1022_vm3, %v6848_v37, %v3158_v7  ;;  %v6867_v23 = vunpack.i.l.bf16 %v8455_v8 }
 0x3a1   :  { %3357 = vrot.lane.b32.xlu0 %v8453_v1, %s7185_s0  ;;  %3509 = vrot.lane.b32.xlu1 %v8453_v1, %s7188_s20  ;;  %v3273_v15 = vmax.f32 %v3121_v6, %v3217_v58  ;;  %v3274_v57 = vmax.f32 %v3122_v10, %v3158_v7 }
 0x3a2   :  { %v3067_v30 = vsel %vm1006_vm2, %v6883_v61, %v9395_v31  ;;  %v3066_v29 = vsel %vm1006_vm2, %v6863_v38, %v6883_v61  ;;  %v3063_v37 = vsel %vm1006_vm2, %v6882_v24, %v6842_v59  ;;  %v6873_v59 = vunpack.i.h.bf16 %v8472_v5 }
 0x3a3   :  { %v6886_v32 = vpop.permute.xlu0 %6885  ;;  %v6856_v16 = vpop.permute.xlu1 %6855  ;;  %v3119_v7 = vmax.f32 %v8226_v33, %v3063_v37 }
 0x3a4   :  { %v6888_v48 = vunpack.i.h.bf16 %v6886_v32  ;;  %v6887_v9 = vunpack.i.l.bf16 %v6886_v32  ;;  %v6858_v63 = vunpack.i.h.bf16 %v6856_v16  ;;  %v6857_v50 = vunpack.i.l.bf16 %v6856_v16 }
 0x3a5   :  { %7040 = vrot.lane.b32.xlu0 %v7039_v27, %s7186_s1  ;;  %7045 = vrot.lane.b32.xlu1 %v7039_v27, %s7187_s2  ;;  %v3124_v32 = vmax.f32 %v8198_v22, %v3067_v30 }
 0x3a6   :  { %v3219_v16 = vsel %vm1022_vm3, %v6888_v48, %v6867_v23  ;;  %v3215_v31 = vsel %vm1022_vm3, %v6887_v9, %v6847_v52  ;;  %v3520_v56 = vsel %vm1054_vm5, %v6857_v50, %v6858_v63  ;;  %v3521_v52 = vsel %vm1054_vm5, %v6858_v63, %v8430_v55 }
 0x3a7   :  { %v6891_v21 = vpop.permute.xlu0 %6890  ;;  %v3310_v36 = vpop.permute.xlu1 %3309  ;;  %v3576_v24 = vmax.f32 %v3424_v3, %v3520_v56  ;;  %v3218_v6 = vsel %vm1022_vm3, %v6868_v62, %v6888_v48  ;;  %v3271_v33 = vmax.f32 %v3119_v7, %v3215_v31  ;;  %v3123_v63 = vmax.f32 %v8121_v28, %v3066_v29 }
 0x3a8   :  { %v6893_v12 = vunpack.i.h.bf16 %v6891_v21  ;;  %v6892_v19 = vunpack.i.l.bf16 %v6891_v21  ;;  %v3369_v61 = vsel %vm1038_vm4, %v6853_v54, %v3310_v36  ;;  %v3426_v38 = vmax.f32 %v3274_v57, %v3310_v36 }
 0x3a9   :  { %v3425_v22 = vmax.f32 %v3273_v15, %v3369_v61  ;;  %7055 = vrot.lane.b32.xlu0 %v7039_v27, %s7188_s20  ;;  %7050 = vrot.lane.b32.xlu1 %v7039_v27, %s7185_s0  ;;  %v9452_v54 = vunpack.i.l.bf16 %v8472_v5  ;;  %v3276_v27 = vmax.f32 %v3124_v32, %v3219_v16  ;;  %v3275_v28 = vmax.f32 %v3123_v63, %v3218_v6 }
 0x3aa   :  { %v3367_v9 = vsel %vm1038_vm4, %v6892_v19, %v6852_v44  ;;  %v3578_v34 = vmax.f32 %v3426_v38, %v8430_v55  ;;  %3748 = vmatprep.mubr.f32.mxu0 %v3576_v24  ;;  %v3370_v37 = vsel %vm1038_vm4, %v6873_v59, %v6893_v12  ;;  %v9453_v29 = vunpack.i.l.bf16 %v8444_v13 }
 0x3ab   :  { %v3371_v36 = vsel %vm1038_vm4, %v6893_v12, %v9452_v54  ;;  %v3577_v10 = vmax.f32 %v3425_v22, %v3521_v52  ;;  %v6896_v30 = vpop.permute.xlu0 %6895  ;;  %v6876_v58 = vpop.permute.xlu1 %6875  ;;  %v3423_v55 = vmax.f32 %v3271_v33, %v3367_v9  ;;  %v3427_v12 = vmax.f32 %v3275_v28, %v3370_v37 }
 0x3ac   :  { %v6898_v56 = vunpack.i.h.bf16 %v6896_v30  ;;  %v6897_v21 = vunpack.i.l.bf16 %v6896_v30  ;;  %v6878_v44 = vunpack.i.h.bf16 %v6876_v58  ;;  %v6877_v3 = vunpack.i.l.bf16 %v6876_v58  ;;  %5762 = vmatprep.mubr.msk.f32.mxu1 %vm3659_vm6, %v3578_v34 }
 0x3ad   :  { %7065 = vrot.lane.b32.xlu0 %v8497_v39, %s7187_s2  ;;  %7060 = vrot.lane.b32.xlu1 %v8497_v39, %s7186_s1  ;;  %v3428_v31 = vmax.f32 %v3276_v27, %v3371_v36  ;;  %v9454_v9 = vmov %v9452_v54 }
 0x3ae   :  { %v3519_v48 = vsel %vm1054_vm5, %v6897_v21, %v6857_v50  ;;  %3854 = vmatmul.mubr.f32.vlgmr.msra.gmra.mrb[18].mxu1 %v3577_v10  ;;  %v3523_v62 = vsel %vm1054_vm5, %v6898_v56, %v6877_v3  ;;  %v3522_v38 = vsel %vm1054_vm5, %v6878_v44, %v6898_v56 }
 0x3af   :  { %v3575_v15 = vmax.f32 %v3423_v55, %v3519_v48  ;;  %v3166_v57 = vpop.permute.xlu0 %3165  ;;  %v3014_v32 = vpop.permute.xlu1 %3013  ;;  %v3580_v16 = vmax.f32 %v3428_v31, %v3523_v62  ;;  %v3579_v24 = vmax.f32 %v3427_v12, %v3522_v38 }
 0x3b0   :  { %v3068_v19 = vsel %vm1006_vm2, %v9453_v29, %v3014_v32  ;;  %v3126_v61 = vmax.f32 %v8306_v47, %v3014_v32  ;;  %v3220_v59 = vsel %vm1022_vm3, %v6867_v23, %v3166_v57  ;;  %v8557_v47 = vadd.f32 %v8296_v40, %v8421_v42 }
 0x3b1   :  { %v3125_v50 = vmax.f32 %v8130_v11, %v3068_v19  ;;  %7075 = vrot.lane.b32.xlu0 %v8497_v39, %s7188_s20  ;;  %3749 = vmatmul.mubr.f32.vlgmr.msra.gmra.mrb[20].mxu0 %v3575_v15 }
 0x3b2   :  { %7070 = vrot.lane.b32.xlu1 %v8497_v39, %s7185_s0  ;;  %3753 = vmatprep.mubr.f32.mxu0 %v3580_v16  ;;  %v3278_v13 = vmax.f32 %v3126_v61, %v3166_v57 }
 0x3b3   :  { %v3470_v7 = vpop.permute.xlu0 %3469  ;;  %v3318_v11 = vpop.permute.xlu1 %3317  ;;  %v3277_v22 = vmax.f32 %v3125_v50, %v3220_v59 }
 0x3b4   :  { %v3372_v52 = vsel %vm1038_vm4, %v9454_v9, %v3318_v11  ;;  %v3430_v8 = vmax.f32 %v3278_v13, %v3318_v11  ;;  %v3524_v39 = vsel %vm1054_vm5, %v6877_v3, %v3470_v7 }
 0x3b5   :  { %v3429_v34 = vmax.f32 %v3277_v22, %v3372_v52  ;;  %3213 = vrot.lane.b32.xlu0 %v8557_v47, %s7187_s2  ;;  %3754 = vmatmul.mubr.f32.gmra.mrb[22].mxu0 %v3579_v24 }
 0x3b6   :  { %v3582_v23 = vmax.f32 %v3430_v8, %v3470_v7  ;;  %3061 = vrot.lane.b32.xlu1 %v8557_v47, %s7186_s1 }
 0x3b7   :  { %v8567_v40 = vpop.permute.xlu0 %6900  ;;  %v8569_v42 = vpop.permute.xlu1 %6905  ;;  %v3581_v54 = vmax.f32 %v3429_v34, %v3524_v39 }
 0x3b8   :  { %v6903_v5 = vunpack.i.h.bf16 %v8567_v40  ;;  %v6902_v36 = vunpack.i.l.bf16 %v8567_v40  ;;  %v6908_v6 = vunpack.i.h.bf16 %v8569_v42  ;;  %v6907_v33 = vunpack.i.l.bf16 %v8569_v42  ;;  %5763 = vmatprep.mubr.msk.f32.mxu1 %vm3659_vm6, %v3582_v23 }
 0x3b9   :  { %3517 = vrot.lane.b32.xlu0 %v8557_v47, %s7188_s20  ;;  %3859 = vmatmul.mubr.f32.gmra.mrb[20].mxu1 %v3581_v54 }
 0x3ba   :  { %v3070_v10 = vsel %vm1006_vm2, %v6902_v36, %v6903_v5  ;;  %v3222_v30 = vsel %vm1022_vm3, %v6907_v33, %v6908_v6  ;;  %3365 = vrot.lane.b32.xlu1 %v8557_v47, %s7185_s0 }
 0x3bb   :  { %v3128_v58 = vmax.f32 %v8316_v51, %v3070_v10  ;;  %v8585_v27 = vpop.permute.xlu0 %6910  ;;  %v3022_v56 = vpop.permute.xlu1 %3021 }
 0x3bc   :  { %v6913_v21 = vunpack.i.h.bf16 %v8585_v27  ;;  %v6912_v44 = vunpack.i.l.bf16 %v8585_v27  ;;  %v3071_v3 = vsel %vm1006_vm2, %v6903_v5, %v3022_v56  ;;  %v3130_v55 = vmax.f32 %v8327_v0, %v3022_v56 }
 0x3bd   :  { %v3280_v63 = vmax.f32 %v3128_v58, %v3222_v30  ;;  %v3129_v48 = vmax.f32 %v8313_v53, %v3071_v3 }
 0x3be   :  { %v3374_v31 = vsel %vm1038_vm4, %v6912_v44, %v6913_v21 }
 0x3bf   :  { %v3174_v62 = vpop.permute.xlu0 %3173  ;;  %v8595_v51 = vpop.permute.xlu1 %6915  ;;  %v3432_v32 = vmax.f32 %v3280_v63, %v3374_v31 }
 0x3c0   :  { %v3223_v37 = vsel %vm1022_vm3, %v6908_v6, %v3174_v62  ;;  %v6918_v15 = vunpack.i.h.bf16 %v8595_v51  ;;  %v6917_v57 = vunpack.i.l.bf16 %v8595_v51  ;;  %v3282_v16 = vmax.f32 %v3130_v55, %v3174_v62 }
 0x3c1   :  { %v3281_v0 = vmax.f32 %v3129_v48, %v3223_v37 }
 0x3c2   :  { %v3526_v28 = vsel %vm1054_vm5, %v6917_v57, %v6918_v15 }
 0x3c3   :  { %v3478_v29 = vpop.permute.xlu0 %3477  ;;  %v3326_v19 = vpop.permute.xlu1 %3325  ;;  %v3584_v61 = vmax.f32 %v3432_v32, %v3526_v28 }
 0x3c4   :  { %v3375_v38 = vsel %vm1038_vm4, %v6913_v21, %v3326_v19  ;;  %v3434_v53 = vmax.f32 %v3282_v16, %v3326_v19  ;;  %v3527_v12 = vsel %vm1054_vm5, %v6918_v15, %v3478_v29 }
 0x3c5   :  { %v3433_v50 = vmax.f32 %v3281_v0, %v3375_v38  ;;  %3758 = vmatprep.mubr.f32.mxu0 %v3584_v61 }
 0x3c6   :  { %v3586_v59 = vmax.f32 %v3434_v53, %v3478_v29 }
 0x3c7   :  { %v6921_v13 = vpop.permute.xlu0 %6920  ;;  %v6926_v7 = vpop.permute.xlu1 %6925  ;;  %v3585_v11 = vmax.f32 %v3433_v50, %v3527_v12 }
 0x3c8   :  { %5764 = vmatprep.mubr.msk.f32.mxu1 %vm3659_vm6, %v3586_v59  ;;  %v6928_v9 = vunpack.i.h.bf16 %v6926_v7  ;;  %v6923_v54 = vunpack.i.h.bf16 %v6921_v13  ;;  %v6922_v5 = vunpack.i.l.bf16 %v6921_v13  ;;  %v6927_v6 = vunpack.i.l.bf16 %v6926_v7 }
 0x3c9   :  { %3864 = vmatmul.mubr.f32.gmra.mrb[22].mxu1 %v3585_v11 }
 0x3cb   :  { %v6931_v22 = vpop.permute.xlu0 %6930  ;;  %v6936_v24 = vpop.permute.xlu1 %6935 }
 0x3cc   :  { %v6933_v10 = vunpack.i.h.bf16 %v6931_v22  ;;  %v6932_v30 = vunpack.i.l.bf16 %v6931_v22  ;;  %v6937_v19 = vunpack.i.l.bf16 %v6936_v24  ;;  %v6938_v22 = vunpack.i.h.bf16 %v6936_v24 }
 0x3cf   :  { %v6946_v52 = vpop.permute.xlu0 %6945  ;;  %v6941_v8 = vpop.permute.xlu1 %6940 }
 0x3d0   :  { %v6948_v34 = vunpack.i.h.bf16 %v6946_v52  ;;  %v6947_v39 = vunpack.i.l.bf16 %v6946_v52  ;;  %v6943_v23 = vunpack.i.h.bf16 %v6941_v8  ;;  %v6942_v40 = vunpack.i.l.bf16 %v6941_v8 }
 0x3d2   :  { %v3224_v58 = vsel %vm1022_vm3, %v6928_v9, %v6948_v34  ;;  %v3069_v56 = vsel %vm1006_vm2, %v6942_v40, %v6902_v36  ;;  %v3225_v21 = vsel %vm1022_vm3, %v6948_v34, %v6927_v6  ;;  %v3072_v3 = vsel %vm1006_vm2, %v6923_v54, %v6943_v23 }
 0x3d3   :  { %v3073_v63 = vsel %vm1006_vm2, %v6943_v23, %v6922_v5  ;;  %v3127_v55 = vmax.f32 %v8353_v18, %v3069_v56  ;;  %v6956_v31 = vpop.permute.xlu0 %6955  ;;  %v6951_v48 = vpop.permute.xlu1 %6950  ;;  %v3221_v62 = vsel %vm1022_vm3, %v6947_v39, %v6907_v33  ;;  %v3131_v51 = vmax.f32 %v8336_v2, %v3072_v3 }
 0x3d4   :  { %v3132_v37 = vmax.f32 %v8350_v25, %v3073_v63  ;;  %v6958_v15 = vunpack.i.h.bf16 %v6956_v31  ;;  %v6957_v36 = vunpack.i.l.bf16 %v6956_v31  ;;  %v6953_v32 = vunpack.i.h.bf16 %v6951_v48 }
 0x3d5   :  { %v6952_v16 = vunpack.i.l.bf16 %v6951_v48  ;;  %v3279_v28 = vmax.f32 %v3127_v55, %v3221_v62  ;;  %v3283_v29 = vmax.f32 %v3131_v51, %v3224_v58 }
 0x3d6   :  { %v3284_v0 = vmax.f32 %v3132_v37, %v3225_v21  ;;  %v3377_v33 = vsel %vm1038_vm4, %v6953_v32, %v6932_v30  ;;  %v3376_v2 = vsel %vm1038_vm4, %v6933_v10, %v6953_v32  ;;  %v3525_v12 = vsel %vm1054_vm5, %v6957_v36, %v6917_v57 }
 0x3d7   :  { %v3182_v61 = vpop.permute.xlu0 %3181  ;;  %v3030_v18 = vpop.permute.xlu1 %3029  ;;  %v3373_v42 = vsel %vm1038_vm4, %v6952_v16, %v6912_v44  ;;  %v3529_v13 = vsel %vm1054_vm5, %v6958_v15, %v6937_v19  ;;  %v3435_v11 = vmax.f32 %v3283_v29, %v3376_v2  ;;  %v3528_v57 = vsel %vm1054_vm5, %v6938_v22, %v6958_v15 }
 0x3d8   :  { %v3074_v25 = vsel %vm1006_vm2, %v6922_v5, %v3030_v18  ;;  %v3134_v38 = vmax.f32 %v8364_v60, %v3030_v18  ;;  %v3431_v53 = vmax.f32 %v3279_v28, %v3373_v42  ;;  %v3436_v59 = vmax.f32 %v3284_v0, %v3377_v33 }
 0x3d9   :  { %v3133_v50 = vmax.f32 %v8339_v4, %v3074_v25  ;;  %v3226_v27 = vsel %vm1022_vm3, %v6927_v6, %v3182_v61  ;;  %v3587_v54 = vmax.f32 %v3435_v11, %v3528_v57 }
 0x3da   :  { %v3286_v7 = vmax.f32 %v3134_v38, %v3182_v61  ;;  %v3583_v44 = vmax.f32 %v3431_v53, %v3525_v12  ;;  %v3588_v34 = vmax.f32 %v3436_v59, %v3529_v13 }
 0x3db   :  { %v3486_v9 = vpop.permute.xlu0 %3485  ;;  %v3334_v52 = vpop.permute.xlu1 %3333  ;;  %v3285_v8 = vmax.f32 %v3133_v50, %v3226_v27 }
 0x3dc   :  { %v3378_v60 = vsel %vm1038_vm4, %v6932_v30, %v3334_v52  ;;  %v3438_v39 = vmax.f32 %v3286_v7, %v3334_v52  ;;  %3759 = vmatmul.mubr.f32.gmra.mrb[24].mxu0 %v3583_v44  ;;  %v3530_v23 = vsel %vm1054_vm5, %v6937_v19, %v3486_v9 }
 0x3dd   :  { %v3437_v4 = vmax.f32 %v3285_v8, %v3378_v60  ;;  %3763 = vmatprep.mubr.f32.mxu0 %v3588_v34 }
 0x3de   :  { %v3590_v40 = vmax.f32 %v3438_v39, %v3486_v9 }
 0x3df   :  { %v6961_v5 = vpop.permute.xlu0 %6960  ;;  %v8629_v6 = vpop.permute.xlu1 %6965  ;;  %v3589_v24 = vmax.f32 %v3437_v4, %v3530_v23 }
 0x3e0   :  { %v6963_v10 = vunpack.i.h.bf16 %v6961_v5  ;;  %v6962_v58 = vunpack.i.l.bf16 %v6961_v5  ;;  %v6968_v56 = vunpack.i.h.bf16 %v8629_v6  ;;  %v6967_v30 = vunpack.i.l.bf16 %v8629_v6  ;;  %3764 = vmatmul.mubr.f32.gmra.mrb[26].mxu0 %v3587_v54  ;;  %5765 = vmatprep.mubr.msk.f32.mxu1 %vm3659_vm6, %v3590_v40 }
 0x3e1   :  { %3869 = vmatmul.mubr.f32.gmra.mrb[24].mxu1 %v3589_v24 }
 0x3e2   :  { %v3076_v21 = vsel %vm1006_vm2, %v6962_v58, %v6963_v10  ;;  %v3228_v3 = vsel %vm1022_vm3, %v6967_v30, %v6968_v56 }
 0x3e3   :  { %v3136_v63 = vmax.f32 %v8374_v46, %v3076_v21  ;;  %v8637_v55 = vpop.permute.xlu0 %6970  ;;  %v3038_v31 = vpop.permute.xlu1 %3037 }
 0x3e4   :  { %v6973_v48 = vunpack.i.h.bf16 %v8637_v55  ;;  %v6972_v62 = vunpack.i.l.bf16 %v8637_v55  ;;  %v3077_v51 = vsel %vm1006_vm2, %v6963_v10, %v3038_v31  ;;  %v3138_v15 = vmax.f32 %v8385_v35, %v3038_v31 }
 0x3e5   :  { %v3288_v37 = vmax.f32 %v3136_v63, %v3228_v3  ;;  %v3137_v32 = vmax.f32 %v8371_v41, %v3077_v51 }
 0x3e6   :  { %v3380_v36 = vsel %vm1038_vm4, %v6972_v62, %v6973_v48 }
 0x3e7   :  { %v3190_v16 = vpop.permute.xlu0 %3189  ;;  %v8647_v46 = vpop.permute.xlu1 %6975  ;;  %v3440_v19 = vmax.f32 %v3288_v37, %v3380_v36 }
 0x3e8   :  { %v3229_v28 = vsel %vm1022_vm3, %v6968_v56, %v3190_v16  ;;  %v6978_v0 = vunpack.i.h.bf16 %v8647_v46  ;;  %v6977_v29 = vunpack.i.l.bf16 %v8647_v46  ;;  %v3290_v61 = vmax.f32 %v3138_v15, %v3190_v16 }
 0x3e9   :  { %v3289_v35 = vmax.f32 %v3137_v32, %v3229_v28 }
 0x3ea   :  { %v3532_v18 = vsel %vm1054_vm5, %v6977_v29, %v6978_v0 }
 0x3eb   :  { %v3494_v42 = vpop.permute.xlu0 %3493  ;;  %v3342_v33 = vpop.permute.xlu1 %3341  ;;  %v3592_v2 = vmax.f32 %v3440_v19, %v3532_v18 }
 0x3ec   :  { %v3381_v25 = vsel %vm1038_vm4, %v6973_v48, %v3342_v33  ;;  %v3442_v41 = vmax.f32 %v3290_v61, %v3342_v33  ;;  %v3533_v53 = vsel %vm1054_vm5, %v6978_v0, %v3494_v42 }
 0x3ed   :  { %v3441_v38 = vmax.f32 %v3289_v35, %v3381_v25  ;;  %3768 = vmatprep.mubr.f32.mxu0 %v3592_v2 }
 0x3ee   :  { %v3594_v50 = vmax.f32 %v3442_v41, %v3494_v42 }
 0x3ef   :  { %v6981_v12 = vpop.permute.xlu0 %6980  ;;  %v6986_v59 = vpop.permute.xlu1 %6985  ;;  %v3593_v13 = vmax.f32 %v3441_v38, %v3533_v53 }
 0x3f0   :  { %5766 = vmatprep.mubr.msk.f32.mxu1 %vm3659_vm6, %v3594_v50  ;;  %v6988_v44 = vunpack.i.h.bf16 %v6986_v59  ;;  %v6983_v60 = vunpack.i.h.bf16 %v6981_v12  ;;  %v6982_v39 = vunpack.i.l.bf16 %v6981_v12  ;;  %v6987_v4 = vunpack.i.l.bf16 %v6986_v59 }
 0x3f1   :  { %3874 = vmatmul.mubr.f32.gmra.mrb[26].mxu1 %v3593_v13 }
 0x3f3   :  { %v6991_v27 = vpop.permute.xlu0 %6990  ;;  %v6996_v7 = vpop.permute.xlu1 %6995 }
 0x3f4   :  { %v6993_v57 = vunpack.i.h.bf16 %v6991_v27  ;;  %v6992_v23 = vunpack.i.l.bf16 %v6991_v27  ;;  %v6997_v16 = vunpack.i.l.bf16 %v6996_v7  ;;  %v6998_v25 = vunpack.i.h.bf16 %v6996_v7 }
 0x3f7   :  { %v7006_v11 = vpop.permute.xlu0 %7005  ;;  %v7001_v22 = vpop.permute.xlu1 %7000 }
 0x3f8   :  { %v7008_v9 = vunpack.i.h.bf16 %v7006_v11  ;;  %v7007_v52 = vunpack.i.l.bf16 %v7006_v11  ;;  %v7003_v8 = vunpack.i.h.bf16 %v7001_v22  ;;  %v7002_v34 = vunpack.i.l.bf16 %v7001_v22 }
 0x3fa   :  { %v3230_v40 = vsel %vm1022_vm3, %v6988_v44, %v7008_v9  ;;  %v3075_v54 = vsel %vm1006_vm2, %v7002_v34, %v6962_v58  ;;  %v3231_v5 = vsel %vm1022_vm3, %v7008_v9, %v6987_v4  ;;  %v3078_v6 = vsel %vm1006_vm2, %v6983_v60, %v7003_v8 }
 0x3fb   :  { %v3079_v24 = vsel %vm1006_vm2, %v7003_v8, %v6982_v39  ;;  %v3135_v10 = vmax.f32 %v8411_v14, %v3075_v54  ;;  %v7016_v56 = vpop.permute.xlu0 %7015  ;;  %v7011_v21 = vpop.permute.xlu1 %7010  ;;  %v3227_v3 = vsel %vm1022_vm3, %v7007_v52, %v6967_v30  ;;  %v3139_v63 = vmax.f32 %v8394_v49, %v3078_v6 }
 0x3fc   :  { %v3140_v31 = vmax.f32 %v8408_v17, %v3079_v24  ;;  %v7018_v48 = vunpack.i.h.bf16 %v7016_v56  ;;  %v7017_v51 = vunpack.i.l.bf16 %v7016_v56  ;;  %v7013_v37 = vunpack.i.h.bf16 %v7011_v21 }
 0x3fd   :  { %v7012_v58 = vunpack.i.l.bf16 %v7011_v21  ;;  %v3287_v15 = vmax.f32 %v3135_v10, %v3227_v3  ;;  %v3291_v32 = vmax.f32 %v3139_v63, %v3230_v40 }
 0x3fe   :  { %v3292_v36 = vmax.f32 %v3140_v31, %v3231_v5  ;;  %v3383_v30 = vsel %vm1038_vm4, %v7013_v37, %v6992_v23  ;;  %v3382_v49 = vsel %vm1038_vm4, %v6993_v57, %v7013_v37  ;;  %v3531_v18 = vsel %vm1054_vm5, %v7017_v51, %v6977_v29 }
 0x3ff   :  { %v3198_v46 = vpop.permute.xlu0 %3197  ;;  %v3046_v28 = vpop.permute.xlu1 %3045  ;;  %v3379_v14 = vsel %vm1038_vm4, %v7012_v58, %v6972_v62  ;;  %v3535_v42 = vsel %vm1054_vm5, %v7018_v48, %v6997_v16  ;;  %v3443_v2 = vmax.f32 %v3291_v32, %v3382_v49  ;;  %v3534_v29 = vsel %vm1054_vm5, %v6998_v25, %v7018_v48 }
 0x400   :  { %v3080_v17 = vsel %vm1006_vm2, %v6982_v39, %v3046_v28  ;;  %v3142_v0 = vmax.f32 %v8424_v20, %v3046_v28  ;;  %v3439_v19 = vmax.f32 %v3287_v15, %v3379_v14  ;;  %v3444_v35 = vmax.f32 %v3292_v36, %v3383_v30 }
 0x401   :  { %v3141_v61 = vmax.f32 %v8397_v43, %v3080_v17  ;;  %v3232_v55 = vsel %vm1022_vm3, %v6987_v4, %v3198_v46  ;;  %v3595_v27 = vmax.f32 %v3443_v2, %v3534_v29 }
 0x402   :  { %v3294_v33 = vmax.f32 %v3142_v0, %v3198_v46  ;;  %v3591_v62 = vmax.f32 %v3439_v19, %v3531_v18  ;;  %v3596_v50 = vmax.f32 %v3444_v35, %v3535_v42 }
 0x403   :  { %v3502_v41 = vpop.permute.xlu0 %3501  ;;  %v3350_v38 = vpop.permute.xlu1 %3349  ;;  %v3293_v53 = vmax.f32 %v3141_v61, %v3232_v55 }
 0x404   :  { %v3384_v20 = vsel %vm1038_vm4, %v6992_v23, %v3350_v38  ;;  %v3446_v12 = vmax.f32 %v3294_v33, %v3350_v38  ;;  %3769 = vmatmul.mubr.f32.gmra.mrb[28].mxu0 %v3591_v62  ;;  %v3536_v59 = vsel %vm1054_vm5, %v6997_v16, %v3502_v41 }
 0x405   :  { %v3445_v43 = vmax.f32 %v3293_v53, %v3384_v20  ;;  %3773 = vmatprep.mubr.f32.mxu0 %v3596_v50 }
 0x406   :  { %v3598_v13 = vmax.f32 %v3446_v12, %v3502_v41 }
 0x407   :  { %v7021_v44 = vpop.permute.xlu0 %7020  ;;  %v8679_v11 = vpop.permute.xlu1 %7025  ;;  %v3597_v7 = vmax.f32 %v3445_v43, %v3536_v59  ;;  %v9455_v43 = vld [vmem:[#allocation5_spill] sm:$0xff] }
 0x408   :  { %v7023_v22 = vunpack.i.h.bf16 %v7021_v44  ;;  %v7022_v9 = vunpack.i.l.bf16 %v7021_v44  ;;  %v7028_v52 = vunpack.i.h.bf16 %v8679_v11  ;;  %v7027_v8 = vunpack.i.l.bf16 %v8679_v11  ;;  %3774 = vmatmul.mubr.f32.gmra.mrb[30].mxu0 %v3595_v27  ;;  %5767 = vmatprep.mubr.msk.f32.mxu1 %vm3659_vm6, %v3598_v13  ;;  %v9456_v27 = vld [vmem:[#allocation10_spill] sm:$0xff]  ;;  %v9457_v11 = vld [vmem:[#allocation11_spill] sm:$0xff] }
 0x409   :  { %3879 = vmatmul.mubr.f32.gmra.mrb[28].mxu1 %v3597_v7 }
 0x40a   :  { %v3082_v34 = vsel %vm1006_vm2, %v7022_v9, %v7023_v22  ;;  %v3234_v60 = vsel %vm1022_vm3, %v7027_v8, %v7028_v52 }
 0x40b   :  { %v3144_v39 = vmax.f32 %v8436_v26, %v3082_v34  ;;  %v8687_v4 = vpop.permute.xlu0 %7030  ;;  %v3054_v57 = vpop.permute.xlu1 %3053 }
 0x40c   :  { %v7033_v23 = vunpack.i.h.bf16 %v8687_v4  ;;  %v7032_v40 = vunpack.i.l.bf16 %v8687_v4  ;;  %v3083_v54 = vsel %vm1006_vm2, %v7023_v22, %v3054_v57  ;;  %v3146_v6 = vmax.f32 %v8453_v1, %v3054_v57 }
 0x40d   :  { %v3296_v5 = vmax.f32 %v3144_v39, %v3234_v60  ;;  %v3145_v10 = vmax.f32 %v8433_v45, %v3083_v54 }
 0x40e   :  { %v3386_v24 = vsel %vm1038_vm4, %v7032_v40, %v7033_v23 }
 0x40f   :  { %v3206_v56 = vpop.permute.xlu0 %3205  ;;  %v8697_v26 = vpop.permute.xlu1 %7035  ;;  %v3448_v31 = vmax.f32 %v3296_v5, %v3386_v24 }
 0x410   :  { %v3235_v21 = vsel %vm1022_vm3, %v7028_v52, %v3206_v56  ;;  %v7038_v3 = vunpack.i.h.bf16 %v8697_v26  ;;  %v7037_v63 = vunpack.i.l.bf16 %v8697_v26  ;;  %v3298_v48 = vmax.f32 %v3146_v6, %v3206_v56 }
 0x411   :  { %v3297_v1 = vmax.f32 %v3145_v10, %v3235_v21 }
 0x412   :  { %v3538_v51 = vsel %vm1054_vm5, %v7037_v63, %v7038_v3 }
 0x413   :  { %v3358_v37 = vpop.permute.xlu0 %3357  ;;  %v3510_v58 = vpop.permute.xlu1 %3509  ;;  %v3600_v15 = vmax.f32 %v3448_v31, %v3538_v51  ;;  %v9458_v51 = vld [vmem:[#allocation9_spill] sm:$0xff] }
 0x414   :  { %v3387_v36 = vsel %vm1038_vm4, %v7033_v23, %v3358_v37  ;;  %v3450_v45 = vmax.f32 %v3298_v48, %v3358_v37  ;;  %v3539_v32 = vsel %vm1054_vm5, %v7038_v3, %v3510_v58 }
 0x415   :  { %v3449_v16 = vmax.f32 %v3297_v1, %v3387_v36  ;;  %3778 = vmatprep.mubr.f32.mxu0 %v3600_v15 }
 0x416   :  { %v3602_v46 = vmax.f32 %v3450_v45, %v3510_v58 }
 0x417   :  { %v7041_v28 = vpop.permute.xlu0 %7040  ;;  %v7046_v14 = vpop.permute.xlu1 %7045  ;;  %v3601_v30 = vmax.f32 %v3449_v16, %v3539_v32 }
 0x418   :  { %5768 = vmatprep.mubr.msk.f32.mxu1 %vm3659_vm6, %v3602_v46  ;;  %v7048_v0 = vunpack.i.h.bf16 %v7046_v14  ;;  %v7043_v33 = vunpack.i.h.bf16 %v7041_v28  ;;  %v7042_v62 = vunpack.i.l.bf16 %v7041_v28  ;;  %v7047_v2 = vunpack.i.l.bf16 %v7046_v14 }
 0x419   :  { %3884 = vmatmul.mubr.f32.gmra.mrb[30].mxu1 %v3601_v30 }
 0x41b   :  { %v8706_v49 = vpop.permute.xlu0 %7055  ;;  %v7051_v17 = vpop.permute.xlu1 %7050 }
 0x41c   :  { %v7053_v25 = vunpack.i.h.bf16 %v7051_v17  ;;  %v7052_v41 = vunpack.i.l.bf16 %v7051_v17  ;;  %v7057_v54 = vunpack.i.l.bf16 %v8706_v49  ;;  %v7058_v58 = vunpack.i.h.bf16 %v8706_v49 }
 0x41f   :  { %v7066_v19 = vpop.permute.xlu0 %7065  ;;  %v7061_v61 = vpop.permute.xlu1 %7060 }
 0x420   :  { %v7068_v18 = vunpack.i.h.bf16 %v7066_v19  ;;  %v7067_v35 = vunpack.i.l.bf16 %v7066_v19  ;;  %v7063_v42 = vunpack.i.h.bf16 %v7061_v61  ;;  %v7062_v55 = vunpack.i.l.bf16 %v7061_v61 }
 0x422   :  { %v3236_v38 = vsel %vm1022_vm3, %v7048_v0, %v7068_v18  ;;  %v3081_v53 = vsel %vm1006_vm2, %v7062_v55, %v7022_v9  ;;  %v3237_v50 = vsel %vm1022_vm3, %v7068_v18, %v7047_v2  ;;  %v3084_v20 = vsel %vm1006_vm2, %v7043_v33, %v7063_v42 }
 0x423   :  { %v3085_v12 = vsel %vm1006_vm2, %v7063_v42, %v7042_v62  ;;  %v3143_v29 = vmax.f32 %v9455_v43, %v3081_v53  ;;  %v7076_v59 = vpop.permute.xlu0 %7075  ;;  %v3233_v13 = vsel %vm1022_vm3, %v7067_v35, %v7027_v8  ;;  %v3147_v44 = vmax.f32 %v9456_v27, %v3084_v20 }
 0x424   :  { %v3148_v7 = vmax.f32 %v9457_v11, %v3085_v12  ;;  %v7078_v22 = vunpack.i.h.bf16 %v7076_v59  ;;  %v7071_v52 = vpop.permute.xlu1 %7070  ;;  %v7077_v34 = vunpack.i.l.bf16 %v7076_v59 }
 0x425   :  { %v7073_v60 = vunpack.i.h.bf16 %v7071_v52  ;;  %v7072_v9 = vunpack.i.l.bf16 %v7071_v52  ;;  %v3295_v39 = vmax.f32 %v3143_v29, %v3233_v13  ;;  %v3299_v23 = vmax.f32 %v3147_v44, %v3236_v38 }
 0x426   :  { %v3300_v57 = vmax.f32 %v3148_v7, %v3237_v50  ;;  %v3537_v31 = vsel %vm1054_vm5, %v7077_v34, %v7037_v63  ;;  %v3541_v48 = vsel %vm1054_vm5, %v7078_v22, %v7057_v54  ;;  %v3540_v63 = vsel %vm1054_vm5, %v7058_v58, %v7078_v22 }
 0x427   :  { %v3385_v5 = vsel %vm1038_vm4, %v7072_v9, %v7032_v40  ;;  %v3388_v8 = vsel %vm1038_vm4, %v7053_v25, %v7073_v60  ;;  %v3389_v6 = vsel %vm1038_vm4, %v7073_v60, %v7052_v41  ;;  %v3214_v24 = vpop.permute.xlu0 %3213 }
 0x428   :  { %v3062_v10 = vpop.permute.xlu1 %3061  ;;  %v3447_v56 = vmax.f32 %v3295_v39, %v3385_v5  ;;  %v3452_v26 = vmax.f32 %v3300_v57, %v3389_v6  ;;  %v3451_v37 = vmax.f32 %v3299_v23, %v3388_v8  ;;  %v3238_v15 = vsel %vm1022_vm3, %v7047_v2, %v3214_v24 }
 0x429   :  { %v3086_v21 = vsel %vm1006_vm2, %v7042_v62, %v3062_v10  ;;  %v3150_v3 = vmax.f32 %v8557_v47, %v3062_v10 }
 0x42a   :  { %v3149_v4 = vmax.f32 %v9458_v51, %v3086_v21  ;;  %v3599_v1 = vmax.f32 %v3447_v56, %v3537_v31  ;;  %v3604_v40 = vmax.f32 %v3452_v26, %v3541_v48  ;;  %v3603_v14 = vmax.f32 %v3451_v37, %v3540_v63 }
 0x42b   :  { %v3302_v36 = vmax.f32 %v3150_v3, %v3214_v24  ;;  %v3518_v45 = vpop.permute.xlu0 %3517 }
 0x42c   :  { %v3366_v32 = vpop.permute.xlu1 %3365  ;;  %v3301_v16 = vmax.f32 %v3149_v4, %v3238_v15  ;;  %3779 = vmatmul.mubr.f32.gmra.mrb[32].mxu0 %v3599_v1  ;;  %v3542_v30 = vsel %vm1054_vm5, %v7057_v54, %v3518_v45 }
 0x42d   :  { %v3390_v47 = vsel %vm1038_vm4, %v7052_v41, %v3366_v32  ;;  %v3454_v46 = vmax.f32 %v3302_v36, %v3366_v32  ;;  %3783 = vmatprep.mubr.f32.mxu0 %v3604_v40 }
 0x42e   :  { %v3453_v28 = vmax.f32 %v3301_v16, %v3390_v47 }
 0x42f   :  { %v3606_v17 = vmax.f32 %v3454_v46, %v3518_v45 }
 0x430   :  { %3784 = vmatmul.mubr.f32.gmra.mrb[34].mxu0 %v3603_v14  ;;  %v3605_v49 = vmax.f32 %v3453_v28, %v3542_v30 }
 0x431   :  { %5769 = vmatprep.mubr.msk.f32.mxu1 %vm3659_vm6, %v3606_v17 }
 0x432   :  { %3889 = vmatmul.mubr.f32.gmra.mrb[32].mxu1 %v3605_v49 }
 0x481   :  { %v3855_v0 = vpop.f32.mrb[18].mxu1 }
 0x482   :  { %v3857_v19 = vpop.f32.mrb[19].mxu1 }
 0x484   :  { %v5884_v61 = vpop.f32.mrb[20].mxu0 }
 0x485   :  { %v5885_v18 = vpop.f32.mrb[21].mxu0 }
 0x486   :  { %v5886_v35 = vadd.f32 %v5885_v18, %v5884_v61 }
 0x488   :  { %v3856_v42 = vadd.f32 %v5886_v35, %v3855_v0  ;;  %v5887_v55 = vpop.f32.mrb[22].mxu0  ;;  %v4265_v35 = vld [vmem:[%s9352_s7] sm:$0xff] }
 0x489   :  { %v5888_v33 = vpop.f32.mrb[23].mxu0 }
 0x48a   :  { %v5889_v62 = vadd.f32 %v5888_v33, %v5887_v55  ;;  %v3894_v38 = vmax.f32 %v3856_v42, 0.0  ;;  %v4321_v42 = vld [vmem:[%s9353_s8] sm:$0xff]  ;;  %v4267_v55 = vld [vmem:[%s9352_s7 + $0x10] sm:$0xff]  ;;  %v4007_v33 = vld [vmem:[%s9351_s6 + $0x8] sm:$0xff] }
 0x48b   :  { %4119 = vmatprep.mubr.f32.mxu0 %v4007_v33 }
 0x48c   :  { %v3860_v2 = vpop.f32.mrb[20].mxu1 }
 0x48d   :  { %v3861_v25 = vadd.f32 %v5889_v62, %v3860_v2  ;;  %v3862_v41 = vpop.f32.mrb[21].mxu1  ;;  %v4323_v62 = vld [vmem:[%s9353_s8 + $0x10] sm:$0xff] }
 0x48e   :  { %v4008_v2 = vld [vmem:[%s9351_s6 + $0x10] sm:$0xff]  ;;  %v4266_v41 = vld [vmem:[%s9352_s7 + $0x8] sm:$0xff] }
 0x48f   :  { %v3895_v53 = vmax.f32 %v3861_v25, 0.0  ;;  %6082 = vmatprep.mubr.msk.f32.mxu1 %vm4030_vm7, %v4008_v2  ;;  %v4269_v25 = vld [vmem:[%s9352_s7 + $0x20] sm:$0xff] }
 0x491   :  { %v8734_v50 = vpack.i.bf16 %v3895_v53, %v3894_v38  ;;  %v6434_v20 = vpack.c.bf16 %v3895_v53, %v3894_v38  ;;  %v4325_v38 = vld [vmem:[%s9353_s8 + $0x20] sm:$0xff]  ;;  %v4322_v53 = vld [vmem:[%s9353_s8 + $0x8] sm:$0xff] }
 0x493   :  { %7080 = vrot.lane.b32.xlu1 %v8734_v50, %s7187_s2 }
 0x49c   :  { %v3865_v12 = vpop.f32.mrb[22].mxu1 }
 0x49d   :  { %v3867_v43 = vpop.f32.mrb[23].mxu1 }
 0x4af   :  { %v5890_v29 = vpop.f32.mrb[24].mxu0 }
 0x4b0   :  { %v5891_v59 = vpop.f32.mrb[25].mxu0 }
 0x4b1   :  { %v5892_v13 = vadd.f32 %v5891_v59, %v5890_v29 }
 0x4b3   :  { %v3866_v27 = vadd.f32 %v5892_v13, %v3865_v12  ;;  %v5893_v44 = vpop.f32.mrb[26].mxu0  ;;  %v4327_v12 = vld [vmem:[%s9353_s8 + $0x30] sm:$0xff] }
 0x4b4   :  { %v5894_v11 = vpop.f32.mrb[27].mxu0  ;;  %v3870_v7 = vpop.f32.mrb[24].mxu1 }
 0x4b5   :  { %v5895_v22 = vadd.f32 %v5894_v11, %v5893_v44  ;;  %v3872_v52 = vpop.f32.mrb[25].mxu1  ;;  %v3896_v60 = vmax.f32 %v3866_v27, 0.0  ;;  %v4324_v27 = vld [vmem:[%s9353_s8 + $0x18] sm:$0xff]  ;;  %v4270_v44 = vld [vmem:[%s9352_s7 + $0x28] sm:$0xff] }
 0x4b6   :  { %v4326_v11 = vld [vmem:[%s9353_s8 + $0x28] sm:$0xff] }
 0x4b7   :  { %v3871_v34 = vadd.f32 %v5895_v22, %v3870_v7  ;;  %v4272_v7 = vld [vmem:[%s9352_s7 + $0x38] sm:$0xff] }
 0x4b8   :  { %v4328_v22 = vld [vmem:[%s9353_s8 + $0x38] sm:$0xff]  ;;  %s7193_s8 = smov 121  }
 0x4b9   :  { %v3897_v9 = vmax.f32 %v3871_v34, 0.0 }
 0x4bb   :  { %v7084_v39 = vpack.i.bf16 %v3897_v9, %v3896_v60  ;;  %v8738_v57 = vpack.c.bf16 %v3897_v9, %v3896_v60 }
 0x4bd   :  { %7085 = vrot.lane.b32.xlu0 %v7084_v39, %s7187_s2 }
 0x4c4   :  { %v3875_v23 = vpop.f32.mrb[26].mxu1 }
 0x4c5   :  { %v3877_v54 = vpop.f32.mrb[27].mxu1 }
 0x4d7   :  { %v5896_v5 = vpop.f32.mrb[28].mxu0 }
 0x4d8   :  { %v5897_v8 = vpop.f32.mrb[29].mxu0 }
 0x4d9   :  { %v5898_v6 = vadd.f32 %v5897_v8, %v5896_v5 }
 0x4db   :  { %v3876_v24 = vadd.f32 %v5898_v6, %v3875_v23  ;;  %v5899_v10 = vpop.f32.mrb[30].mxu0 }
 0x4dc   :  { %v5900_v56 = vpop.f32.mrb[31].mxu0  ;;  %v3880_v26 = vpop.f32.mrb[28].mxu1 }
 0x4dd   :  { %v5901_v21 = vadd.f32 %v5900_v56, %v5899_v10  ;;  %v3882_v3 = vpop.f32.mrb[29].mxu1  ;;  %v3898_v48 = vmax.f32 %v3876_v24, 0.0 }
 0x4df   :  { %v3881_v31 = vadd.f32 %v5901_v21, %v3880_v26 }
 0x4e1   :  { %v3899_v51 = vmax.f32 %v3881_v31, 0.0 }
 0x4e3   :  { %v7089_v4 = vpack.i.bf16 %v3899_v51, %v3898_v48  ;;  %v8741_v1 = vpack.c.bf16 %v3899_v51, %v3898_v48 }
 0x4e5   :  { %7090 = vrot.lane.b32.xlu1 %v7089_v4, %s7187_s2 }
 0x4e9   :  { %7095 = vrot.lane.b32.xlu1 %v8734_v50, %s7185_s0 }
 0x4ec   :  { %v3885_v40 = vpop.f32.mrb[30].mxu1 }
 0x4ed   :  { %v3887_v37 = vpop.f32.mrb[31].mxu1  ;;  %7110 = vrot.lane.b32.xlu1 %v7084_v39, %s7185_s0 }
 0x4f1   :  { %7120 = vrot.lane.b32.xlu1 %v8734_v50, %s7188_s20 }
 0x4f5   :  { %7130 = vrot.lane.b32.xlu1 %v7089_v4, %s7186_s1 }
 0x4ff   :  { %v5902_v58 = vpop.f32.mrb[32].mxu0 }
 0x500   :  { %v5903_v15 = vpop.f32.mrb[33].mxu0 }
 0x501   :  { %v5904_v36 = vadd.f32 %v5903_v15, %v5902_v58 }
 0x503   :  { %v3886_v45 = vadd.f32 %v5904_v36, %v3885_v40  ;;  %v5905_v32 = vpop.f32.mrb[34].mxu0 }
 0x504   :  { %v5906_v16 = vpop.f32.mrb[35].mxu0 }
 0x505   :  { %v5907_v47 = vadd.f32 %v5906_v16, %v5905_v32  ;;  %v3890_v46 = vpop.f32.mrb[32].mxu1  ;;  %v7081_v63 = vpop.permute.xlu1 %7080  ;;  %v3900_v0 = vmax.f32 %v3886_v45, 0.0 }
 0x506   :  { %v3892_v28 = vpop.f32.mrb[33].mxu1  ;;  %v7083_v14 = vunpack.i.h.bf16 %v7081_v63  ;;  %v7082_v30 = vunpack.i.l.bf16 %v7081_v63 }
 0x507   :  { %v3891_v17 = vadd.f32 %v5907_v47, %v3890_v46 }
 0x508   :  { %v6432_v49 = vpack.c.bf16 %v7083_v14, %v7082_v30 }
 0x509   :  { %v3901_v19 = vmax.f32 %v3891_v17, 0.0 }
 0x50a   :  { %6433 = vmatprep.subr.bf16.mxu0 %v6432_v49 }
 0x50b   :  { %6435 = vmatpush3.bf16.msra.mxu0 %v6434_v20  ;;  %v7099_v61 = vpack.i.bf16 %v3901_v19, %v3900_v0  ;;  %v8750_v18 = vpack.c.bf16 %v3901_v19, %v3900_v0  ;;  %v4268_v20 = vld [vmem:[%s9352_s7 + $0x18] sm:$0xff] }
 0x50d   :  { %7100 = vrot.lane.b32.xlu0 %v7099_v61, %s7187_s2  ;;  %7140 = vrot.lane.b32.xlu1 %v7099_v61, %s7185_s0 }
 0x511   :  { %7105 = vrot.lane.b32.xlu0 %v8734_v50, %s7186_s1  ;;  %7145 = vrot.lane.b32.xlu1 %v7089_v4, %s7188_s20  ;;  %v4271_v50 = vld [vmem:[%s9352_s7 + $0x30] sm:$0xff]  ;;  %s7191_s7 = smov 123  }
 0x515   :  { %7115 = vrot.lane.b32.xlu0 %v7084_v39, %s7186_s1  ;;  %4275 = vperm.xlu1 %6838, %v4265_v35  }
 0x519   :  { %7125 = vrot.lane.b32.xlu0 %v7089_v4, %s7185_s0  ;;  %4331 = vperm.xlu1 %6838, %v4321_v42  }
 0x51d   :  { %7135 = vrot.lane.b32.xlu0 %v7084_v39, %s7188_s20  ;;  %4285 = vperm.xlu1 %6838, %v4267_v55  }
 0x521   :  { %7150 = vrot.lane.b32.xlu0 %v7099_v61, %s7186_s1  ;;  %4341 = vperm.xlu1 %6838, %v4323_v62  }
 0x525   :  { %7155 = vrot.lane.b32.xlu0 %v7099_v61, %s7188_s20  ;;  %4295 = vperm.xlu1 %6838, %v4269_v25  }
 0x529   :  { %4280 = vperm.xlu0 %6837, %v4266_v41   ;;  %4351 = vperm.xlu1 %6838, %v4325_v38  }
 0x52d   :  { %4336 = vperm.xlu0 %6837, %v4322_v53   ;;  %4305 = vperm.xlu1 %6838, %v4271_v50  }
 0x52f   :  { %v7086_v43 = vpop.permute.xlu0 %7085 }
 0x530   :  { %v7088_v29 = vunpack.i.h.bf16 %v7086_v43  ;;  %v7087_v59 = vunpack.i.l.bf16 %v7086_v43  ;;  %v4006_v43 = vld [vmem:[%s9351_s6] sm:$0xff] }
 0x531   :  { %4290 = vperm.xlu0 %6837, %v4268_v20   ;;  %4361 = vperm.xlu1 %6838, %v4327_v12  }
 0x532   :  { %v6436_v13 = vpack.c.bf16 %v7088_v29, %v7087_v59  ;;  %v4010_v29 = vld [vmem:[%s9351_s6 + $0x20] sm:$0xff]  ;;  %v9459_v59 = vmov 0.0|0.0  }
 0x534   :  { %6437 = vmatprep.subr.bf16.mxu0 %v6436_v13 }
 0x535   :  { %4346 = vperm.xlu0 %6837, %v4324_v27   ;;  %6439 = vmatpush3.bf16.msra.mxu0 %v8738_v57  ;;  %v4009_v27 = vld [vmem:[%s9351_s6 + $0x18] sm:$0xff] }
 0x539   :  { %4300 = vperm.xlu0 %6837, %v4270_v44   ;;  %v4011_v44 = vld [vmem:[%s9351_s6 + $0x28] sm:$0xff] }
 0x53d   :  { %4356 = vperm.xlu0 %6837, %v4326_v11   ;;  %v4013_v11 = vld [vmem:[%s9351_s6 + $0x38] sm:$0xff] }
 0x541   :  { %4310 = vperm.xlu0 %6837, %v4272_v7   ;;  %v4014_v7 = vld [vmem:[%s9351_s6 + $0x40] sm:$0xff] }
 0x545   :  { %4366 = vperm.xlu0 %6837, %v4328_v22   ;;  %v4012_v22 = vld [vmem:[%s9351_s6 + $0x30] sm:$0xff] }
 0x557   :  { %v7091_v52 = vpop.permute.xlu1 %7090 }
 0x558   :  { %v7093_v34 = vunpack.i.h.bf16 %v7091_v52  ;;  %v7092_v60 = vunpack.i.l.bf16 %v7091_v52  ;;  %v4017_v52 = vld [vmem:[%s9351_s6 + $0x58] sm:$0xff] }
 0x55a   :  { %v6440_v9 = vpack.c.bf16 %v7093_v34, %v7092_v60  ;;  %v4016_v34 = vld [vmem:[%s9351_s6 + $0x50] sm:$0xff] }
 0x55b   :  { %v7096_v39 = vpop.permute.xlu1 %7095  ;;  %v4020_v60 = vld [vmem:[%s9351_s6 + $0x70] sm:$0xff] }
 0x55c   :  { %6441 = vmatprep.subr.bf16.mxu0 %v6440_v9  ;;  %v7098_v6 = vunpack.i.h.bf16 %v7096_v39  ;;  %v7097_v24 = vunpack.i.l.bf16 %v7096_v39  ;;  %v4015_v9 = vld [vmem:[%s9351_s6 + $0x48] sm:$0xff] }
 0x55d   :  { %6443 = vmatpush3.bf16.msra.mxu0 %v8741_v1  ;;  %v4019_v39 = vld [vmem:[%s9351_s6 + $0x68] sm:$0xff] }
 0x55e   :  { %v6448_v3 = vpack.c.bf16 %v7098_v6, %v7097_v24  ;;  %v4021_v6 = vld [vmem:[%s9351_s6 + $0x78] sm:$0xff] }
 0x55f   :  { %v7111_v57 = vpop.permute.xlu1 %7110  ;;  %v4025_v24 = vld [vmem:[%s9351_s6 + $0x98] sm:$0xff] }
 0x560   :  { %v7113_v51 = vunpack.i.h.bf16 %v7111_v57  ;;  %v7112_v4 = vunpack.i.l.bf16 %v7111_v57  ;;  %v4023_v57 = vld [vmem:[%s9351_s6 + $0x88] sm:$0xff] }
 0x562   :  { %v6452_v36 = vpack.c.bf16 %v7113_v51, %v7112_v4 }
 0x563   :  { %v7121_v23 = vpop.permute.xlu1 %7120 }
 0x564   :  { %v7123_v54 = vunpack.i.h.bf16 %v7121_v23  ;;  %v7122_v5 = vunpack.i.l.bf16 %v7121_v23  ;;  %v4026_v23 = vld [vmem:[%s9351_s6 + $0xa0] sm:$0xff] }
 0x566   :  { %v6464_v8 = vpack.c.bf16 %v7123_v54, %v7122_v5  ;;  %v4018_v54 = vld [vmem:[%s9351_s6 + $0x60] sm:$0xff] }
 0x567   :  { %v7131_v31 = vpop.permute.xlu1 %7130  ;;  %v4022_v5 = vld [vmem:[%s9351_s6 + $0x80] sm:$0xff] }
 0x568   :  { %6465 = vmatprep.subr.bf16.mxu1 %v6464_v8  ;;  %v7133_v47 = vunpack.i.h.bf16 %v7131_v31  ;;  %v7132_v46 = vunpack.i.l.bf16 %v7131_v31 }
 0x569   :  { %6467 = vmatpush3.bf16.msra.mxu1 %v6464_v8  ;;  %v4029_v8 = vld [vmem:[%s9351_s6 + $0xb8] sm:$0xff] }
 0x56a   :  { %v6458_v19 = vpack.c.bf16 %v7133_v47, %v7132_v46  ;;  %v4617_v46 = vld [vmem:[%s9354_s9] sm:$0xff] }
 0x57f   :  { %v7101_v10 = vpop.permute.xlu0 %7100  ;;  %v7141_v58 = vpop.permute.xlu1 %7140 }
 0x580   :  { %v7103_v56 = vunpack.i.h.bf16 %v7101_v10  ;;  %v7102_v26 = vunpack.i.l.bf16 %v7101_v10  ;;  %v7143_v63 = vunpack.i.h.bf16 %v7141_v58  ;;  %v7142_v28 = vunpack.i.l.bf16 %v7141_v58  ;;  %v4024_v10 = vld [vmem:[%s9351_s6 + $0x90] sm:$0xff] }
 0x582   :  { %v6444_v21 = vpack.c.bf16 %v7103_v56, %v7102_v26  ;;  %v6460_v61 = vpack.c.bf16 %v7143_v63, %v7142_v28  ;;  %v4028_v56 = vld [vmem:[%s9351_s6 + $0xb0] sm:$0xff]  ;;  %v4027_v26 = vld [vmem:[%s9351_s6 + $0xa8] sm:$0xff] }
 0x583   :  { %v7106_v48 = vpop.permute.xlu0 %7105  ;;  %v7146_v49 = vpop.permute.xlu1 %7145  ;;  %v4618_v63 = vld [vmem:[%s9354_s9 + $0x8] sm:$0xff] }
 0x584   :  { %v7108_v40 = vunpack.i.h.bf16 %v7106_v48  ;;  %v7107_v1 = vunpack.i.l.bf16 %v7106_v48  ;;  %6445 = vmatprep.subr.bf16.mxu0 %v6444_v21  ;;  %v7148_v35 = vunpack.i.h.bf16 %v7146_v49  ;;  %v7147_v42 = vunpack.i.l.bf16 %v7146_v49 }
 0x585   :  { %6447 = vmatpush3.bf16.msra.mxu0 %v8750_v18  ;;  %v6480_v49 = vpack.c.bf16 %v4618_v63, %v4617_v46 }
 0x586   :  { %v6450_v37 = vpack.c.bf16 %v7108_v40, %v7107_v1  ;;  %6449 = vmatprep.subr.bf16.mxu0 %v6448_v3  ;;  %v6472_v25 = vpack.c.bf16 %v7148_v35, %v7147_v42 }
 0x587   :  { %v7116_v15 = vpop.permute.xlu0 %7115 }
 0x588   :  { %v7118_v45 = vunpack.i.h.bf16 %v7116_v15  ;;  %v7117_v32 = vunpack.i.l.bf16 %v7116_v15 }
 0x589   :  { %6451 = vmatpush3.bf16.msra.mxu0 %v6450_v37 }
 0x58a   :  { %v6454_v16 = vpack.c.bf16 %v7118_v45, %v7117_v32  ;;  %6453 = vmatprep.subr.bf16.mxu0 %v6452_v36 }
 0x58b   :  { %v7126_v14 = vpop.permute.xlu0 %7125 }
 0x58c   :  { %v7128_v30 = vunpack.i.h.bf16 %v7126_v14  ;;  %v7127_v17 = vunpack.i.l.bf16 %v7126_v14 }
 0x58d   :  { %6455 = vmatpush3.bf16.msra.mxu0 %v6454_v16 }
 0x58e   :  { %v6456_v0 = vpack.c.bf16 %v7128_v30, %v7127_v17 }
 0x58f   :  { %v7136_v18 = vpop.permute.xlu0 %7135 }
 0x590   :  { %v7138_v55 = vunpack.i.h.bf16 %v7136_v18  ;;  %v7137_v33 = vunpack.i.l.bf16 %v7136_v18  ;;  %6457 = vmatprep.subr.bf16.mxu0 %v6456_v0 }
 0x591   :  { %6459 = vmatpush3.bf16.msra.mxu0 %v6458_v19 }
 0x592   :  { %v6468_v62 = vpack.c.bf16 %v7138_v55, %v7137_v33  ;;  %6461 = vmatprep.subr.bf16.mxu0 %v6460_v61  ;;  %v4619_v33 = vld [vmem:[%s9354_s9 + $0x10] sm:$0xff] }
 0x593   :  { %v7151_v2 = vpop.permute.xlu0 %7150 }
 0x594   :  { %v7153_v41 = vunpack.i.h.bf16 %v7151_v2  ;;  %v7152_v38 = vunpack.i.l.bf16 %v7151_v2  ;;  %6469 = vmatprep.subr.bf16.mxu1 %v6468_v62  ;;  %v4276_v48 = vpop.permute.xlu1 %4275 }
 0x595   :  { %6471 = vmatpush3.bf16.msra.mxu1 %v6468_v62  ;;  %v4620_v62 = vld [vmem:[%s9354_s9 + $0x18] sm:$0xff] }
 0x596   :  { %v6462_v53 = vpack.c.bf16 %v7153_v41, %v7152_v38  ;;  %6473 = vmatprep.subr.bf16.mxu1 %v6472_v25  ;;  %v6484_v41 = vpack.c.bf16 %v4620_v62, %v4619_v33 }
 0x597   :  { %v7156_v50 = vpop.permute.xlu0 %7155 }
 0x598   :  { %v7158_v20 = vunpack.i.h.bf16 %v7156_v50  ;;  %v7157_v12 = vunpack.i.l.bf16 %v7156_v50  ;;  %6463 = vmatpush3.bf16.msra.mxu0 %v6462_v53  ;;  %v4332_v28 = vpop.permute.xlu1 %4331 }
 0x599   :  { %6475 = vmatpush3.bf16.msra.mxu1 %v6472_v25  ;;  %6502 = vmatprep.subr.bf16.mxu0 %v9459_v59 }
 0x59a   :  { %v6476_v13 = vpack.c.bf16 %v7158_v20, %v7157_v12  ;;  %v4621_v12 = vld [vmem:[%s9354_s9 + $0x20] sm:$0xff] }
 0x59b   :  { %4120 = vmatmul.mubr.f32.vlgmr.msra.gmra.mrb[36].mxu0 %v4006_v43  ;;  %v4622_v43 = vld [vmem:[%s9354_s9 + $0x28] sm:$0xff] }
 0x59c   :  { %6477 = vmatprep.subr.bf16.mxu1 %v6476_v13  ;;  %4124 = vmatprep.mubr.f32.mxu0 %v4010_v29 }
 0x59d   :  { %6479 = vmatpush3.bf16.msra.mxu1 %v6476_v13 }
 0x59e   :  { %6481 = vmatprep.subr.bf16.mxu1 %v6480_v49 }
 0x59f   :  { %4125 = vmatmul.mubr.f32.gmra.mrb[38].mxu0 %v4009_v27  ;;  %v6488_v27 = vpack.c.bf16 %v4622_v43, %v4621_v12 }
 0x5a0   :  { %6083 = vmatmul.mubr.msk.f32.vlgmr.msra.gmra.mrb[34].mxu1 %vm4030_vm7, %v4011_v44  ;;  %4129 = vmatprep.mubr.f32.mxu0 %v4013_v11 }
 0x5a1   :  { %6085 = vmatprep.mubr.msk.f32.mxu1 %vm4030_vm7, %v4014_v7  ;;  %6483 = vmatpush3.bf16.msra.mxu1 %v6480_v49 }
 0x5a2   :  { %6485 = vmatprep.subr.bf16.mxu1 %v6484_v41 }
 0x5a3   :  { %4130 = vmatmul.mubr.f32.gmra.mrb[40].mxu0 %v4012_v22  ;;  %v4623_v22 = vld [vmem:[%s9354_s9 + $0x30] sm:$0xff] }
 0x5a4   :  { %6086 = vmatmul.mubr.msk.f32.gmra.mrb[36].mxu1 %vm4030_vm7, %v4017_v52  ;;  %4134 = vmatprep.mubr.f32.mxu0 %v4016_v34  ;;  %v4624_v52 = vld [vmem:[%s9354_s9 + $0x38] sm:$0xff] }
 0x5a5   :  { %6088 = vmatprep.mubr.msk.f32.mxu1 %vm4030_vm7, %v4020_v60  ;;  %6487 = vmatpush3.bf16.msra.mxu1 %v6484_v41  ;;  %v6492_v60 = vpack.c.bf16 %v4624_v52, %v4623_v22 }
 0x5a6   :  { %6489 = vmatprep.subr.bf16.mxu1 %v6488_v27 }
 0x5a7   :  { %4135 = vmatmul.mubr.f32.gmra.mrb[42].mxu0 %v4015_v9 }
 0x5a8   :  { %4139 = vmatprep.mubr.f32.mxu0 %v4019_v39  ;;  %6089 = vmatmul.mubr.msk.f32.gmra.mrb[38].mxu1 %vm4030_vm7, %v4023_v57  ;;  %v4281_v51 = vpop.permute.xlu0 %4280 }
 0x5a9   :  { %6091 = vmatprep.mubr.msk.f32.mxu1 %vm4030_vm7, %v4026_v23  ;;  %6491 = vmatpush3.bf16.msra.mxu1 %v6488_v27 }
 0x5aa   :  { %6493 = vmatprep.subr.bf16.mxu1 %v6492_v60 }
 0x5ab   :  { %4140 = vmatmul.mubr.f32.gmra.mrb[44].mxu0 %v4018_v54  ;;  %v4625_v54 = vld [vmem:[%s9354_s9 + $0x40] sm:$0xff] }
 0x5ac   :  { %4144 = vmatprep.mubr.f32.mxu0 %v4022_v5  ;;  %6092 = vmatmul.mubr.msk.f32.gmra.mrb[40].mxu1 %vm4030_vm7, %v4029_v8  ;;  %v4337_v0 = vpop.permute.xlu0 %4336  ;;  %v4626_v5 = vld [vmem:[%s9354_s9 + $0x48] sm:$0x1]  ;;  %s7192_s9 = smov 122  }
 0x5ad   :  { %6495 = vmatpush3.bf16.msra.mxu1 %v6492_v60 }
 0x5af   :  { %4145 = vmatmul.mubr.f32.gmra.mrb[46].mxu0 %v4021_v6 }
 0x5b0   :  { %4149 = vmatprep.mubr.f32.mxu0 %v4025_v24  ;;  %v6496_v24 = vpack.c.bf16 %v4626_v5, %v4625_v54 }
 0x5b2   :  { %6498 = vmatprep.subr.msk.bf16.mxu1 %vm6497_vm10, %v6496_v24 }
 0x5b3   :  { %4150 = vmatmul.mubr.f32.gmra.mrb[48].mxu0 %v4024_v10  ;;  %6501 = vmatpush3.bf16.msk.msra.mxu1 %vm6497_vm10, %v6496_v24 }
 0x5b4   :  { %4154 = vmatprep.mubr.f32.mxu0 %v4028_v56  ;;  %6534 = vmatprep.subr.bf16.mxu1 %v9459_v59 }
 0x5b7   :  { %4155 = vmatmul.mubr.f32.gmra.mrb[50].mxu0 %v4027_v26  ;;  %v4286_v26 = vpop.permute.xlu1 %4285 }
 0x66e   :  { %v5940_v21 = vpop.f32.mrb[36].mxu0 }
 0x66f   :  { %v5941_v3 = vpop.f32.mrb[37].mxu0 }
 0x670   :  { %v5942_v31 = vadd.f32 %v5941_v3, %v5940_v21  ;;  %v4291_v3 = vpop.permute.xlu0 %4290 }
 0x672   :  { %v5943_v4 = vpop.f32.mrb[38].mxu0 }
 0x673   :  { %v5944_v40 = vpop.f32.mrb[39].mxu0  ;;  %v6084_v1 = vpop.f32.mrb[34].mxu1 }
 0x674   :  { %v5945_v37 = vadd.f32 %v5944_v40, %v5943_v4  ;;  %v4226_v58 = vpop.f32.mrb[35].mxu1  ;;  %v4347_v4 = vpop.permute.xlu0 %4346 }
 0x675   :  { %v4227_v15 = vadd.f32 %v5942_v31, %v4226_v58 }
 0x676   :  { %v4232_v36 = vadd.f32 %v6084_v1, %v5945_v37  ;;  %v5946_v45 = vpop.f32.mrb[40].mxu0 }
 0x677   :  { %v4313_v32 = vmul.f32 %v4276_v48, %v4227_v15  ;;  %v5947_v16 = vpop.f32.mrb[41].mxu0  ;;  %v6087_v47 = vpop.f32.mrb[36].mxu1 }
 0x678   :  { %v4314_v14 = vmul.f32 %v4281_v51, %v4232_v36  ;;  %v5948_v30 = vadd.f32 %v5947_v16, %v5946_v45  ;;  %v4236_v17 = vpop.f32.mrb[37].mxu1  ;;  %v4342_v51 = vpop.permute.xlu1 %4341 }
 0x679   :  { %v8900_v19 = vadd.f32 %v4332_v28, %v4313_v32  ;;  %v4301_v58 = vpop.permute.xlu0 %4300 }
 0x67a   :  { %v8902_v61 = vadd.f32 %v4337_v0, %v4314_v14  ;;  %v8904_v18 = vadd.f32 %v5948_v30, %v4236_v17  ;;  %v5949_v35 = vpop.f32.mrb[42].mxu0 }
 0x67b   :  { %v5950_v42 = vpop.f32.mrb[43].mxu0  ;;  %4385 = vrot.lane.b32.xlu1 %v8900_v19, %s7186_s1  ;;  %v6090_v55 = vpop.f32.mrb[38].mxu1 }
 0x67c   :  { %v5951_v2 = vadd.f32 %v5950_v42, %v5949_v35  ;;  %4387 = vrot.lane.b32.xlu0 %v8902_v61, %s7186_s1  ;;  %v4246_v25 = vpop.f32.mrb[39].mxu1  ;;  %v4315_v31 = vmul.f32 %v4286_v26, %v8904_v18  ;;  %v4296_v37 = vpop.permute.xlu1 %4295  ;;  %v5787_v35 = vld [vmem:[%s9355_s10 + $0x10] sm:$0xff]  ;;  %v5788_v42 = vld [vmem:[%s9355_s10 + $0x18] sm:$0x3] }
 0x67d   :  { %v4357_v32 = vpop.permute.xlu0 %4356  ;;  %v5832_v18 = vld [vmem:[%s9356_s11 + $0xb8] sm:$0xff] }
 0x67e   :  { %v4242_v38 = vadd.f32 %v6087_v47, %v5951_v2  ;;  %v5952_v53 = vpop.f32.mrb[44].mxu0  ;;  %v8965_v40 = vadd.f32 %v4342_v51, %v4315_v31 }
 0x67f   :  { %v5953_v50 = vpop.f32.mrb[45].mxu0  ;;  %4417 = vrot.lane.b32.xlu1 %v8900_v19, %s7187_s2  ;;  %v6093_v20 = vpop.f32.mrb[40].mxu1 }
 0x680   :  { %v5954_v29 = vadd.f32 %v5953_v50, %v5952_v53  ;;  %4419 = vrot.lane.b32.xlu0 %v8902_v61, %s7187_s2  ;;  %v4256_v13 = vpop.f32.mrb[41].mxu1  ;;  %v4316_v48 = vmul.f32 %v4291_v3, %v4242_v38  ;;  %v4352_v45 = vpop.permute.xlu1 %4351 }
 0x681   :  { %v4311_v63 = vpop.permute.xlu0 %4310 }
 0x682   :  { %v8926_v44 = vadd.f32 %v5954_v29, %v4246_v25  ;;  %v5955_v11 = vpop.f32.mrb[46].mxu0  ;;  %v8967_v1 = vadd.f32 %v4347_v4, %v4316_v48 }
 0x683   :  { %v5956_v7 = vpop.f32.mrb[47].mxu0  ;;  %4449 = vrot.lane.b32.xlu1 %v8900_v19, %s7185_s0 }
 0x684   :  { %v5957_v34 = vadd.f32 %v5956_v7, %v5955_v11  ;;  %4451 = vrot.lane.b32.xlu0 %v8902_v61, %s7185_s0  ;;  %v4317_v15 = vmul.f32 %v4296_v37, %v8926_v44  ;;  %v4306_v46 = vpop.permute.xlu1 %4305 }
 0x685   :  { %v4367_v17 = vpop.permute.xlu0 %4366 }
 0x686   :  { %v4252_v9 = vadd.f32 %v6090_v55, %v5957_v34  ;;  %v5958_v39 = vpop.f32.mrb[48].mxu0  ;;  %v8998_v16 = vadd.f32 %v4352_v45, %v4317_v15  ;;  %v6503_v55 = vpack.c.bf16 %v5788_v42, %v5787_v35 }
 0x687   :  { %v5959_v57 = vpop.f32.mrb[49].mxu0  ;;  %4481 = vrot.lane.b32.xlu1 %v8900_v19, %s7188_s20 }
 0x688   :  { %v5960_v23 = vadd.f32 %v5959_v57, %v5958_v39  ;;  %4483 = vrot.lane.b32.xlu0 %v8902_v61, %s7188_s20  ;;  %v4318_v36 = vmul.f32 %v4301_v58, %v4252_v9  ;;  %v4362_v30 = vpop.permute.xlu1 %4361  ;;  %6505 = vmatpush3.bf16.msk.msra.mxu0 %vm9054_vm12, %v6503_v55 }
 0x689   :  { %6506 = vmatprep.subr.bf16.mxu0 %v9459_v59 }
 0x68a   :  { %v8948_v8 = vadd.f32 %v5960_v23, %v4256_v13  ;;  %v5961_v6 = vpop.f32.mrb[50].mxu0  ;;  %v9000_v47 = vadd.f32 %v4357_v32, %v4318_v36 }
 0x68b   :  { %v5962_v10 = vpop.f32.mrb[51].mxu0  ;;  %4513 = vrot.lane.b32.xlu1 %v8900_v19, %s7191_s7 }
 0x68c   :  { %v5963_v56 = vadd.f32 %v5962_v10, %v5961_v6  ;;  %4515 = vrot.lane.b32.xlu0 %v8902_v61, %s7191_s7  ;;  %v4319_v28 = vmul.f32 %v4306_v46, %v8948_v8 }
 0x68e   :  { %v4262_v21 = vadd.f32 %v6093_v20, %v5963_v56  ;;  %v9031_v49 = vadd.f32 %v4362_v30, %v4319_v28 }
 0x68f   :  { %4545 = vrot.lane.b32.xlu1 %v8900_v19, %s7192_s9 }
 0x690   :  { %4547 = vrot.lane.b32.xlu0 %v8902_v61, %s7192_s9  ;;  %v4320_v14 = vmul.f32 %v4311_v63, %v4262_v21 }
 0x692   :  { %v9033_v0 = vadd.f32 %v4367_v17, %v4320_v14 }
 0x693   :  { %4577 = vrot.lane.b32.xlu1 %v8900_v19, %s7193_s8 }
 0x694   :  { %4579 = vrot.lane.b32.xlu0 %v8902_v61, %s7193_s8 }
 0x697   :  { %4389 = vrot.lane.b32.xlu1 %v8965_v40, %s7186_s1 }
 0x698   :  { %4391 = vrot.lane.b32.xlu0 %v8967_v1, %s7186_s1 }
 0x69b   :  { %4421 = vrot.lane.b32.xlu1 %v8965_v40, %s7187_s2 }
 0x69c   :  { %4423 = vrot.lane.b32.xlu0 %v8967_v1, %s7187_s2 }
 0x69f   :  { %4453 = vrot.lane.b32.xlu1 %v8965_v40, %s7185_s0 }
 0x6a0   :  { %4455 = vrot.lane.b32.xlu0 %v8967_v1, %s7185_s0 }
 0x6a3   :  { %4485 = vrot.lane.b32.xlu1 %v8965_v40, %s7188_s20 }
 0x6a4   :  { %4487 = vrot.lane.b32.xlu0 %v8967_v1, %s7188_s20 }
 0x6a7   :  { %4517 = vrot.lane.b32.xlu1 %v8965_v40, %s7191_s7 }
 0x6a8   :  { %4519 = vrot.lane.b32.xlu0 %v8967_v1, %s7191_s7 }
 0x6ab   :  { %4549 = vrot.lane.b32.xlu1 %v8965_v40, %s7192_s9 }
 0x6ac   :  { %4551 = vrot.lane.b32.xlu0 %v8967_v1, %s7192_s9 }
 0x6af   :  { %4581 = vrot.lane.b32.xlu1 %v8965_v40, %s7193_s8 }
 0x6b0   :  { %4583 = vrot.lane.b32.xlu0 %v8967_v1, %s7193_s8 }
 0x6b3   :  { %4393 = vrot.lane.b32.xlu1 %v8998_v16, %s7186_s1 }
 0x6b4   :  { %4395 = vrot.lane.b32.xlu0 %v9000_v47, %s7186_s1 }
 0x6b7   :  { %4425 = vrot.lane.b32.xlu1 %v8998_v16, %s7187_s2 }
 0x6b8   :  { %4427 = vrot.lane.b32.xlu0 %v9000_v47, %s7187_s2 }
 0x6bb   :  { %4457 = vrot.lane.b32.xlu1 %v8998_v16, %s7185_s0 }
 0x6bc   :  { %4459 = vrot.lane.b32.xlu0 %v9000_v47, %s7185_s0 }
 0x6bf   :  { %4489 = vrot.lane.b32.xlu1 %v8998_v16, %s7188_s20 }
 0x6c0   :  { %4491 = vrot.lane.b32.xlu0 %v9000_v47, %s7188_s20 }
 0x6c3   :  { %4521 = vrot.lane.b32.xlu1 %v8998_v16, %s7191_s7 }
 0x6c4   :  { %4523 = vrot.lane.b32.xlu0 %v9000_v47, %s7191_s7 }
 0x6c7   :  { %4553 = vrot.lane.b32.xlu1 %v8998_v16, %s7192_s9 }
 0x6c8   :  { %4555 = vrot.lane.b32.xlu0 %v9000_v47, %s7192_s9 }
 0x6cb   :  { %4585 = vrot.lane.b32.xlu1 %v8998_v16, %s7193_s8 }
 0x6cc   :  { %4587 = vrot.lane.b32.xlu0 %v9000_v47, %s7193_s8 }
 0x6cf   :  { %4397 = vrot.lane.b32.xlu1 %v9031_v49, %s7186_s1 }
 0x6d0   :  { %4399 = vrot.lane.b32.xlu0 %v9033_v0, %s7186_s1 }
 0x6d3   :  { %4429 = vrot.lane.b32.xlu1 %v9031_v49, %s7187_s2 }
 0x6d4   :  { %4431 = vrot.lane.b32.xlu0 %v9033_v0, %s7187_s2 }
 0x6d7   :  { %4461 = vrot.lane.b32.xlu1 %v9031_v49, %s7185_s0 }
 0x6d8   :  { %4463 = vrot.lane.b32.xlu0 %v9033_v0, %s7185_s0 }
 0x6db   :  { %4493 = vrot.lane.b32.xlu1 %v9031_v49, %s7188_s20 }
 0x6dc   :  { %4495 = vrot.lane.b32.xlu0 %v9033_v0, %s7188_s20 }
 0x6df   :  { %4525 = vrot.lane.b32.xlu1 %v9031_v49, %s7191_s7 }
 0x6e0   :  { %4527 = vrot.lane.b32.xlu0 %v9033_v0, %s7191_s7 }
 0x6e3   :  { %4557 = vrot.lane.b32.xlu1 %v9031_v49, %s7192_s9 }
 0x6e4   :  { %4559 = vrot.lane.b32.xlu0 %v9033_v0, %s7192_s9 }
 0x6e7   :  { %4589 = vrot.lane.b32.xlu1 %v9031_v49, %s7193_s8 }
 0x6e8   :  { %4591 = vrot.lane.b32.xlu0 %v9033_v0, %s7193_s8 }
 0x6ed   :  { %v4386_v33 = vpop.permute.xlu1 %4385 }
 0x6ee   :  { %v4388_v62 = vpop.permute.xlu0 %4387  ;;  %v4409_v50 = vmax.f32 %v8900_v19, %v4386_v33 }
 0x6ef   :  { %v4410_v12 = vmax.f32 %v8902_v61, %v4388_v62 }
 0x6f1   :  { %v4418_v2 = vpop.permute.xlu1 %4417 }
 0x6f2   :  { %v4420_v25 = vpop.permute.xlu0 %4419  ;;  %v4441_v43 = vmax.f32 %v4409_v50, %v4418_v2 }
 0x6f3   :  { %v4442_v29 = vmax.f32 %v4410_v12, %v4420_v25 }
 0x6f5   :  { %v4450_v41 = vpop.permute.xlu1 %4449 }
 0x6f6   :  { %v4452_v38 = vpop.permute.xlu0 %4451  ;;  %v4473_v27 = vmax.f32 %v4441_v43, %v4450_v41 }
 0x6f7   :  { %v4474_v11 = vmax.f32 %v4442_v29, %v4452_v38 }
 0x6f9   :  { %v4482_v53 = vpop.permute.xlu1 %4481 }
 0x6fa   :  { %v4484_v20 = vpop.permute.xlu0 %4483  ;;  %v4505_v7 = vmax.f32 %v4473_v27, %v4482_v53 }
 0x6fb   :  { %v4506_v22 = vmax.f32 %v4474_v11, %v4484_v20 }
 0x6fd   :  { %v4514_v13 = vpop.permute.xlu1 %4513 }
 0x6fe   :  { %v4516_v44 = vpop.permute.xlu0 %4515  ;;  %v4537_v34 = vmax.f32 %v4505_v7, %v4514_v13 }
 0x6ff   :  { %v4538_v9 = vmax.f32 %v4506_v22, %v4516_v44 }
 0x701   :  { %v4546_v52 = vpop.permute.xlu1 %4545 }
 0x702   :  { %v4548_v60 = vpop.permute.xlu0 %4547  ;;  %v4569_v39 = vmax.f32 %v4537_v34, %v4546_v52 }
 0x703   :  { %v4570_v57 = vmax.f32 %v4538_v9, %v4548_v60 }
 0x705   :  { %v4578_v23 = vpop.permute.xlu1 %4577 }
 0x706   :  { %v4601_v54 = vmax.f32 %v4569_v39, %v4578_v23  ;;  %v4580_v19 = vpop.permute.xlu0 %4579 }
 0x707   :  { %v4602_v5 = vmax.f32 %v4570_v57, %v4580_v19 }
 0x708   :  { %v4609_v61 = vmax.f32 %v4601_v54, 0.0 }
 0x709   :  { %v4610_v8 = vmax.f32 %v4602_v5, 0.0  ;;  %v4390_v6 = vpop.permute.xlu1 %4389 }
 0x70a   :  { %v4392_v24 = vpop.permute.xlu0 %4391  ;;  %6114 = vmatprep.mubr.msk.f32.mxu1 %vm4627_vm13, %v4609_v61  ;;  %v4411_v31 = vmax.f32 %v8965_v40, %v4390_v6 }
 0x70b   :  { %6115 = vmatmul.mubr.msk.f32.vlgmr.msra.gmra.mrb[42].mxu1 %vm4627_vm13, %v4610_v8  ;;  %v4412_v51 = vmax.f32 %v8967_v1, %v4392_v24 }
 0x70d   :  { %v4422_v10 = vpop.permute.xlu1 %4421 }
 0x70e   :  { %v4424_v56 = vpop.permute.xlu0 %4423  ;;  %v4443_v4 = vmax.f32 %v4411_v31, %v4422_v10 }
 0x70f   :  { %v4444_v37 = vmax.f32 %v4412_v51, %v4424_v56 }
 0x711   :  { %v4454_v26 = vpop.permute.xlu1 %4453 }
 0x712   :  { %v4456_v21 = vpop.permute.xlu0 %4455  ;;  %v4475_v15 = vmax.f32 %v4443_v4, %v4454_v26 }
 0x713   :  { %v4476_v45 = vmax.f32 %v4444_v37, %v4456_v21 }
 0x715   :  { %v4486_v3 = vpop.permute.xlu1 %4485 }
 0x716   :  { %v4488_v48 = vpop.permute.xlu0 %4487  ;;  %v4507_v32 = vmax.f32 %v4475_v15, %v4486_v3 }
 0x717   :  { %v4508_v46 = vmax.f32 %v4476_v45, %v4488_v48 }
 0x719   :  { %v4518_v58 = vpop.permute.xlu1 %4517 }
 0x71a   :  { %v4520_v36 = vpop.permute.xlu0 %4519  ;;  %v4539_v28 = vmax.f32 %v4507_v32, %v4518_v58 }
 0x71b   :  { %v4540_v30 = vmax.f32 %v4508_v46, %v4520_v36 }
 0x71d   :  { %v4550_v63 = vpop.permute.xlu1 %4549 }
 0x71e   :  { %v4552_v14 = vpop.permute.xlu0 %4551  ;;  %v4571_v17 = vmax.f32 %v4539_v28, %v4550_v63 }
 0x71f   :  { %v4572_v35 = vmax.f32 %v4540_v30, %v4552_v14 }
 0x721   :  { %v4582_v42 = vpop.permute.xlu1 %4581 }
 0x722   :  { %v4603_v55 = vmax.f32 %v4571_v17, %v4582_v42  ;;  %v4584_v40 = vpop.permute.xlu0 %4583 }
 0x723   :  { %v4604_v33 = vmax.f32 %v4572_v35, %v4584_v40 }
 0x724   :  { %v4611_v62 = vmax.f32 %v4603_v55, 0.0 }
 0x725   :  { %v4612_v1 = vmax.f32 %v4604_v33, 0.0  ;;  %v4394_v2 = vpop.permute.xlu1 %4393 }
 0x726   :  { %v4396_v25 = vpop.permute.xlu0 %4395  ;;  %6117 = vmatprep.mubr.msk.f32.mxu1 %vm4627_vm13, %v4611_v62  ;;  %v4413_v12 = vmax.f32 %v8998_v16, %v4394_v2  ;;  %v9462_v62 = vmov 0.0   ;;  %v5818_v2 = vld [vmem:[%s9356_s11 + $0x58] sm:$0xff] }
 0x727   :  { %6118 = vmatmul.mubr.msk.f32.gmra.mrb[44].mxu1 %vm4627_vm13, %v4612_v1  ;;  %v4414_v29 = vmax.f32 %v9000_v47, %v4396_v25  ;;  %6130 = vmatprep.mubr.msk.f32.mxu0 %vm7194_vm14, %v9462_v62  ;;  %v5817_v1 = vld [vmem:[%s9356_s11 + $0x50] sm:$0xff] }
 0x728   :  { %v6535_v25 = vpack.c.bf16 %v5818_v2, %v5817_v1 }
 0x729   :  { %v4426_v41 = vpop.permute.xlu1 %4425 }
 0x72a   :  { %v4428_v38 = vpop.permute.xlu0 %4427  ;;  %v4445_v13 = vmax.f32 %v4413_v12, %v4426_v41  ;;  %v5819_v41 = vld [vmem:[%s9356_s11 + $0x60] sm:$0xff]  ;;  %6536 = vmatpush3.bf16.msra.mxu1 %v6535_v25 }
 0x72b   :  { %v4446_v27 = vmax.f32 %v4414_v29, %v4428_v38  ;;  %v5820_v38 = vld [vmem:[%s9356_s11 + $0x68] sm:$0xff]  ;;  %6537 = vmatprep.subr.bf16.mxu1 %v9459_v59 }
 0x72c   :  { %v5824_v29 = vld [vmem:[%s9356_s11 + $0x88] sm:$0xff] }
 0x72d   :  { %v4458_v53 = vpop.permute.xlu1 %4457 }
 0x72e   :  { %v4460_v50 = vpop.permute.xlu0 %4459  ;;  %v4477_v11 = vmax.f32 %v4445_v13, %v4458_v53  ;;  %v6538_v53 = vpack.c.bf16 %v5820_v38, %v5819_v41  ;;  %v5402_v38 = vld [vmem:[%s9356_s11 + $0x10] sm:$0xff] }
 0x72f   :  { %v4478_v22 = vmax.f32 %v4446_v27, %v4460_v50  ;;  %v5821_v50 = vld [vmem:[%s9356_s11 + $0x70] sm:$0xff] }
 0x730   :  { %6539 = vmatpush3.bf16.msra.mxu1 %v6538_v53  ;;  %v5825_v27 = vld [vmem:[%s9356_s11 + $0x90] sm:$0xff]  ;;  %v5403_v53 = vld [vmem:[%s9356_s11 + $0x18] sm:$0xff] }
 0x731   :  { %v4490_v20 = vpop.permute.xlu1 %4489  ;;  %6540 = vmatprep.subr.bf16.mxu1 %v9459_v59 }
 0x732   :  { %v4492_v43 = vpop.permute.xlu0 %4491  ;;  %v4509_v52 = vmax.f32 %v4477_v11, %v4490_v20  ;;  %v5822_v20 = vld [vmem:[%s9356_s11 + $0x78] sm:$0xff] }
 0x733   :  { %v4510_v34 = vmax.f32 %v4478_v22, %v4492_v43  ;;  %v6541_v12 = vpack.c.bf16 %v5822_v20, %v5821_v50  ;;  %v5823_v43 = vld [vmem:[%s9356_s11 + $0x80] sm:$0xff]  ;;  %v4762_v22 = vld [vmem:[%s9355_s10 + $0x8] sm:$0x3]  ;;  %v6553_v50 = vpack.c.bf16 %v5403_v53, %v5402_v38 }
 0x734   :  { %v6544_v13 = vpack.c.bf16 %v5824_v29, %v5823_v43  ;;  %v5404_v20 = vld [vmem:[%s9356_s11 + $0x20] sm:$0xff]  ;;  %v5406_v29 = vld [vmem:[%s9356_s11 + $0x30] sm:$0xff] }
 0x735   :  { %v4522_v44 = vpop.permute.xlu1 %4521  ;;  %6542 = vmatpush3.bf16.msra.mxu1 %v6541_v12  ;;  %v5405_v12 = vld [vmem:[%s9356_s11 + $0x28] sm:$0xff] }
 0x736   :  { %v4524_v7 = vpop.permute.xlu0 %4523  ;;  %v4541_v9 = vmax.f32 %v4509_v52, %v4522_v44  ;;  %6543 = vmatprep.subr.bf16.mxu1 %v9459_v59  ;;  %v5826_v44 = vld [vmem:[%s9356_s11 + $0x98] sm:$0xff]  ;;  %v6556_v43 = vpack.c.bf16 %v5405_v12, %v5404_v20 }
 0x737   :  { %v4542_v57 = vmax.f32 %v4510_v34, %v4524_v7  ;;  %v6547_v11 = vpack.c.bf16 %v5826_v44, %v5825_v27  ;;  %v4761_v7 = vld [vmem:[%s9355_s10] sm:$0xff] }
 0x738   :  { %v6507_v52 = vpack.c.bf16 %v4762_v22, %v4761_v7  ;;  %v5408_v44 = vld [vmem:[%s9356_s11 + $0x40] sm:$0xff]  ;;  %v5840_v22 = vld [vmem:[%s9356_s11 + $0xf0] sm:$0xff] }
 0x739   :  { %v4554_v60 = vpop.permute.xlu1 %4553  ;;  %6545 = vmatpush3.bf16.msra.mxu1 %v6544_v13  ;;  %v5407_v13 = vld [vmem:[%s9356_s11 + $0x38] sm:$0xff] }
 0x73a   :  { %v4556_v39 = vpop.permute.xlu0 %4555  ;;  %v4573_v23 = vmax.f32 %v4541_v9, %v4554_v60  ;;  %6546 = vmatprep.subr.bf16.mxu1 %v9459_v59  ;;  %v5793_v9 = vld [vmem:[%s9355_s10 + $0x20] sm:$0xff]  ;;  %v6559_v27 = vpack.c.bf16 %v5407_v13, %v5406_v29 }
 0x73b   :  { %v4574_v54 = vmax.f32 %v4542_v57, %v4556_v39  ;;  %v5794_v39 = vld [vmem:[%s9355_s10 + $0x28] sm:$0x3] }
 0x73c   :  { %v6511_v57 = vpack.c.bf16 %v5794_v39, %v5793_v9  ;;  %v5843_v9 = vld [vmem:[%s9356_s11 + $0x108] sm:$0xff] }
 0x73d   :  { %v4586_v19 = vpop.permute.xlu1 %4585  ;;  %6548 = vmatpush3.bf16.msra.mxu1 %v6547_v11  ;;  %v5409_v11 = vld [vmem:[%s9356_s11 + $0x48] sm:$0xff] }
 0x73e   :  { %v4605_v5 = vmax.f32 %v4573_v23, %v4586_v19  ;;  %v4588_v16 = vpop.permute.xlu0 %4587  ;;  %6549 = vmatprep.subr.bf16.mxu1 %v9459_v59  ;;  %v5797_v23 = vld [vmem:[%s9355_s10 + $0x30] sm:$0xff]  ;;  %v6562_v7 = vpack.c.bf16 %v5409_v11, %v5408_v44 }
 0x73f   :  { %v4606_v61 = vmax.f32 %v4574_v54, %v4588_v16  ;;  %v5798_v54 = vld [vmem:[%s9355_s10 + $0x38] sm:$0x3] }
 0x740   :  { %v4613_v8 = vmax.f32 %v4605_v5, 0.0  ;;  %v6515_v19 = vpack.c.bf16 %v5798_v54, %v5797_v23  ;;  %v5845_v23 = vld [vmem:[%s9356_s11 + $0x118] sm:$0xff] }
 0x741   :  { %v4614_v47 = vmax.f32 %v4606_v61, 0.0  ;;  %v4398_v6 = vpop.permute.xlu1 %4397  ;;  %v5801_v61 = vld [vmem:[%s9355_s10 + $0x40] sm:$0xff] }
 0x742   :  { %v4400_v24 = vpop.permute.xlu0 %4399  ;;  %6120 = vmatprep.mubr.msk.f32.mxu1 %vm4627_vm13, %v4613_v8  ;;  %v4415_v31 = vmax.f32 %v9031_v49, %v4398_v6  ;;  %v5802_v8 = vld [vmem:[%s9355_s10 + $0x48] sm:$0x3]  ;;  %v5805_v6 = vld [vmem:[%s9355_s10 + $0x50] sm:$0xff] }
 0x743   :  { %6121 = vmatmul.mubr.msk.f32.gmra.mrb[46].mxu1 %vm4627_vm13, %v4614_v47  ;;  %v4416_v51 = vmax.f32 %v9033_v0, %v4400_v24  ;;  %v6519_v47 = vpack.c.bf16 %v5802_v8, %v5801_v61  ;;  %v5806_v24 = vld [vmem:[%s9355_s10 + $0x58] sm:$0x3] }
 0x744   :  { %v5849_v61 = vld [vmem:[%s9356_s11 + $0x138] sm:$0xff] }
 0x745   :  { %v4430_v10 = vpop.permute.xlu1 %4429 }
 0x746   :  { %v4432_v56 = vpop.permute.xlu0 %4431  ;;  %v4447_v4 = vmax.f32 %v4415_v31, %v4430_v10  ;;  %v6523_v10 = vpack.c.bf16 %v5806_v24, %v5805_v6 }
 0x747   :  { %v4448_v37 = vmax.f32 %v4416_v51, %v4432_v56  ;;  %v5814_v51 = vld [vmem:[%s9355_s10 + $0x78] sm:$0x3] }
 0x749   :  { %v4462_v26 = vpop.permute.xlu1 %4461 }
 0x74a   :  { %v4464_v21 = vpop.permute.xlu0 %4463  ;;  %v4479_v15 = vmax.f32 %v4447_v4, %v4462_v26 }
 0x74b   :  { %v4480_v45 = vmax.f32 %v4448_v37, %v4464_v21  ;;  %v5809_v21 = vld [vmem:[%s9355_s10 + $0x60] sm:$0xff] }
 0x74d   :  { %v4494_v3 = vpop.permute.xlu1 %4493 }
 0x74e   :  { %v4496_v48 = vpop.permute.xlu0 %4495  ;;  %v4511_v32 = vmax.f32 %v4479_v15, %v4494_v3  ;;  %v5810_v3 = vld [vmem:[%s9355_s10 + $0x68] sm:$0x3]  ;;  %v5829_v15 = vld [vmem:[%s9356_s11 + $0xa0] sm:$0xff] }
 0x74f   :  { %v4512_v46 = vmax.f32 %v4480_v45, %v4496_v48  ;;  %v6527_v31 = vpack.c.bf16 %v5810_v3, %v5809_v21  ;;  %v5813_v48 = vld [vmem:[%s9355_s10 + $0x70] sm:$0xff] }
 0x750   :  { %v6531_v4 = vpack.c.bf16 %v5814_v51, %v5813_v48  ;;  %v5851_v51 = vld [vmem:[%s9357_s12] ss:$0 sm:$0xff] }
 0x751   :  { %v4526_v58 = vpop.permute.xlu1 %4525 }
 0x752   :  { %v4528_v36 = vpop.permute.xlu0 %4527  ;;  %v4543_v28 = vmax.f32 %v4511_v32, %v4526_v58  ;;  %v5831_v32 = vld [vmem:[%s9356_s11 + $0xb0] sm:$0xff] }
 0x753   :  { %v4544_v30 = vmax.f32 %v4512_v46, %v4528_v36  ;;  %v5830_v36 = vld [vmem:[%s9356_s11 + $0xa8] sm:$0xff]  ;;  %v6568_v46 = vpack.c.bf16 %v5832_v18, %v5831_v32 }
 0x754   :  { %v6565_v45 = vpack.c.bf16 %v5830_v36, %v5829_v15 }
 0x755   :  { %v4558_v63 = vpop.permute.xlu1 %4557 }
 0x756   :  { %v4560_v14 = vpop.permute.xlu0 %4559  ;;  %v4575_v17 = vmax.f32 %v4543_v28, %v4558_v63  ;;  %v5833_v63 = vld [vmem:[%s9356_s11 + $0xc0] sm:$0xff]  ;;  %v5834_v28 = vld [vmem:[%s9356_s11 + $0xc8] sm:$0xff] }
 0x757   :  { %v4576_v35 = vmax.f32 %v4544_v30, %v4560_v14  ;;  %v6571_v14 = vpack.c.bf16 %v5834_v28, %v5833_v63  ;;  %v5835_v30 = vld [vmem:[%s9356_s11 + $0xd0] sm:$0xff] }
 0x759   :  { %v4590_v42 = vpop.permute.xlu1 %4589 }
 0x75a   :  { %v4607_v55 = vmax.f32 %v4575_v17, %v4590_v42  ;;  %v4592_v49 = vpop.permute.xlu0 %4591  ;;  %v5836_v17 = vld [vmem:[%s9356_s11 + $0xd8] sm:$0xff]  ;;  %v5837_v42 = vld [vmem:[%s9356_s11 + $0xe0] sm:$0xff] }
 0x75b   :  { %v4608_v40 = vmax.f32 %v4576_v35, %v4592_v49  ;;  %v6574_v35 = vpack.c.bf16 %v5836_v17, %v5835_v30 }
 0x75c   :  { %v4615_v33 = vmax.f32 %v4607_v55, 0.0  ;;  %v5838_v55 = vld [vmem:[%s9356_s11 + $0xe8] sm:$0xff] }
 0x75d   :  { %v4616_v0 = vmax.f32 %v4608_v40, 0.0  ;;  %v6577_v49 = vpack.c.bf16 %v5838_v55, %v5837_v42  ;;  %v5400_v40 = vld [vmem:[%s9356_s11] sm:$0xff] }
 0x75e   :  { %6123 = vmatprep.mubr.msk.f32.mxu1 %vm4627_vm13, %v4615_v33  ;;  %v5401_v33 = vld [vmem:[%s9356_s11 + $0x8] sm:$0xff] }
 0x75f   :  { %6124 = vmatmul.mubr.msk.f32.gmra.mrb[48].mxu1 %vm4627_vm13, %v4616_v0  ;;  %v6550_v1 = vpack.c.bf16 %v5401_v33, %v5400_v40 }
 0x760   :  { %6202 = vmatprep.mubr.msk.f32.mxu1 %vm7194_vm14, %v9462_v62 }
 0x7de   :  { %v6116_v34 = vpop.f32.mrb[42].mxu1 }
 0x7df   :  { %v4722_v60 = vpop.f32.mrb[43].mxu1  ;;  %6131 = vmatmul.mubr.msk.f32.vlgmr.msra.gmra.mrb[52].mxu0 %vm4766_vm15, %v6116_v34 }
 0x7e0   :  { %6509 = vmatpush3.bf16.msk.msra.mxu0 %vm9054_vm12, %v6507_v52  ;;  %6137 = vmatprep.mubr.msk.f32.mxu0 %vm7194_vm14, %v9462_v62  ;;  %v5841_v52 = vld [vmem:[%s9356_s11 + $0xf8] sm:$0xff] }
 0x7e1   :  { %6510 = vmatprep.subr.bf16.mxu0 %v9459_v59  ;;  %v6580_v34 = vpack.c.bf16 %v5841_v52, %v5840_v22 }
 0x7e7   :  { %6138 = vmatmul.mubr.msk.f32.vlgmr.msra.gmra.mrb[52].mxu0 %vm4766_vm15, %v4722_v60  ;;  %v5842_v60 = vld [vmem:[%s9356_s11 + $0x100] sm:$0xff] }
 0x7e8   :  { %6513 = vmatpush3.bf16.msk.msra.mxu0 %vm9054_vm12, %v6511_v57  ;;  %6144 = vmatprep.mubr.msk.f32.mxu0 %vm7194_vm14, %v9462_v62  ;;  %v6583_v39 = vpack.c.bf16 %v5843_v9, %v5842_v60  ;;  %v5844_v57 = vld [vmem:[%s9356_s11 + $0x110] sm:$0xff] }
 0x7e9   :  { %6514 = vmatprep.subr.bf16.mxu0 %v9459_v59  ;;  %v6586_v54 = vpack.c.bf16 %v5845_v23, %v5844_v57 }
 0x7fa   :  { %v6119_v5 = vpop.f32.mrb[44].mxu1 }
 0x7fb   :  { %v4732_v16 = vpop.f32.mrb[45].mxu1 }
 0x7fc   :  { %6145 = vmatmul.mubr.msk.f32.vlgmr.msra.gmra.mrb[52].mxu0 %vm4766_vm15, %v4732_v16  ;;  %v5848_v16 = vld [vmem:[%s9356_s11 + $0x130] sm:$0xff] }
 0x7fd   :  { %6517 = vmatpush3.bf16.msk.msra.mxu0 %vm9054_vm12, %v6515_v19  ;;  %6151 = vmatprep.mubr.msk.f32.mxu0 %vm7194_vm14, %v9462_v62  ;;  %v5846_v19 = vld [vmem:[%s9356_s11 + $0x120] sm:$0xff]  ;;  %v6592_v8 = vpack.c.bf16 %v5849_v61, %v5848_v16 }
 0x7fe   :  { %6518 = vmatprep.subr.bf16.mxu0 %v9459_v59 }
 0x804   :  { %6152 = vmatmul.mubr.msk.f32.vlgmr.msra.gmra.mrb[52].mxu0 %vm4766_vm15, %v6119_v5 }
 0x805   :  { %6521 = vmatpush3.bf16.msk.msra.mxu0 %vm9054_vm12, %v6519_v47  ;;  %6158 = vmatprep.mubr.msk.f32.mxu0 %vm7194_vm14, %v9462_v62 }
 0x806   :  { %6522 = vmatprep.subr.bf16.mxu0 %v9459_v59 }
 0x816   :  { %v6122_v56 = vpop.f32.mrb[46].mxu1 }
 0x817   :  { %v4742_v26 = vpop.f32.mrb[47].mxu1 }
 0x818   :  { %6159 = vmatmul.mubr.msk.f32.vlgmr.msra.gmra.mrb[52].mxu0 %vm4766_vm15, %v4742_v26 }
 0x819   :  { %6525 = vmatpush3.bf16.msk.msra.mxu0 %vm9054_vm12, %v6523_v10  ;;  %6165 = vmatprep.mubr.msk.f32.mxu0 %vm7194_vm14, %v9462_v62 }
 0x81a   :  { %6526 = vmatprep.subr.bf16.mxu0 %v9459_v59 }
 0x820   :  { %6166 = vmatmul.mubr.msk.f32.vlgmr.msra.gmra.mrb[52].mxu0 %vm4766_vm15, %v6122_v56 }
 0x821   :  { %6529 = vmatpush3.bf16.msk.msra.mxu0 %vm9054_vm12, %v6527_v31  ;;  %6172 = vmatprep.mubr.msk.f32.mxu0 %vm7194_vm14, %v9462_v62 }
 0x822   :  { %6530 = vmatprep.subr.bf16.mxu0 %v9459_v59 }
 0x832   :  { %v6125_v37 = vpop.f32.mrb[48].mxu1 }
 0x833   :  { %v4752_v58 = vpop.f32.mrb[49].mxu1 }
 0x834   :  { %6173 = vmatmul.mubr.msk.f32.vlgmr.msra.gmra.mrb[52].mxu0 %vm4766_vm15, %v4752_v58 }
 0x835   :  { %6533 = vmatpush3.bf16.msk.msra.mxu0 %vm9054_vm12, %v6531_v4  ;;  %6179 = vmatprep.mubr.msk.f32.mxu0 %vm7194_vm14, %v9462_v62 }
 0x836   :  { %6564 = vmatprep.subr.bf16.mxu0 %v9459_v59 }
 0x83c   :  { %6180 = vmatmul.mubr.msk.f32.vlgmr.msra.gmra.mrb[52].mxu0 %vm4766_vm15, %v6125_v37 }
 0x83d   :  { %6566 = vmatpush3.bf16.msra.mxu0 %v6565_v45  ;;  %6248 = vmatprep.mubr.msk.f32.mxu0 %vm7194_vm14, %v9462_v62 }
 0x83e   :  { %6567 = vmatprep.subr.bf16.mxu0 %v9459_v59 }
 0x841   :  { %6569 = vmatpush3.bf16.msra.mxu0 %v6568_v46 }
 0x842   :  { %6570 = vmatprep.subr.bf16.mxu0 %v9459_v59 }
 0x845   :  { %6572 = vmatpush3.bf16.msra.mxu0 %v6571_v14 }
 0x846   :  { %6573 = vmatprep.subr.bf16.mxu0 %v9459_v59 }
 0x849   :  { %6575 = vmatpush3.bf16.msra.mxu0 %v6574_v35 }
 0x84a   :  { %6576 = vmatprep.subr.bf16.mxu0 %v9459_v59 }
 0x84d   :  { %6578 = vmatpush3.bf16.msra.mxu0 %v6577_v49 }
 0x90f   :  { %v5395_v0 = vpop.f32.mrb[52].mxu0 }
 0x910   :  { %v5422_v2 = vrot.slane %v5395_v0, 2  ;;  %v5579_v25 = vrot.slane %v5395_v0, 4  ;;  %v6181_v41 = vpop.f32.mrb[53].mxu0  ;;  %v5664_v47 = vrot.slane %v5395_v0, 6 }
 0x912   :  { %6203 = vmatmul.mubr.msk.f32.vlgmr.msra.gmra.mrb[50].mxu1 %vm5423_vm0, %v5422_v2  ;;  %6249 = vmatmul.mubr.msk.f32.vlgmr.msra.gmra.mrb[54].mxu0 %vm5423_vm0, %v5579_v25 }
 0x913   :  { %6551 = vmatpush3.bf16.msra.mxu1 %v6550_v1  ;;  %6225 = vmatprep.mubr.msk.f32.mxu1 %vm7194_vm14, %v9462_v62 }
 0x914   :  { %6552 = vmatprep.subr.bf16.mxu1 %v9459_v59 }
 0x917   :  { %6554 = vmatpush3.bf16.msra.mxu1 %v6553_v50 }
 0x918   :  { %6555 = vmatprep.subr.bf16.mxu1 %v9459_v59 }
 0x91b   :  { %6557 = vmatpush3.bf16.msra.mxu1 %v6556_v43 }
 0x91c   :  { %6558 = vmatprep.subr.bf16.mxu1 %v9459_v59 }
 0x91f   :  { %6560 = vmatpush3.bf16.msra.mxu1 %v6559_v27 }
 0x920   :  { %6561 = vmatprep.subr.bf16.mxu1 %v9459_v59 }
 0x923   :  { %6563 = vmatpush3.bf16.msra.mxu1 %v6562_v7 }
 0x924   :  { %6579 = vmatprep.subr.bf16.mxu1 %v9459_v59 }
 0x926   :  { %6226 = vmatmul.mubr.msk.f32.vlgmr.msra.gmra.mrb[52].mxu1 %vm5423_vm0, %v5395_v0 }
 0x927   :  { %6581 = vmatpush3.bf16.msra.mxu1 %v6580_v34  ;;  %6271 = vmatprep.mubr.msk.f32.mxu1 %vm7194_vm14, %v9462_v62  ;;  %v5847_v62 = vld [vmem:[%s9356_s11 + $0x128] sm:$0xff]  ;;  %s7195_s11 = smov [#allocation2]  }
 0x928   :  { %6582 = vmatprep.subr.bf16.mxu1 %v9459_v59  ;;  %v6589_v5 = vpack.c.bf16 %v5847_v62, %v5846_v19  ;;  %s5754_s30 = sshll.u32 %s7195_s11, 4  ;;  %s5755_s30 = int_to_ptr.vmem [resolvable:$true] %s5754_s30 }
 0x929   :  { %s7159_s20 = scalar_lea.vmem %s5755_s30, 32  ;;  %p7164_p1 = scmp.lt.s32.totalorder %s5755_s30, %s5755_s30 }
 0x92a   :  { %p7160_p0 = scmp.ne.s32.totalorder %s5755_s30, %s7159_s20  ;;  %p7165_p2 = scmp.lt.s32.totalorder %s7159_s20, %s7159_s20 }
 0x92b   :  { %6584 = vmatpush3.bf16.msra.mxu1 %v6583_v39 }
 0x92c   :  { %6585 = vmatprep.subr.bf16.mxu1 %v9459_v59  ;;  %p7166_p3 = por %p7165_p2, %p7164_p1 }
 0x92e   :  { %p7167_p4 = pnand %p7166_p3, %p7160_p0 }
 0x92f   :  { %6587 = vmatpush3.bf16.msra.mxu1 %v6586_v54 }
 0x930   :  { %6588 = vmatprep.subr.bf16.mxu1 %v9459_v59 }
 0x933   :  { %6590 = vmatpush3.bf16.msra.mxu1 %v6589_v5 }
 0x934   :  { %6591 = vmatprep.subr.bf16.mxu1 %v9459_v59 }
 0x937   :  { %6593 = vmatpush3.bf16.msra.mxu1 %v6592_v8 }
 0x93a   :  { %6272 = vmatmul.mubr.msk.f32.vlgmr.msra.gmra.mrb[54].mxu1 %vm5423_vm0, %v5664_v47 }
 0x9e5   :  { %v5492_v6 = vpop.f32.mrb[50].mxu1  ;;  %v5648_v24 = vpop.f32.mrb[54].mxu0 }
 0x9e6   :  { %v6204_v10 = vpop.f32.mrb[51].mxu1  ;;  %v6250_v56 = vpop.f32.mrb[55].mxu0 }
 0x9f9   :  { %v5564_v26 = vpop.f32.mrb[52].mxu1 }
 0x9fa   :  { %v5565_v21 = vadd.f32 %v5564_v26, %v5492_v6  ;;  %v6227_v3 = vpop.f32.mrb[53].mxu1 }
 0x9fc   :  { %v5652_v31 = vadd.f32 %v5648_v24, %v5565_v21 }
 0xa0d   :  { %v5733_v48 = vpop.f32.mrb[54].mxu1 }
 0xa0e   :  { %v5737_v59 = vadd.f32 %v5733_v48, %v5652_v31  ;;  %v6273_v4 = vpop.f32.mrb[55].mxu1 }
 0xa10   :  { %v5745_v37 = vadd.f32 %v5851_v51, %v5737_v59 }
 0xa12   :  { %5747 = vst.msk [vmem:[#allocation2] sm:$0x3] %vm5746_vm1, %v5745_v37 }
 0xa13   :  { %7170 = shalt.err (!%p7167_p4)
}
 0xa14   :  { %s7171_s5 = scalar_lea.hbm %s9358_s13, 32 }
 0xa15   :  { %p7172_p5 = scmp.ne.s32.totalorder %s9358_s13, %s7171_s5  ;;  %p7175_p6 = scmp.lt.u32.totalorder %s7171_s5, %s9358_s13 }
 0xa17   :  { %p7177_p7 = pnand %p7175_p6, %p7172_p5 }
 0xa19   :  { %7180 = shalt.err (!%p7177_p7)
}
 0xa1a   :  { %5757 = dma.vmem_to_hbm [thread:$0]  %s5755_s30, 32, %s9358_s13, [#allocation3]  }
 0xa1b   :  { %7181 = dma.done.wait [#allocation3], 32  }
 0xa1c   :  { %7182 = vsyncadd [#allocation3], 4294967264 }
 0xa1d   :  { %5761 = vsyncpa [#allocation3], 1 }

</bundles_post_ra>
